<compile_context>
chip_gen: v7x
topology: tpu7x:2x2x1
jax: 0.10.0
libtpu: 0.0.40
codegen_flags: <defaults>
</compile_context>

<pallas_src>
import numpy as np
import jax
import jax.numpy as jnp
from jax.experimental import pallas as pl
from jax.experimental.pallas import tpu as pltpu


# --------------------------------------------------------------------------
# Kernel
# --------------------------------------------------------------------------
def _model_kernel(x2_ref, h0_ref, c0_ref,
                  wih_fb_ref, whhf_ref, whhb_ref, bfb_ref,
                  wih2_ref, whh2_ref, b2_ref,
                  wfc1_ref, bfc1_ref, wfc2_ref, bfc2_ref,
                  out_ref, hseq_scr):
    B = h0_ref.shape[1]
    Hp = h0_ref.shape[2]
    T = x2_ref.shape[0] // B
    G = 4 * Hp

    # ---- Hoisted LSTM1 input projection: both directions in ONE matmul ----
    gin = (jnp.dot(x2_ref[...], wih_fb_ref[...],
                   preferred_element_type=jnp.float32) + bfb_ref[...])  # (T*B, 8Hp)

    whh_f = whhf_ref[...]
    whh_b = whhb_ref[...]

    def cell(gates, c):
        # PyTorch gate order (i, f, g, o); each slice is a full 128-lane block.
        i = jax.nn.sigmoid(gates[:, 0 * Hp:1 * Hp])
        f = jax.nn.sigmoid(gates[:, 1 * Hp:2 * Hp])
        g = jnp.tanh(gates[:, 2 * Hp:3 * Hp])
        o = jax.nn.sigmoid(gates[:, 3 * Hp:4 * Hp])
        c_new = f * c + i * g
        return o * jnp.tanh(c_new), c_new

    # ---- LSTM1: fused bidirectional recurrence, fully unrolled ----
    h_f, c_f = h0_ref[0], c0_ref[0]
    h_b, c_b = h0_ref[1], c0_ref[1]
    for t in range(T):
        tb = T - 1 - t
        g_f = (jnp.dot(h_f, whh_f, preferred_element_type=jnp.float32)
               + gin[t * B:(t + 1) * B, 0:G])
        g_b = (jnp.dot(h_b, whh_b, preferred_element_type=jnp.float32)
               + gin[tb * B:(tb + 1) * B, G:2 * G])
        h_f, c_f = cell(g_f, c_f)
        h_b, c_b = cell(g_b, c_b)
        # fwd hidden -> lanes [0:Hp], bwd hidden -> lanes [Hp:2Hp]
        # (both lane-tile aligned) of a single sequence buffer.
        hseq_scr[t * B:(t + 1) * B, 0:Hp] = h_f
        hseq_scr[tb * B:(tb + 1) * B, Hp:2 * Hp] = h_b

    # ---- Hoisted LSTM2 input projection: ONE matmul over fwd|bwd sequence ----
    gin2 = (jnp.dot(hseq_scr[...], wih2_ref[...],
                    preferred_element_type=jnp.float32) + b2_ref[...])  # (T*B, 4Hp)

    # ---- LSTM2 recurrence (zero initial state), fully unrolled ----
    whh2 = whh2_ref[...]
    h2 = jnp.zeros((B, Hp), jnp.float32)
    c2 = jnp.zeros((B, Hp), jnp.float32)
    for t in range(T):
        g2 = (jnp.dot(h2, whh2, preferred_element_type=jnp.float32)
              + gin2[t * B:(t + 1) * B, :])
        h2, c2 = cell(g2, c2)

    # ---- Head: out[:, -1, :] == h2 -> relu(fc1) -> (dropout = id) -> fc2 ----
    z = jnp.maximum(
        jnp.dot(h2, wfc1_ref[...], preferred_element_type=jnp.float32)
        + bfc1_ref[...], 0.0)
    out_ref[...] = (jnp.dot(z, wfc2_ref[...], preferred_element_type=jnp.float32)
                    + bfc2_ref[...])


# --------------------------------------------------------------------------
# One-time weight preparation (model-load time, not per forward call)
# --------------------------------------------------------------------------
def _pad_rows(w_t, rows_to):
    return jnp.pad(w_t, ((0, rows_to - w_t.shape[0]), (0, 0)))


def _pad_gate_cols(w_t, H, Hp):
    """(rows, 4H) -> (rows, 4Hp): widen each PyTorch gate block (i|f|g|o) H->Hp."""
    return jnp.concatenate(
        [jnp.pad(w_t[:, k * H:(k + 1) * H], ((0, 0), (0, Hp - H))) for k in range(4)],
        axis=1)


def _prep_gate_b(b_ih, b_hh, H, Hp):
    b = b_ih + b_hh
    return jnp.concatenate(
        [jnp.pad(b[k * H:(k + 1) * H], (0, Hp - H)) for k in range(4)]
    ).reshape(1, 4 * Hp)


def prepare_params(p, H, Hp=128, Fp=128):
    F = p['w_fc1'].shape[0]          # fc1 width (64)
    C = p['w_fc2'].shape[0]          # num classes
    # LSTM1: fwd|bwd input-projection weights concatenated along the output
    # dim so both directions' gates come from one matmul.
    wih_fb = jnp.concatenate(
        [_pad_gate_cols(jnp.transpose(p['w_ih_f']), H, Hp),
         _pad_gate_cols(jnp.transpose(p['w_ih_b']), H, Hp)], axis=1)       # (I, 8Hp)
    b_fb = jnp.concatenate(
        [_prep_gate_b(p['b_ih_f'], p['b_hh_f'], H, Hp),
         _prep_gate_b(p['b_ih_b'], p['b_hh_b'], H, Hp)], axis=1)           # (1, 8Hp)
    # LSTM2 input weight: rows are concat(fwd_H, bwd_H); re-block so the fwd
    # rows land on [0:H] of the first Hp block and bwd rows on [0:H] of the
    # second Hp block (matching the hseq scratch layout).
    w2_t = jnp.transpose(p['w_ih2'])                                        # (2H, 4H)
    wih2 = _pad_gate_cols(
        jnp.concatenate([_pad_rows(w2_t[:H], Hp), _pad_rows(w2_t[H:], Hp)], axis=0),
        H, Hp)                                                              # (2Hp, 4Hp)
    return dict(
        wih_fb=wih_fb, b_fb=b_fb,
        whh_f=_pad_gate_cols(_pad_rows(jnp.transpose(p['w_hh_f']), Hp), H, Hp),
        whh_b=_pad_gate_cols(_pad_rows(jnp.transpose(p['w_hh_b']), Hp), H, Hp),
        wih2=wih2,
        whh2=_pad_gate_cols(_pad_rows(jnp.transpose(p['w_hh2']), Hp), H, Hp),
        b2=_prep_gate_b(p['b_ih2'], p['b_hh2'], H, Hp),
        # fc1/fc2 padded so the intermediate activation z is a full 128-lane block.
        wfc1=jnp.pad(jnp.transpose(p['w_fc1']), ((0, Hp - H), (0, Fp - F))),
        bfc1=jnp.pad(p['b_fc1'], (0, Fp - F)).reshape(1, Fp),
        wfc2=jnp.pad(jnp.transpose(p['w_fc2']), ((0, Fp - F), (0, 0))),
        bfc2=p['b_fc2'].reshape(1, C),
    )


# --------------------------------------------------------------------------
# Forward wrapper
# --------------------------------------------------------------------------
def improved_lstm_forward(x, h0, c0, prep, *, Hp=128):
    B, T, I = x.shape
    H = h0.shape[-1]
    C = prep['wfc2'].shape[1]

    # time-major, flattened so row index = t*B + b
    x2 = jnp.transpose(x, (1, 0, 2)).reshape(T * B, I)
    h0p = jnp.pad(h0, ((0, 0), (0, 0), (0, Hp - H)))
    c0p = jnp.pad(c0, ((0, 0), (0, 0), (0, Hp - H)))

    args = (x2, h0p, c0p,
            prep['wih_fb'], prep['whh_f'], prep['whh_b'], prep['b_fb'],
            prep['wih2'], prep['whh2'], prep['b2'],
            prep['wfc1'], prep['bfc1'], prep['wfc2'], prep['bfc2'])

    vmem = pltpu.MemorySpace.VMEM
    return pl.pallas_call(
        _model_kernel,
        out_shape=jax.ShapeDtypeStruct((B, C), jnp.float32),
        in_specs=[pl.BlockSpec(memory_space=vmem)] * len(args),
        out_specs=pl.BlockSpec(memory_space=vmem),
        scratch_shapes=[pltpu.VMEM((T * B, 2 * Hp), jnp.float32)],  # fwd|bwd seq
    )(*args)


# ---------------- pure-numpy reference (exact PyTorch semantics) ----------------
def reference_forward(x, h0, c0, p):
    def sig(v):
        return 1.0 / (1.0 + np.exp(-v))

    def cell(x_t, h, c, wih, whh, bih, bhh):
        gates = x_t @ wih.T + h @ whh.T + bih + bhh
        i, f, g, o = np.split(gates, 4, axis=-1)
        i, f, o, g = sig(i), sig(f), sig(o), np.tanh(g)
        c = f * c + i * g
        h = o * np.tanh(c)
        return h, c

    B, T, _ = x.shape
    H = h0.shape[-1]
    hf, cf = h0[0], c0[0]
    hb, cb = h0[1], c0[1]
    fwd_out = np.zeros((B, T, H), np.float32)
    bwd_out = np.zeros((B, T, H), np.float32)
    for t in range(T):
        hf, cf = cell(x[:, t], hf, cf, p['w_ih_f'], p['w_hh_f'],
                      p['b_ih_f'], p['b_hh_f'])
        fwd_out[:, t] = hf
    for t in range(T - 1, -1, -1):
        hb, cb = cell(x[:, t], hb, cb, p['w_ih_b'], p['w_hh_b'],
                      p['b_ih_b'], p['b_hh_b'])
        bwd_out[:, t] = hb
    seq = np.concatenate([fwd_out, bwd_out], axis=-1)
    h2 = np.zeros((B, H), np.float32)
    c2 = np.zeros((B, H), np.float32)
    for t in range(T):
        h2, c2 = cell(seq[:, t], h2, c2, p['w_ih2'], p['w_hh2'],
                      p['b_ih2'], p['b_hh2'])
    z = np.maximum(h2 @ p['w_fc1'].T + p['b_fc1'], 0.0)
    return z @ p['w_fc2'].T + p['b_fc2']


if __name__ == "__main__":
    # batch, seq, input_size, hidden_size (per module spec), num_classes
    B, T, I, H, C = 2, 8, 16, 64, 4
    Hp = 128

    key = jax.random.PRNGKey(0)
    keys = jax.random.split(key, 17)

    def u(k, shape, bound):
        return jax.random.uniform(k, shape, jnp.float32, -bound, bound)

    kH = 1.0 / np.sqrt(H)
    kF = 1.0 / np.sqrt(64)
    params = {
        'w_ih_f': u(keys[0], (4 * H, I), kH), 'w_hh_f': u(keys[1], (4 * H, H), kH),
        'b_ih_f': u(keys[2], (4 * H,), kH),   'b_hh_f': u(keys[3], (4 * H,), kH),
        'w_ih_b': u(keys[4], (4 * H, I), kH), 'w_hh_b': u(keys[5], (4 * H, H), kH),
        'b_ih_b': u(keys[6], (4 * H,), kH),   'b_hh_b': u(keys[7], (4 * H,), kH),
        'w_ih2': u(keys[8], (4 * H, 2 * H), kH), 'w_hh2': u(keys[9], (4 * H, H), kH),
        'b_ih2': u(keys[10], (4 * H,), kH),   'b_hh2': u(keys[11], (4 * H,), kH),
        'w_fc1': u(keys[12], (64, H), kH),    'b_fc1': u(keys[13], (64,), kH),
        'w_fc2': u(keys[14], (C, 64), kF),    'b_fc2': u(keys[15], (C,), kF),
    }
    x = jax.random.normal(keys[16], (B, T, I), jnp.float32)
    h0 = jnp.zeros((2, B, H), jnp.float32)   # (num_directions, B, H)
    c0 = jnp.zeros((2, B, H), jnp.float32)

    prep = prepare_params(params, H, Hp)     # one-time, model-load path
    out = improved_lstm_forward(x, h0, c0, prep, Hp=Hp)
    out = jax.block_until_ready(out)

    ref = reference_forward(np.asarray(x), np.asarray(h0), np.asarray(c0),
                            {k: np.asarray(v) for k, v in params.items()})
    np.testing.assert_allclose(np.asarray(out), ref, rtol=1e-4, atol=1e-4)
    print("KERNEL_OK")
</pallas_src>

<mosaic_0001>
module attributes {stable_mosaic.version = 11 : i64} {
  func.func @_model_kernel(%arg0: memref<16x16xf32, #tpu.memory_space<vmem>>, %arg1: memref<2x2x128xf32, #tpu.memory_space<vmem>>, %arg2: memref<2x2x128xf32, #tpu.memory_space<vmem>>, %arg3: memref<16x1024xf32, #tpu.memory_space<vmem>>, %arg4: memref<128x512xf32, #tpu.memory_space<vmem>>, %arg5: memref<128x512xf32, #tpu.memory_space<vmem>>, %arg6: memref<1x1024xf32, #tpu.memory_space<vmem>>, %arg7: memref<256x512xf32, #tpu.memory_space<vmem>>, %arg8: memref<128x512xf32, #tpu.memory_space<vmem>>, %arg9: memref<1x512xf32, #tpu.memory_space<vmem>>, %arg10: memref<128x128xf32, #tpu.memory_space<vmem>>, %arg11: memref<1x128xf32, #tpu.memory_space<vmem>>, %arg12: memref<128x4xf32, #tpu.memory_space<vmem>>, %arg13: memref<1x4xf32, #tpu.memory_space<vmem>>, %arg14: memref<2x4xf32, #tpu.memory_space<vmem>>, %arg15: memref<16x256xf32, #tpu.memory_space<vmem>>) attributes {dimension_semantics = [], scalar_prefetch = 0 : i64, scratch_operands = 1 : i64, tpu.core_type = #tpu.core_type<tc>} {
    %c0 = arith.constant 0 : index
    %c0_0 = arith.constant 0 : index
    %0 = vector.load %arg0[%c0, %c0_0] : memref<16x16xf32, #tpu.memory_space<vmem>>, vector<16x16xf32>
    %c0_1 = arith.constant 0 : index
    %c0_2 = arith.constant 0 : index
    %1 = vector.load %arg3[%c0_1, %c0_2] : memref<16x1024xf32, #tpu.memory_space<vmem>>, vector<16x1024xf32>
    %cst = arith.constant dense<0.000000e+00> : vector<16x1024xf32>
    %2 = tpu.matmul %0, %1, %cst {dimension_numbers = #tpu.dot_dimension_numbers<[1], [0], [0], [1], [0, 0, 1, 1], [], []>} : vector<16x16xf32>, vector<16x1024xf32>, vector<16x1024xf32> -> vector<16x1024xf32>
    %c0_3 = arith.constant 0 : index
    %c0_4 = arith.constant 0 : index
    %3 = vector.load %arg6[%c0_3, %c0_4] : memref<1x1024xf32, #tpu.memory_space<vmem>>, vector<1x1024xf32>
    %4 = vector.broadcast %3 : vector<1x1024xf32> to vector<16x1024xf32>
    %5 = arith.addf %2, %4 : vector<16x1024xf32>
    %c0_5 = arith.constant 0 : index
    %c0_6 = arith.constant 0 : index
    %6 = vector.load %arg4[%c0_5, %c0_6] : memref<128x512xf32, #tpu.memory_space<vmem>>, vector<128x512xf32>
    %c0_7 = arith.constant 0 : index
    %c0_8 = arith.constant 0 : index
    %7 = vector.load %arg5[%c0_7, %c0_8] : memref<128x512xf32, #tpu.memory_space<vmem>>, vector<128x512xf32>
    %c0_9 = arith.constant 0 : index
    %c0_10 = arith.constant 0 : index
    %c0_11 = arith.constant 0 : index
    %8 = vector.load %arg1[%c0_9, %c0_10, %c0_11] : memref<2x2x128xf32, #tpu.memory_space<vmem>>, vector<1x2x128xf32>
    %9 = vector.shape_cast %8 : vector<1x2x128xf32> to vector<2x128xf32>
    %c0_12 = arith.constant 0 : index
    %c0_13 = arith.constant 0 : index
    %c0_14 = arith.constant 0 : index
    %10 = vector.load %arg2[%c0_12, %c0_13, %c0_14] : memref<2x2x128xf32, #tpu.memory_space<vmem>>, vector<1x2x128xf32>
    %11 = vector.shape_cast %10 : vector<1x2x128xf32> to vector<2x128xf32>
    %c1 = arith.constant 1 : index
    %c0_15 = arith.constant 0 : index
    %c0_16 = arith.constant 0 : index
    %12 = vector.load %arg1[%c1, %c0_15, %c0_16] : memref<2x2x128xf32, #tpu.memory_space<vmem>>, vector<1x2x128xf32>
    %13 = vector.shape_cast %12 : vector<1x2x128xf32> to vector<2x128xf32>
    %c1_17 = arith.constant 1 : index
    %c0_18 = arith.constant 0 : index
    %c0_19 = arith.constant 0 : index
    %14 = vector.load %arg2[%c1_17, %c0_18, %c0_19] : memref<2x2x128xf32, #tpu.memory_space<vmem>>, vector<1x2x128xf32>
    %15 = vector.shape_cast %14 : vector<1x2x128xf32> to vector<2x128xf32>
    %cst_20 = arith.constant dense<0.000000e+00> : vector<2x512xf32>
    %16 = tpu.matmul %9, %6, %cst_20 {dimension_numbers = #tpu.dot_dimension_numbers<[1], [0], [0], [1], [0, 0, 1, 1], [], []>} : vector<2x128xf32>, vector<128x512xf32>, vector<2x512xf32> -> vector<2x512xf32>
    %17 = vector.extract_strided_slice %5 {offsets = [0, 0], sizes = [2, 512], strides = [1, 1]} : vector<16x1024xf32> to vector<2x512xf32>
    %18 = arith.addf %16, %17 : vector<2x512xf32>
    %cst_21 = arith.constant dense<0.000000e+00> : vector<2x512xf32>
    %19 = tpu.matmul %13, %7, %cst_21 {dimension_numbers = #tpu.dot_dimension_numbers<[1], [0], [0], [1], [0, 0, 1, 1], [], []>} : vector<2x128xf32>, vector<128x512xf32>, vector<2x512xf32> -> vector<2x512xf32>
    %20 = vector.extract_strided_slice %5 {offsets = [14, 512], sizes = [2, 512], strides = [1, 1]} : vector<16x1024xf32> to vector<2x512xf32>
    %21 = arith.addf %19, %20 : vector<2x512xf32>
    %22 = vector.extract_strided_slice %18 {offsets = [0, 0], sizes = [2, 128], strides = [1, 1]} : vector<2x512xf32> to vector<2x128xf32>
    %23 = arith.negf %22 : vector<2x128xf32>
    %24 = math.exp %23 : vector<2x128xf32>
    %cst_22 = arith.constant 1.000000e+00 : f32
    %25 = vector.broadcast %cst_22 : f32 to vector<2x128xf32>
    %26 = arith.addf %25, %24 : vector<2x128xf32>
    %27 = arith.divf %25, %26 : vector<2x128xf32>
    %28 = vector.extract_strided_slice %18 {offsets = [0, 128], sizes = [2, 128], strides = [1, 1]} : vector<2x512xf32> to vector<2x128xf32>
    %29 = arith.negf %28 : vector<2x128xf32>
    %30 = math.exp %29 : vector<2x128xf32>
    %cst_23 = arith.constant 1.000000e+00 : f32
    %31 = vector.broadcast %cst_23 : f32 to vector<2x128xf32>
    %32 = arith.addf %31, %30 : vector<2x128xf32>
    %33 = arith.divf %31, %32 : vector<2x128xf32>
    %34 = vector.extract_strided_slice %18 {offsets = [0, 256], sizes = [2, 128], strides = [1, 1]} : vector<2x512xf32> to vector<2x128xf32>
    %35 = math.tanh %34 : vector<2x128xf32>
    %36 = vector.extract_strided_slice %18 {offsets = [0, 384], sizes = [2, 128], strides = [1, 1]} : vector<2x512xf32> to vector<2x128xf32>
    %37 = arith.negf %36 : vector<2x128xf32>
    %38 = math.exp %37 : vector<2x128xf32>
    %cst_24 = arith.constant 1.000000e+00 : f32
    %39 = vector.broadcast %cst_24 : f32 to vector<2x128xf32>
    %40 = arith.addf %39, %38 : vector<2x128xf32>
    %41 = arith.divf %39, %40 : vector<2x128xf32>
    %42 = arith.mulf %33, %11 : vector<2x128xf32>
    %43 = arith.mulf %27, %35 : vector<2x128xf32>
    %44 = arith.addf %42, %43 : vector<2x128xf32>
    %45 = math.tanh %44 : vector<2x128xf32>
    %46 = arith.mulf %41, %45 : vector<2x128xf32>
    %47 = vector.extract_strided_slice %21 {offsets = [0, 0], sizes = [2, 128], strides = [1, 1]} : vector<2x512xf32> to vector<2x128xf32>
    %48 = arith.negf %47 : vector<2x128xf32>
    %49 = math.exp %48 : vector<2x128xf32>
    %cst_25 = arith.constant 1.000000e+00 : f32
    %50 = vector.broadcast %cst_25 : f32 to vector<2x128xf32>
    %51 = arith.addf %50, %49 : vector<2x128xf32>
    %52 = arith.divf %50, %51 : vector<2x128xf32>
    %53 = vector.extract_strided_slice %21 {offsets = [0, 128], sizes = [2, 128], strides = [1, 1]} : vector<2x512xf32> to vector<2x128xf32>
    %54 = arith.negf %53 : vector<2x128xf32>
    %55 = math.exp %54 : vector<2x128xf32>
    %cst_26 = arith.constant 1.000000e+00 : f32
    %56 = vector.broadcast %cst_26 : f32 to vector<2x128xf32>
    %57 = arith.addf %56, %55 : vector<2x128xf32>
    %58 = arith.divf %56, %57 : vector<2x128xf32>
    %59 = vector.extract_strided_slice %21 {offsets = [0, 256], sizes = [2, 128], strides = [1, 1]} : vector<2x512xf32> to vector<2x128xf32>
    %60 = math.tanh %59 : vector<2x128xf32>
    %61 = vector.extract_strided_slice %21 {offsets = [0, 384], sizes = [2, 128], strides = [1, 1]} : vector<2x512xf32> to vector<2x128xf32>
    %62 = arith.negf %61 : vector<2x128xf32>
    %63 = math.exp %62 : vector<2x128xf32>
    %cst_27 = arith.constant 1.000000e+00 : f32
    %64 = vector.broadcast %cst_27 : f32 to vector<2x128xf32>
    %65 = arith.addf %64, %63 : vector<2x128xf32>
    %66 = arith.divf %64, %65 : vector<2x128xf32>
    %67 = arith.mulf %58, %15 : vector<2x128xf32>
    %68 = arith.mulf %52, %60 : vector<2x128xf32>
    %69 = arith.addf %67, %68 : vector<2x128xf32>
    %70 = math.tanh %69 : vector<2x128xf32>
    %71 = arith.mulf %66, %70 : vector<2x128xf32>
    %c0_28 = arith.constant 0 : index
    %c0_29 = arith.constant 0 : index
    %72 = vector.load %arg15[%c0_28, %c0_29] : memref<16x256xf32, #tpu.memory_space<vmem>>, vector<2x128xf32>
    tpu.vector_store %arg15[%c0_28, %c0_29], %46 {strides = array<i32>} : memref<16x256xf32, #tpu.memory_space<vmem>>, vector<2x128xf32>,
    %c14 = arith.constant 14 : index
    %c128 = arith.constant 128 : index
    %73 = vector.load %arg15[%c14, %c128] : memref<16x256xf32, #tpu.memory_space<vmem>>, vector<2x128xf32>
    tpu.vector_store %arg15[%c14, %c128], %71 {strides = array<i32>} : memref<16x256xf32, #tpu.memory_space<vmem>>, vector<2x128xf32>,
    %cst_30 = arith.constant dense<0.000000e+00> : vector<2x512xf32>
    %74 = tpu.matmul %46, %6, %cst_30 {dimension_numbers = #tpu.dot_dimension_numbers<[1], [0], [0], [1], [0, 0, 1, 1], [], []>} : vector<2x128xf32>, vector<128x512xf32>, vector<2x512xf32> -> vector<2x512xf32>
    %75 = vector.extract_strided_slice %5 {offsets = [2, 0], sizes = [2, 512], strides = [1, 1]} : vector<16x1024xf32> to vector<2x512xf32>
    %76 = arith.addf %74, %75 : vector<2x512xf32>
    %cst_31 = arith.constant dense<0.000000e+00> : vector<2x512xf32>
    %77 = tpu.matmul %71, %7, %cst_31 {dimension_numbers = #tpu.dot_dimension_numbers<[1], [0], [0], [1], [0, 0, 1, 1], [], []>} : vector<2x128xf32>, vector<128x512xf32>, vector<2x512xf32> -> vector<2x512xf32>
    %78 = vector.extract_strided_slice %5 {offsets = [12, 512], sizes = [2, 512], strides = [1, 1]} : vector<16x1024xf32> to vector<2x512xf32>
    %79 = arith.addf %77, %78 : vector<2x512xf32>
    %80 = vector.extract_strided_slice %76 {offsets = [0, 0], sizes = [2, 128], strides = [1, 1]} : vector<2x512xf32> to vector<2x128xf32>
    %81 = arith.negf %80 : vector<2x128xf32>
    %82 = math.exp %81 : vector<2x128xf32>
    %cst_32 = arith.constant 1.000000e+00 : f32
    %83 = vector.broadcast %cst_32 : f32 to vector<2x128xf32>
    %84 = arith.addf %83, %82 : vector<2x128xf32>
    %85 = arith.divf %83, %84 : vector<2x128xf32>
    %86 = vector.extract_strided_slice %76 {offsets = [0, 128], sizes = [2, 128], strides = [1, 1]} : vector<2x512xf32> to vector<2x128xf32>
    %87 = arith.negf %86 : vector<2x128xf32>
    %88 = math.exp %87 : vector<2x128xf32>
    %cst_33 = arith.constant 1.000000e+00 : f32
    %89 = vector.broadcast %cst_33 : f32 to vector<2x128xf32>
    %90 = arith.addf %89, %88 : vector<2x128xf32>
    %91 = arith.divf %89, %90 : vector<2x128xf32>
    %92 = vector.extract_strided_slice %76 {offsets = [0, 256], sizes = [2, 128], strides = [1, 1]} : vector<2x512xf32> to vector<2x128xf32>
    %93 = math.tanh %92 : vector<2x128xf32>
    %94 = vector.extract_strided_slice %76 {offsets = [0, 384], sizes = [2, 128], strides = [1, 1]} : vector<2x512xf32> to vector<2x128xf32>
    %95 = arith.negf %94 : vector<2x128xf32>
    %96 = math.exp %95 : vector<2x128xf32>
    %cst_34 = arith.constant 1.000000e+00 : f32
    %97 = vector.broadcast %cst_34 : f32 to vector<2x128xf32>
    %98 = arith.addf %97, %96 : vector<2x128xf32>
    %99 = arith.divf %97, %98 : vector<2x128xf32>
    %100 = arith.mulf %91, %44 : vector<2x128xf32>
    %101 = arith.mulf %85, %93 : vector<2x128xf32>
    %102 = arith.addf %100, %101 : vector<2x128xf32>
    %103 = math.tanh %102 : vector<2x128xf32>
    %104 = arith.mulf %99, %103 : vector<2x128xf32>
    %105 = vector.extract_strided_slice %79 {offsets = [0, 0], sizes = [2, 128], strides = [1, 1]} : vector<2x512xf32> to vector<2x128xf32>
    %106 = arith.negf %105 : vector<2x128xf32>
    %107 = math.exp %106 : vector<2x128xf32>
    %cst_35 = arith.constant 1.000000e+00 : f32
    %108 = vector.broadcast %cst_35 : f32 to vector<2x128xf32>
    %109 = arith.addf %108, %107 : vector<2x128xf32>
    %110 = arith.divf %108, %109 : vector<2x128xf32>
    %111 = vector.extract_strided_slice %79 {offsets = [0, 128], sizes = [2, 128], strides = [1, 1]} : vector<2x512xf32> to vector<2x128xf32>
    %112 = arith.negf %111 : vector<2x128xf32>
    %113 = math.exp %112 : vector<2x128xf32>
    %cst_36 = arith.constant 1.000000e+00 : f32
    %114 = vector.broadcast %cst_36 : f32 to vector<2x128xf32>
    %115 = arith.addf %114, %113 : vector<2x128xf32>
    %116 = arith.divf %114, %115 : vector<2x128xf32>
    %117 = vector.extract_strided_slice %79 {offsets = [0, 256], sizes = [2, 128], strides = [1, 1]} : vector<2x512xf32> to vector<2x128xf32>
    %118 = math.tanh %117 : vector<2x128xf32>
    %119 = vector.extract_strided_slice %79 {offsets = [0, 384], sizes = [2, 128], strides = [1, 1]} : vector<2x512xf32> to vector<2x128xf32>
    %120 = arith.negf %119 : vector<2x128xf32>
    %121 = math.exp %120 : vector<2x128xf32>
    %cst_37 = arith.constant 1.000000e+00 : f32
    %122 = vector.broadcast %cst_37 : f32 to vector<2x128xf32>
    %123 = arith.addf %122, %121 : vector<2x128xf32>
    %124 = arith.divf %122, %123 : vector<2x128xf32>
    %125 = arith.mulf %116, %69 : vector<2x128xf32>
    %126 = arith.mulf %110, %118 : vector<2x128xf32>
    %127 = arith.addf %125, %126 : vector<2x128xf32>
    %128 = math.tanh %127 : vector<2x128xf32>
    %129 = arith.mulf %124, %128 : vector<2x128xf32>
    %c2 = arith.constant 2 : index
    %c0_38 = arith.constant 0 : index
    %130 = vector.load %arg15[%c2, %c0_38] : memref<16x256xf32, #tpu.memory_space<vmem>>, vector<2x128xf32>
    tpu.vector_store %arg15[%c2, %c0_38], %104 {strides = array<i32>} : memref<16x256xf32, #tpu.memory_space<vmem>>, vector<2x128xf32>,
    %c12 = arith.constant 12 : index
    %c128_39 = arith.constant 128 : index
    %131 = vector.load %arg15[%c12, %c128_39] : memref<16x256xf32, #tpu.memory_space<vmem>>, vector<2x128xf32>
    tpu.vector_store %arg15[%c12, %c128_39], %129 {strides = array<i32>} : memref<16x256xf32, #tpu.memory_space<vmem>>, vector<2x128xf32>,
    %cst_40 = arith.constant dense<0.000000e+00> : vector<2x512xf32>
    %132 = tpu.matmul %104, %6, %cst_40 {dimension_numbers = #tpu.dot_dimension_numbers<[1], [0], [0], [1], [0, 0, 1, 1], [], []>} : vector<2x128xf32>, vector<128x512xf32>, vector<2x512xf32> -> vector<2x512xf32>
    %133 = vector.extract_strided_slice %5 {offsets = [4, 0], sizes = [2, 512], strides = [1, 1]} : vector<16x1024xf32> to vector<2x512xf32>
    %134 = arith.addf %132, %133 : vector<2x512xf32>
    %cst_41 = arith.constant dense<0.000000e+00> : vector<2x512xf32>
    %135 = tpu.matmul %129, %7, %cst_41 {dimension_numbers = #tpu.dot_dimension_numbers<[1], [0], [0], [1], [0, 0, 1, 1], [], []>} : vector<2x128xf32>, vector<128x512xf32>, vector<2x512xf32> -> vector<2x512xf32>
    %136 = vector.extract_strided_slice %5 {offsets = [10, 512], sizes = [2, 512], strides = [1, 1]} : vector<16x1024xf32> to vector<2x512xf32>
    %137 = arith.addf %135, %136 : vector<2x512xf32>
    %138 = vector.extract_strided_slice %134 {offsets = [0, 0], sizes = [2, 128], strides = [1, 1]} : vector<2x512xf32> to vector<2x128xf32>
    %139 = arith.negf %138 : vector<2x128xf32>
    %140 = math.exp %139 : vector<2x128xf32>
    %cst_42 = arith.constant 1.000000e+00 : f32
    %141 = vector.broadcast %cst_42 : f32 to vector<2x128xf32>
    %142 = arith.addf %141, %140 : vector<2x128xf32>
    %143 = arith.divf %141, %142 : vector<2x128xf32>
    %144 = vector.extract_strided_slice %134 {offsets = [0, 128], sizes = [2, 128], strides = [1, 1]} : vector<2x512xf32> to vector<2x128xf32>
    %145 = arith.negf %144 : vector<2x128xf32>
    %146 = math.exp %145 : vector<2x128xf32>
    %cst_43 = arith.constant 1.000000e+00 : f32
    %147 = vector.broadcast %cst_43 : f32 to vector<2x128xf32>
    %148 = arith.addf %147, %146 : vector<2x128xf32>
    %149 = arith.divf %147, %148 : vector<2x128xf32>
    %150 = vector.extract_strided_slice %134 {offsets = [0, 256], sizes = [2, 128], strides = [1, 1]} : vector<2x512xf32> to vector<2x128xf32>
    %151 = math.tanh %150 : vector<2x128xf32>
    %152 = vector.extract_strided_slice %134 {offsets = [0, 384], sizes = [2, 128], strides = [1, 1]} : vector<2x512xf32> to vector<2x128xf32>
    %153 = arith.negf %152 : vector<2x128xf32>
    %154 = math.exp %153 : vector<2x128xf32>
    %cst_44 = arith.constant 1.000000e+00 : f32
    %155 = vector.broadcast %cst_44 : f32 to vector<2x128xf32>
    %156 = arith.addf %155, %154 : vector<2x128xf32>
    %157 = arith.divf %155, %156 : vector<2x128xf32>
    %158 = arith.mulf %149, %102 : vector<2x128xf32>
    %159 = arith.mulf %143, %151 : vector<2x128xf32>
    %160 = arith.addf %158, %159 : vector<2x128xf32>
    %161 = math.tanh %160 : vector<2x128xf32>
    %162 = arith.mulf %157, %161 : vector<2x128xf32>
    %163 = vector.extract_strided_slice %137 {offsets = [0, 0], sizes = [2, 128], strides = [1, 1]} : vector<2x512xf32> to vector<2x128xf32>
    %164 = arith.negf %163 : vector<2x128xf32>
    %165 = math.exp %164 : vector<2x128xf32>
    %cst_45 = arith.constant 1.000000e+00 : f32
    %166 = vector.broadcast %cst_45 : f32 to vector<2x128xf32>
    %167 = arith.addf %166, %165 : vector<2x128xf32>
    %168 = arith.divf %166, %167 : vector<2x128xf32>
    %169 = vector.extract_strided_slice %137 {offsets = [0, 128], sizes = [2, 128], strides = [1, 1]} : vector<2x512xf32> to vector<2x128xf32>
    %170 = arith.negf %169 : vector<2x128xf32>
    %171 = math.exp %170 : vector<2x128xf32>
    %cst_46 = arith.constant 1.000000e+00 : f32
    %172 = vector.broadcast %cst_46 : f32 to vector<2x128xf32>
    %173 = arith.addf %172, %171 : vector<2x128xf32>
    %174 = arith.divf %172, %173 : vector<2x128xf32>
    %175 = vector.extract_strided_slice %137 {offsets = [0, 256], sizes = [2, 128], strides = [1, 1]} : vector<2x512xf32> to vector<2x128xf32>
    %176 = math.tanh %175 : vector<2x128xf32>
    %177 = vector.extract_strided_slice %137 {offsets = [0, 384], sizes = [2, 128], strides = [1, 1]} : vector<2x512xf32> to vector<2x128xf32>
    %178 = arith.negf %177 : vector<2x128xf32>
    %179 = math.exp %178 : vector<2x128xf32>
    %cst_47 = arith.constant 1.000000e+00 : f32
    %180 = vector.broadcast %cst_47 : f32 to vector<2x128xf32>
    %181 = arith.addf %180, %179 : vector<2x128xf32>
    %182 = arith.divf %180, %181 : vector<2x128xf32>
    %183 = arith.mulf %174, %127 : vector<2x128xf32>
    %184 = arith.mulf %168, %176 : vector<2x128xf32>
    %185 = arith.addf %183, %184 : vector<2x128xf32>
    %186 = math.tanh %185 : vector<2x128xf32>
    %187 = arith.mulf %182, %186 : vector<2x128xf32>
    %c4 = arith.constant 4 : index
    %c0_48 = arith.constant 0 : index
    %188 = vector.load %arg15[%c4, %c0_48] : memref<16x256xf32, #tpu.memory_space<vmem>>, vector<2x128xf32>
    tpu.vector_store %arg15[%c4, %c0_48], %162 {strides = array<i32>} : memref<16x256xf32, #tpu.memory_space<vmem>>, vector<2x128xf32>,
    %c10 = arith.constant 10 : index
    %c128_49 = arith.constant 128 : index
    %189 = vector.load %arg15[%c10, %c128_49] : memref<16x256xf32, #tpu.memory_space<vmem>>, vector<2x128xf32>
    tpu.vector_store %arg15[%c10, %c128_49], %187 {strides = array<i32>} : memref<16x256xf32, #tpu.memory_space<vmem>>, vector<2x128xf32>,
    %cst_50 = arith.constant dense<0.000000e+00> : vector<2x512xf32>
    %190 = tpu.matmul %162, %6, %cst_50 {dimension_numbers = #tpu.dot_dimension_numbers<[1], [0], [0], [1], [0, 0, 1, 1], [], []>} : vector<2x128xf32>, vector<128x512xf32>, vector<2x512xf32> -> vector<2x512xf32>
    %191 = vector.extract_strided_slice %5 {offsets = [6, 0], sizes = [2, 512], strides = [1, 1]} : vector<16x1024xf32> to vector<2x512xf32>
    %192 = arith.addf %190, %191 : vector<2x512xf32>
    %cst_51 = arith.constant dense<0.000000e+00> : vector<2x512xf32>
    %193 = tpu.matmul %187, %7, %cst_51 {dimension_numbers = #tpu.dot_dimension_numbers<[1], [0], [0], [1], [0, 0, 1, 1], [], []>} : vector<2x128xf32>, vector<128x512xf32>, vector<2x512xf32> -> vector<2x512xf32>
    %194 = vector.extract_strided_slice %5 {offsets = [8, 512], sizes = [2, 512], strides = [1, 1]} : vector<16x1024xf32> to vector<2x512xf32>
    %195 = arith.addf %193, %194 : vector<2x512xf32>
    %196 = vector.extract_strided_slice %192 {offsets = [0, 0], sizes = [2, 128], strides = [1, 1]} : vector<2x512xf32> to vector<2x128xf32>
    %197 = arith.negf %196 : vector<2x128xf32>
    %198 = math.exp %197 : vector<2x128xf32>
    %cst_52 = arith.constant 1.000000e+00 : f32
    %199 = vector.broadcast %cst_52 : f32 to vector<2x128xf32>
    %200 = arith.addf %199, %198 : vector<2x128xf32>
    %201 = arith.divf %199, %200 : vector<2x128xf32>
    %202 = vector.extract_strided_slice %192 {offsets = [0, 128], sizes = [2, 128], strides = [1, 1]} : vector<2x512xf32> to vector<2x128xf32>
    %203 = arith.negf %202 : vector<2x128xf32>
    %204 = math.exp %203 : vector<2x128xf32>
    %cst_53 = arith.constant 1.000000e+00 : f32
    %205 = vector.broadcast %cst_53 : f32 to vector<2x128xf32>
    %206 = arith.addf %205, %204 : vector<2x128xf32>
    %207 = arith.divf %205, %206 : vector<2x128xf32>
    %208 = vector.extract_strided_slice %192 {offsets = [0, 256], sizes = [2, 128], strides = [1, 1]} : vector<2x512xf32> to vector<2x128xf32>
    %209 = math.tanh %208 : vector<2x128xf32>
    %210 = vector.extract_strided_slice %192 {offsets = [0, 384], sizes = [2, 128], strides = [1, 1]} : vector<2x512xf32> to vector<2x128xf32>
    %211 = arith.negf %210 : vector<2x128xf32>
    %212 = math.exp %211 : vector<2x128xf32>
    %cst_54 = arith.constant 1.000000e+00 : f32
    %213 = vector.broadcast %cst_54 : f32 to vector<2x128xf32>
    %214 = arith.addf %213, %212 : vector<2x128xf32>
    %215 = arith.divf %213, %214 : vector<2x128xf32>
    %216 = arith.mulf %207, %160 : vector<2x128xf32>
    %217 = arith.mulf %201, %209 : vector<2x128xf32>
    %218 = arith.addf %216, %217 : vector<2x128xf32>
    %219 = math.tanh %218 : vector<2x128xf32>
    %220 = arith.mulf %215, %219 : vector<2x128xf32>
    %221 = vector.extract_strided_slice %195 {offsets = [0, 0], sizes = [2, 128], strides = [1, 1]} : vector<2x512xf32> to vector<2x128xf32>
    %222 = arith.negf %221 : vector<2x128xf32>
    %223 = math.exp %222 : vector<2x128xf32>
    %cst_55 = arith.constant 1.000000e+00 : f32
    %224 = vector.broadcast %cst_55 : f32 to vector<2x128xf32>
    %225 = arith.addf %224, %223 : vector<2x128xf32>
    %226 = arith.divf %224, %225 : vector<2x128xf32>
    %227 = vector.extract_strided_slice %195 {offsets = [0, 128], sizes = [2, 128], strides = [1, 1]} : vector<2x512xf32> to vector<2x128xf32>
    %228 = arith.negf %227 : vector<2x128xf32>
    %229 = math.exp %228 : vector<2x128xf32>
    %cst_56 = arith.constant 1.000000e+00 : f32
    %230 = vector.broadcast %cst_56 : f32 to vector<2x128xf32>
    %231 = arith.addf %230, %229 : vector<2x128xf32>
    %232 = arith.divf %230, %231 : vector<2x128xf32>
    %233 = vector.extract_strided_slice %195 {offsets = [0, 256], sizes = [2, 128], strides = [1, 1]} : vector<2x512xf32> to vector<2x128xf32>
    %234 = math.tanh %233 : vector<2x128xf32>
    %235 = vector.extract_strided_slice %195 {offsets = [0, 384], sizes = [2, 128], strides = [1, 1]} : vector<2x512xf32> to vector<2x128xf32>
    %236 = arith.negf %235 : vector<2x128xf32>
    %237 = math.exp %236 : vector<2x128xf32>
    %cst_57 = arith.constant 1.000000e+00 : f32
    %238 = vector.broadcast %cst_57 : f32 to vector<2x128xf32>
    %239 = arith.addf %238, %237 : vector<2x128xf32>
    %240 = arith.divf %238, %239 : vector<2x128xf32>
    %241 = arith.mulf %232, %185 : vector<2x128xf32>
    %242 = arith.mulf %226, %234 : vector<2x128xf32>
    %243 = arith.addf %241, %242 : vector<2x128xf32>
    %244 = math.tanh %243 : vector<2x128xf32>
    %245 = arith.mulf %240, %244 : vector<2x128xf32>
    %c6 = arith.constant 6 : index
    %c0_58 = arith.constant 0 : index
    %246 = vector.load %arg15[%c6, %c0_58] : memref<16x256xf32, #tpu.memory_space<vmem>>, vector<2x128xf32>
    tpu.vector_store %arg15[%c6, %c0_58], %220 {strides = array<i32>} : memref<16x256xf32, #tpu.memory_space<vmem>>, vector<2x128xf32>,
    %c8 = arith.constant 8 : index
    %c128_59 = arith.constant 128 : index
    %247 = vector.load %arg15[%c8, %c128_59] : memref<16x256xf32, #tpu.memory_space<vmem>>, vector<2x128xf32>
    tpu.vector_store %arg15[%c8, %c128_59], %245 {strides = array<i32>} : memref<16x256xf32, #tpu.memory_space<vmem>>, vector<2x128xf32>,
    %cst_60 = arith.constant dense<0.000000e+00> : vector<2x512xf32>
    %248 = tpu.matmul %220, %6, %cst_60 {dimension_numbers = #tpu.dot_dimension_numbers<[1], [0], [0], [1], [0, 0, 1, 1], [], []>} : vector<2x128xf32>, vector<128x512xf32>, vector<2x512xf32> -> vector<2x512xf32>
    %249 = vector.extract_strided_slice %5 {offsets = [8, 0], sizes = [2, 512], strides = [1, 1]} : vector<16x1024xf32> to vector<2x512xf32>
    %250 = arith.addf %248, %249 : vector<2x512xf32>
    %cst_61 = arith.constant dense<0.000000e+00> : vector<2x512xf32>
    %251 = tpu.matmul %245, %7, %cst_61 {dimension_numbers = #tpu.dot_dimension_numbers<[1], [0], [0], [1], [0, 0, 1, 1], [], []>} : vector<2x128xf32>, vector<128x512xf32>, vector<2x512xf32> -> vector<2x512xf32>
    %252 = vector.extract_strided_slice %5 {offsets = [6, 512], sizes = [2, 512], strides = [1, 1]} : vector<16x1024xf32> to vector<2x512xf32>
    %253 = arith.addf %251, %252 : vector<2x512xf32>
    %254 = vector.extract_strided_slice %250 {offsets = [0, 0], sizes = [2, 128], strides = [1, 1]} : vector<2x512xf32> to vector<2x128xf32>
    %255 = arith.negf %254 : vector<2x128xf32>
    %256 = math.exp %255 : vector<2x128xf32>
    %cst_62 = arith.constant 1.000000e+00 : f32
    %257 = vector.broadcast %cst_62 : f32 to vector<2x128xf32>
    %258 = arith.addf %257, %256 : vector<2x128xf32>
    %259 = arith.divf %257, %258 : vector<2x128xf32>
    %260 = vector.extract_strided_slice %250 {offsets = [0, 128], sizes = [2, 128], strides = [1, 1]} : vector<2x512xf32> to vector<2x128xf32>
    %261 = arith.negf %260 : vector<2x128xf32>
    %262 = math.exp %261 : vector<2x128xf32>
    %cst_63 = arith.constant 1.000000e+00 : f32
    %263 = vector.broadcast %cst_63 : f32 to vector<2x128xf32>
    %264 = arith.addf %263, %262 : vector<2x128xf32>
    %265 = arith.divf %263, %264 : vector<2x128xf32>
    %266 = vector.extract_strided_slice %250 {offsets = [0, 256], sizes = [2, 128], strides = [1, 1]} : vector<2x512xf32> to vector<2x128xf32>
    %267 = math.tanh %266 : vector<2x128xf32>
    %268 = vector.extract_strided_slice %250 {offsets = [0, 384], sizes = [2, 128], strides = [1, 1]} : vector<2x512xf32> to vector<2x128xf32>
    %269 = arith.negf %268 : vector<2x128xf32>
    %270 = math.exp %269 : vector<2x128xf32>
    %cst_64 = arith.constant 1.000000e+00 : f32
    %271 = vector.broadcast %cst_64 : f32 to vector<2x128xf32>
    %272 = arith.addf %271, %270 : vector<2x128xf32>
    %273 = arith.divf %271, %272 : vector<2x128xf32>
    %274 = arith.mulf %265, %218 : vector<2x128xf32>
    %275 = arith.mulf %259, %267 : vector<2x128xf32>
    %276 = arith.addf %274, %275 : vector<2x128xf32>
    %277 = math.tanh %276 : vector<2x128xf32>
    %278 = arith.mulf %273, %277 : vector<2x128xf32>
    %279 = vector.extract_strided_slice %253 {offsets = [0, 0], sizes = [2, 128], strides = [1, 1]} : vector<2x512xf32> to vector<2x128xf32>
    %280 = arith.negf %279 : vector<2x128xf32>
    %281 = math.exp %280 : vector<2x128xf32>
    %cst_65 = arith.constant 1.000000e+00 : f32
    %282 = vector.broadcast %cst_65 : f32 to vector<2x128xf32>
    %283 = arith.addf %282, %281 : vector<2x128xf32>
    %284 = arith.divf %282, %283 : vector<2x128xf32>
    %285 = vector.extract_strided_slice %253 {offsets = [0, 128], sizes = [2, 128], strides = [1, 1]} : vector<2x512xf32> to vector<2x128xf32>
    %286 = arith.negf %285 : vector<2x128xf32>
    %287 = math.exp %286 : vector<2x128xf32>
    %cst_66 = arith.constant 1.000000e+00 : f32
    %288 = vector.broadcast %cst_66 : f32 to vector<2x128xf32>
    %289 = arith.addf %288, %287 : vector<2x128xf32>
    %290 = arith.divf %288, %289 : vector<2x128xf32>
    %291 = vector.extract_strided_slice %253 {offsets = [0, 256], sizes = [2, 128], strides = [1, 1]} : vector<2x512xf32> to vector<2x128xf32>
    %292 = math.tanh %291 : vector<2x128xf32>
    %293 = vector.extract_strided_slice %253 {offsets = [0, 384], sizes = [2, 128], strides = [1, 1]} : vector<2x512xf32> to vector<2x128xf32>
    %294 = arith.negf %293 : vector<2x128xf32>
    %295 = math.exp %294 : vector<2x128xf32>
    %cst_67 = arith.constant 1.000000e+00 : f32
    %296 = vector.broadcast %cst_67 : f32 to vector<2x128xf32>
    %297 = arith.addf %296, %295 : vector<2x128xf32>
    %298 = arith.divf %296, %297 : vector<2x128xf32>
    %299 = arith.mulf %290, %243 : vector<2x128xf32>
    %300 = arith.mulf %284, %292 : vector<2x128xf32>
    %301 = arith.addf %299, %300 : vector<2x128xf32>
    %302 = math.tanh %301 : vector<2x128xf32>
    %303 = arith.mulf %298, %302 : vector<2x128xf32>
    %c8_68 = arith.constant 8 : index
    %c0_69 = arith.constant 0 : index
    %304 = vector.load %arg15[%c8_68, %c0_69] : memref<16x256xf32, #tpu.memory_space<vmem>>, vector<2x128xf32>
    tpu.vector_store %arg15[%c8_68, %c0_69], %278 {strides = array<i32>} : memref<16x256xf32, #tpu.memory_space<vmem>>, vector<2x128xf32>,
    %c6_70 = arith.constant 6 : index
    %c128_71 = arith.constant 128 : index
    %305 = vector.load %arg15[%c6_70, %c128_71] : memref<16x256xf32, #tpu.memory_space<vmem>>, vector<2x128xf32>
    tpu.vector_store %arg15[%c6_70, %c128_71], %303 {strides = array<i32>} : memref<16x256xf32, #tpu.memory_space<vmem>>, vector<2x128xf32>,
    %cst_72 = arith.constant dense<0.000000e+00> : vector<2x512xf32>
    %306 = tpu.matmul %278, %6, %cst_72 {dimension_numbers = #tpu.dot_dimension_numbers<[1], [0], [0], [1], [0, 0, 1, 1], [], []>} : vector<2x128xf32>, vector<128x512xf32>, vector<2x512xf32> -> vector<2x512xf32>
    %307 = vector.extract_strided_slice %5 {offsets = [10, 0], sizes = [2, 512], strides = [1, 1]} : vector<16x1024xf32> to vector<2x512xf32>
    %308 = arith.addf %306, %307 : vector<2x512xf32>
    %cst_73 = arith.constant dense<0.000000e+00> : vector<2x512xf32>
    %309 = tpu.matmul %303, %7, %cst_73 {dimension_numbers = #tpu.dot_dimension_numbers<[1], [0], [0], [1], [0, 0, 1, 1], [], []>} : vector<2x128xf32>, vector<128x512xf32>, vector<2x512xf32> -> vector<2x512xf32>
    %310 = vector.extract_strided_slice %5 {offsets = [4, 512], sizes = [2, 512], strides = [1, 1]} : vector<16x1024xf32> to vector<2x512xf32>
    %311 = arith.addf %309, %310 : vector<2x512xf32>
    %312 = vector.extract_strided_slice %308 {offsets = [0, 0], sizes = [2, 128], strides = [1, 1]} : vector<2x512xf32> to vector<2x128xf32>
    %313 = arith.negf %312 : vector<2x128xf32>
    %314 = math.exp %313 : vector<2x128xf32>
    %cst_74 = arith.constant 1.000000e+00 : f32
    %315 = vector.broadcast %cst_74 : f32 to vector<2x128xf32>
    %316 = arith.addf %315, %314 : vector<2x128xf32>
    %317 = arith.divf %315, %316 : vector<2x128xf32>
    %318 = vector.extract_strided_slice %308 {offsets = [0, 128], sizes = [2, 128], strides = [1, 1]} : vector<2x512xf32> to vector<2x128xf32>
    %319 = arith.negf %318 : vector<2x128xf32>
    %320 = math.exp %319 : vector<2x128xf32>
    %cst_75 = arith.constant 1.000000e+00 : f32
    %321 = vector.broadcast %cst_75 : f32 to vector<2x128xf32>
    %322 = arith.addf %321, %320 : vector<2x128xf32>
    %323 = arith.divf %321, %322 : vector<2x128xf32>
    %324 = vector.extract_strided_slice %308 {offsets = [0, 256], sizes = [2, 128], strides = [1, 1]} : vector<2x512xf32> to vector<2x128xf32>
    %325 = math.tanh %324 : vector<2x128xf32>
    %326 = vector.extract_strided_slice %308 {offsets = [0, 384], sizes = [2, 128], strides = [1, 1]} : vector<2x512xf32> to vector<2x128xf32>
    %327 = arith.negf %326 : vector<2x128xf32>
    %328 = math.exp %327 : vector<2x128xf32>
    %cst_76 = arith.constant 1.000000e+00 : f32
    %329 = vector.broadcast %cst_76 : f32 to vector<2x128xf32>
    %330 = arith.addf %329, %328 : vector<2x128xf32>
    %331 = arith.divf %329, %330 : vector<2x128xf32>
    %332 = arith.mulf %323, %276 : vector<2x128xf32>
    %333 = arith.mulf %317, %325 : vector<2x128xf32>
    %334 = arith.addf %332, %333 : vector<2x128xf32>
    %335 = math.tanh %334 : vector<2x128xf32>
    %336 = arith.mulf %331, %335 : vector<2x128xf32>
    %337 = vector.extract_strided_slice %311 {offsets = [0, 0], sizes = [2, 128], strides = [1, 1]} : vector<2x512xf32> to vector<2x128xf32>
    %338 = arith.negf %337 : vector<2x128xf32>
    %339 = math.exp %338 : vector<2x128xf32>
    %cst_77 = arith.constant 1.000000e+00 : f32
    %340 = vector.broadcast %cst_77 : f32 to vector<2x128xf32>
    %341 = arith.addf %340, %339 : vector<2x128xf32>
    %342 = arith.divf %340, %341 : vector<2x128xf32>
    %343 = vector.extract_strided_slice %311 {offsets = [0, 128], sizes = [2, 128], strides = [1, 1]} : vector<2x512xf32> to vector<2x128xf32>
    %344 = arith.negf %343 : vector<2x128xf32>
    %345 = math.exp %344 : vector<2x128xf32>
    %cst_78 = arith.constant 1.000000e+00 : f32
    %346 = vector.broadcast %cst_78 : f32 to vector<2x128xf32>
    %347 = arith.addf %346, %345 : vector<2x128xf32>
    %348 = arith.divf %346, %347 : vector<2x128xf32>
    %349 = vector.extract_strided_slice %311 {offsets = [0, 256], sizes = [2, 128], strides = [1, 1]} : vector<2x512xf32> to vector<2x128xf32>
    %350 = math.tanh %349 : vector<2x128xf32>
    %351 = vector.extract_strided_slice %311 {offsets = [0, 384], sizes = [2, 128], strides = [1, 1]} : vector<2x512xf32> to vector<2x128xf32>
    %352 = arith.negf %351 : vector<2x128xf32>
    %353 = math.exp %352 : vector<2x128xf32>
    %cst_79 = arith.constant 1.000000e+00 : f32
    %354 = vector.broadcast %cst_79 : f32 to vector<2x128xf32>
    %355 = arith.addf %354, %353 : vector<2x128xf32>
    %356 = arith.divf %354, %355 : vector<2x128xf32>
    %357 = arith.mulf %348, %301 : vector<2x128xf32>
    %358 = arith.mulf %342, %350 : vector<2x128xf32>
    %359 = arith.addf %357, %358 : vector<2x128xf32>
    %360 = math.tanh %359 : vector<2x128xf32>
    %361 = arith.mulf %356, %360 : vector<2x128xf32>
    %c10_80 = arith.constant 10 : index
    %c0_81 = arith.constant 0 : index
    %362 = vector.load %arg15[%c10_80, %c0_81] : memref<16x256xf32, #tpu.memory_space<vmem>>, vector<2x128xf32>
    tpu.vector_store %arg15[%c10_80, %c0_81], %336 {strides = array<i32>} : memref<16x256xf32, #tpu.memory_space<vmem>>, vector<2x128xf32>,
    %c4_82 = arith.constant 4 : index
    %c128_83 = arith.constant 128 : index
    %363 = vector.load %arg15[%c4_82, %c128_83] : memref<16x256xf32, #tpu.memory_space<vmem>>, vector<2x128xf32>
    tpu.vector_store %arg15[%c4_82, %c128_83], %361 {strides = array<i32>} : memref<16x256xf32, #tpu.memory_space<vmem>>, vector<2x128xf32>,
    %cst_84 = arith.constant dense<0.000000e+00> : vector<2x512xf32>
    %364 = tpu.matmul %336, %6, %cst_84 {dimension_numbers = #tpu.dot_dimension_numbers<[1], [0], [0], [1], [0, 0, 1, 1], [], []>} : vector<2x128xf32>, vector<128x512xf32>, vector<2x512xf32> -> vector<2x512xf32>
    %365 = vector.extract_strided_slice %5 {offsets = [12, 0], sizes = [2, 512], strides = [1, 1]} : vector<16x1024xf32> to vector<2x512xf32>
    %366 = arith.addf %364, %365 : vector<2x512xf32>
    %cst_85 = arith.constant dense<0.000000e+00> : vector<2x512xf32>
    %367 = tpu.matmul %361, %7, %cst_85 {dimension_numbers = #tpu.dot_dimension_numbers<[1], [0], [0], [1], [0, 0, 1, 1], [], []>} : vector<2x128xf32>, vector<128x512xf32>, vector<2x512xf32> -> vector<2x512xf32>
    %368 = vector.extract_strided_slice %5 {offsets = [2, 512], sizes = [2, 512], strides = [1, 1]} : vector<16x1024xf32> to vector<2x512xf32>
    %369 = arith.addf %367, %368 : vector<2x512xf32>
    %370 = vector.extract_strided_slice %366 {offsets = [0, 0], sizes = [2, 128], strides = [1, 1]} : vector<2x512xf32> to vector<2x128xf32>
    %371 = arith.negf %370 : vector<2x128xf32>
    %372 = math.exp %371 : vector<2x128xf32>
    %cst_86 = arith.constant 1.000000e+00 : f32
    %373 = vector.broadcast %cst_86 : f32 to vector<2x128xf32>
    %374 = arith.addf %373, %372 : vector<2x128xf32>
    %375 = arith.divf %373, %374 : vector<2x128xf32>
    %376 = vector.extract_strided_slice %366 {offsets = [0, 128], sizes = [2, 128], strides = [1, 1]} : vector<2x512xf32> to vector<2x128xf32>
    %377 = arith.negf %376 : vector<2x128xf32>
    %378 = math.exp %377 : vector<2x128xf32>
    %cst_87 = arith.constant 1.000000e+00 : f32
    %379 = vector.broadcast %cst_87 : f32 to vector<2x128xf32>
    %380 = arith.addf %379, %378 : vector<2x128xf32>
    %381 = arith.divf %379, %380 : vector<2x128xf32>
    %382 = vector.extract_strided_slice %366 {offsets = [0, 256], sizes = [2, 128], strides = [1, 1]} : vector<2x512xf32> to vector<2x128xf32>
    %383 = math.tanh %382 : vector<2x128xf32>
    %384 = vector.extract_strided_slice %366 {offsets = [0, 384], sizes = [2, 128], strides = [1, 1]} : vector<2x512xf32> to vector<2x128xf32>
    %385 = arith.negf %384 : vector<2x128xf32>
    %386 = math.exp %385 : vector<2x128xf32>
    %cst_88 = arith.constant 1.000000e+00 : f32
    %387 = vector.broadcast %cst_88 : f32 to vector<2x128xf32>
    %388 = arith.addf %387, %386 : vector<2x128xf32>
    %389 = arith.divf %387, %388 : vector<2x128xf32>
    %390 = arith.mulf %381, %334 : vector<2x128xf32>
    %391 = arith.mulf %375, %383 : vector<2x128xf32>
    %392 = arith.addf %390, %391 : vector<2x128xf32>
    %393 = math.tanh %392 : vector<2x128xf32>
    %394 = arith.mulf %389, %393 : vector<2x128xf32>
    %395 = vector.extract_strided_slice %369 {offsets = [0, 0], sizes = [2, 128], strides = [1, 1]} : vector<2x512xf32> to vector<2x128xf32>
    %396 = arith.negf %395 : vector<2x128xf32>
    %397 = math.exp %396 : vector<2x128xf32>
    %cst_89 = arith.constant 1.000000e+00 : f32
    %398 = vector.broadcast %cst_89 : f32 to vector<2x128xf32>
    %399 = arith.addf %398, %397 : vector<2x128xf32>
    %400 = arith.divf %398, %399 : vector<2x128xf32>
    %401 = vector.extract_strided_slice %369 {offsets = [0, 128], sizes = [2, 128], strides = [1, 1]} : vector<2x512xf32> to vector<2x128xf32>
    %402 = arith.negf %401 : vector<2x128xf32>
    %403 = math.exp %402 : vector<2x128xf32>
    %cst_90 = arith.constant 1.000000e+00 : f32
    %404 = vector.broadcast %cst_90 : f32 to vector<2x128xf32>
    %405 = arith.addf %404, %403 : vector<2x128xf32>
    %406 = arith.divf %404, %405 : vector<2x128xf32>
    %407 = vector.extract_strided_slice %369 {offsets = [0, 256], sizes = [2, 128], strides = [1, 1]} : vector<2x512xf32> to vector<2x128xf32>
    %408 = math.tanh %407 : vector<2x128xf32>
    %409 = vector.extract_strided_slice %369 {offsets = [0, 384], sizes = [2, 128], strides = [1, 1]} : vector<2x512xf32> to vector<2x128xf32>
    %410 = arith.negf %409 : vector<2x128xf32>
    %411 = math.exp %410 : vector<2x128xf32>
    %cst_91 = arith.constant 1.000000e+00 : f32
    %412 = vector.broadcast %cst_91 : f32 to vector<2x128xf32>
    %413 = arith.addf %412, %411 : vector<2x128xf32>
    %414 = arith.divf %412, %413 : vector<2x128xf32>
    %415 = arith.mulf %406, %359 : vector<2x128xf32>
    %416 = arith.mulf %400, %408 : vector<2x128xf32>
    %417 = arith.addf %415, %416 : vector<2x128xf32>
    %418 = math.tanh %417 : vector<2x128xf32>
    %419 = arith.mulf %414, %418 : vector<2x128xf32>
    %c12_92 = arith.constant 12 : index
    %c0_93 = arith.constant 0 : index
    %420 = vector.load %arg15[%c12_92, %c0_93] : memref<16x256xf32, #tpu.memory_space<vmem>>, vector<2x128xf32>
    tpu.vector_store %arg15[%c12_92, %c0_93], %394 {strides = array<i32>} : memref<16x256xf32, #tpu.memory_space<vmem>>, vector<2x128xf32>,
    %c2_94 = arith.constant 2 : index
    %c128_95 = arith.constant 128 : index
    %421 = vector.load %arg15[%c2_94, %c128_95] : memref<16x256xf32, #tpu.memory_space<vmem>>, vector<2x128xf32>
    tpu.vector_store %arg15[%c2_94, %c128_95], %419 {strides = array<i32>} : memref<16x256xf32, #tpu.memory_space<vmem>>, vector<2x128xf32>,
    %cst_96 = arith.constant dense<0.000000e+00> : vector<2x512xf32>
    %422 = tpu.matmul %394, %6, %cst_96 {dimension_numbers = #tpu.dot_dimension_numbers<[1], [0], [0], [1], [0, 0, 1, 1], [], []>} : vector<2x128xf32>, vector<128x512xf32>, vector<2x512xf32> -> vector<2x512xf32>
    %423 = vector.extract_strided_slice %5 {offsets = [14, 0], sizes = [2, 512], strides = [1, 1]} : vector<16x1024xf32> to vector<2x512xf32>
    %424 = arith.addf %422, %423 : vector<2x512xf32>
    %cst_97 = arith.constant dense<0.000000e+00> : vector<2x512xf32>
    %425 = tpu.matmul %419, %7, %cst_97 {dimension_numbers = #tpu.dot_dimension_numbers<[1], [0], [0], [1], [0, 0, 1, 1], [], []>} : vector<2x128xf32>, vector<128x512xf32>, vector<2x512xf32> -> vector<2x512xf32>
    %426 = vector.extract_strided_slice %5 {offsets = [0, 512], sizes = [2, 512], strides = [1, 1]} : vector<16x1024xf32> to vector<2x512xf32>
    %427 = arith.addf %425, %426 : vector<2x512xf32>
    %428 = vector.extract_strided_slice %424 {offsets = [0, 0], sizes = [2, 128], strides = [1, 1]} : vector<2x512xf32> to vector<2x128xf32>
    %429 = arith.negf %428 : vector<2x128xf32>
    %430 = math.exp %429 : vector<2x128xf32>
    %cst_98 = arith.constant 1.000000e+00 : f32
    %431 = vector.broadcast %cst_98 : f32 to vector<2x128xf32>
    %432 = arith.addf %431, %430 : vector<2x128xf32>
    %433 = arith.divf %431, %432 : vector<2x128xf32>
    %434 = vector.extract_strided_slice %424 {offsets = [0, 128], sizes = [2, 128], strides = [1, 1]} : vector<2x512xf32> to vector<2x128xf32>
    %435 = arith.negf %434 : vector<2x128xf32>
    %436 = math.exp %435 : vector<2x128xf32>
    %cst_99 = arith.constant 1.000000e+00 : f32
    %437 = vector.broadcast %cst_99 : f32 to vector<2x128xf32>
    %438 = arith.addf %437, %436 : vector<2x128xf32>
    %439 = arith.divf %437, %438 : vector<2x128xf32>
    %440 = vector.extract_strided_slice %424 {offsets = [0, 256], sizes = [2, 128], strides = [1, 1]} : vector<2x512xf32> to vector<2x128xf32>
    %441 = math.tanh %440 : vector<2x128xf32>
    %442 = vector.extract_strided_slice %424 {offsets = [0, 384], sizes = [2, 128], strides = [1, 1]} : vector<2x512xf32> to vector<2x128xf32>
    %443 = arith.negf %442 : vector<2x128xf32>
    %444 = math.exp %443 : vector<2x128xf32>
    %cst_100 = arith.constant 1.000000e+00 : f32
    %445 = vector.broadcast %cst_100 : f32 to vector<2x128xf32>
    %446 = arith.addf %445, %444 : vector<2x128xf32>
    %447 = arith.divf %445, %446 : vector<2x128xf32>
    %448 = arith.mulf %439, %392 : vector<2x128xf32>
    %449 = arith.mulf %433, %441 : vector<2x128xf32>
    %450 = arith.addf %448, %449 : vector<2x128xf32>
    %451 = math.tanh %450 : vector<2x128xf32>
    %452 = arith.mulf %447, %451 : vector<2x128xf32>
    %453 = vector.extract_strided_slice %427 {offsets = [0, 0], sizes = [2, 128], strides = [1, 1]} : vector<2x512xf32> to vector<2x128xf32>
    %454 = arith.negf %453 : vector<2x128xf32>
    %455 = math.exp %454 : vector<2x128xf32>
    %cst_101 = arith.constant 1.000000e+00 : f32
    %456 = vector.broadcast %cst_101 : f32 to vector<2x128xf32>
    %457 = arith.addf %456, %455 : vector<2x128xf32>
    %458 = arith.divf %456, %457 : vector<2x128xf32>
    %459 = vector.extract_strided_slice %427 {offsets = [0, 128], sizes = [2, 128], strides = [1, 1]} : vector<2x512xf32> to vector<2x128xf32>
    %460 = arith.negf %459 : vector<2x128xf32>
    %461 = math.exp %460 : vector<2x128xf32>
    %cst_102 = arith.constant 1.000000e+00 : f32
    %462 = vector.broadcast %cst_102 : f32 to vector<2x128xf32>
    %463 = arith.addf %462, %461 : vector<2x128xf32>
    %464 = arith.divf %462, %463 : vector<2x128xf32>
    %465 = vector.extract_strided_slice %427 {offsets = [0, 256], sizes = [2, 128], strides = [1, 1]} : vector<2x512xf32> to vector<2x128xf32>
    %466 = math.tanh %465 : vector<2x128xf32>
    %467 = vector.extract_strided_slice %427 {offsets = [0, 384], sizes = [2, 128], strides = [1, 1]} : vector<2x512xf32> to vector<2x128xf32>
    %468 = arith.negf %467 : vector<2x128xf32>
    %469 = math.exp %468 : vector<2x128xf32>
    %cst_103 = arith.constant 1.000000e+00 : f32
    %470 = vector.broadcast %cst_103 : f32 to vector<2x128xf32>
    %471 = arith.addf %470, %469 : vector<2x128xf32>
    %472 = arith.divf %470, %471 : vector<2x128xf32>
    %473 = arith.mulf %464, %417 : vector<2x128xf32>
    %474 = arith.mulf %458, %466 : vector<2x128xf32>
    %475 = arith.addf %473, %474 : vector<2x128xf32>
    %476 = math.tanh %475 : vector<2x128xf32>
    %477 = arith.mulf %472, %476 : vector<2x128xf32>
    %c14_104 = arith.constant 14 : index
    %c0_105 = arith.constant 0 : index
    %478 = vector.load %arg15[%c14_104, %c0_105] : memref<16x256xf32, #tpu.memory_space<vmem>>, vector<2x128xf32>
    tpu.vector_store %arg15[%c14_104, %c0_105], %452 {strides = array<i32>} : memref<16x256xf32, #tpu.memory_space<vmem>>, vector<2x128xf32>,
    %c0_106 = arith.constant 0 : index
    %c128_107 = arith.constant 128 : index
    %479 = vector.load %arg15[%c0_106, %c128_107] : memref<16x256xf32, #tpu.memory_space<vmem>>, vector<2x128xf32>
    tpu.vector_store %arg15[%c0_106, %c128_107], %477 {strides = array<i32>} : memref<16x256xf32, #tpu.memory_space<vmem>>, vector<2x128xf32>,
    %c0_108 = arith.constant 0 : index
    %c0_109 = arith.constant 0 : index
    %480 = vector.load %arg15[%c0_108, %c0_109] : memref<16x256xf32, #tpu.memory_space<vmem>>, vector<16x256xf32>
    %c0_110 = arith.constant 0 : index
    %c0_111 = arith.constant 0 : index
    %481 = vector.load %arg7[%c0_110, %c0_111] : memref<256x512xf32, #tpu.memory_space<vmem>>, vector<256x512xf32>
    %cst_112 = arith.constant dense<0.000000e+00> : vector<16x512xf32>
    %482 = tpu.matmul %480, %481, %cst_112 {dimension_numbers = #tpu.dot_dimension_numbers<[1], [0], [0], [1], [0, 0, 1, 1], [], []>} : vector<16x256xf32>, vector<256x512xf32>, vector<16x512xf32> -> vector<16x512xf32>
    %c0_113 = arith.constant 0 : index
    %c0_114 = arith.constant 0 : index
    %483 = vector.load %arg9[%c0_113, %c0_114] : memref<1x512xf32, #tpu.memory_space<vmem>>, vector<1x512xf32>
    %484 = vector.broadcast %483 : vector<1x512xf32> to vector<16x512xf32>
    %485 = arith.addf %482, %484 : vector<16x512xf32>
    %c0_115 = arith.constant 0 : index
    %c0_116 = arith.constant 0 : index
    %486 = vector.load %arg8[%c0_115, %c0_116] : memref<128x512xf32, #tpu.memory_space<vmem>>, vector<128x512xf32>
    %cst_117 = arith.constant 0.000000e+00 : f32
    %487 = vector.broadcast %cst_117 : f32 to vector<2x128xf32>
    %cst_118 = arith.constant 0.000000e+00 : f32
    %488 = vector.broadcast %cst_118 : f32 to vector<2x128xf32>
    %cst_119 = arith.constant dense<0.000000e+00> : vector<2x512xf32>
    %489 = tpu.matmul %487, %486, %cst_119 {dimension_numbers = #tpu.dot_dimension_numbers<[1], [0], [0], [1], [0, 0, 1, 1], [], []>} : vector<2x128xf32>, vector<128x512xf32>, vector<2x512xf32> -> vector<2x512xf32>
    %490 = vector.extract_strided_slice %485 {offsets = [0, 0], sizes = [2, 512], strides = [1, 1]} : vector<16x512xf32> to vector<2x512xf32>
    %491 = arith.addf %489, %490 : vector<2x512xf32>
    %492 = vector.extract_strided_slice %491 {offsets = [0, 0], sizes = [2, 128], strides = [1, 1]} : vector<2x512xf32> to vector<2x128xf32>
    %493 = arith.negf %492 : vector<2x128xf32>
    %494 = math.exp %493 : vector<2x128xf32>
    %cst_120 = arith.constant 1.000000e+00 : f32
    %495 = vector.broadcast %cst_120 : f32 to vector<2x128xf32>
    %496 = arith.addf %495, %494 : vector<2x128xf32>
    %497 = arith.divf %495, %496 : vector<2x128xf32>
    %498 = vector.extract_strided_slice %491 {offsets = [0, 128], sizes = [2, 128], strides = [1, 1]} : vector<2x512xf32> to vector<2x128xf32>
    %499 = arith.negf %498 : vector<2x128xf32>
    %500 = math.exp %499 : vector<2x128xf32>
    %cst_121 = arith.constant 1.000000e+00 : f32
    %501 = vector.broadcast %cst_121 : f32 to vector<2x128xf32>
    %502 = arith.addf %501, %500 : vector<2x128xf32>
    %503 = arith.divf %501, %502 : vector<2x128xf32>
    %504 = vector.extract_strided_slice %491 {offsets = [0, 256], sizes = [2, 128], strides = [1, 1]} : vector<2x512xf32> to vector<2x128xf32>
    %505 = math.tanh %504 : vector<2x128xf32>
    %506 = vector.extract_strided_slice %491 {offsets = [0, 384], sizes = [2, 128], strides = [1, 1]} : vector<2x512xf32> to vector<2x128xf32>
    %507 = arith.negf %506 : vector<2x128xf32>
    %508 = math.exp %507 : vector<2x128xf32>
    %cst_122 = arith.constant 1.000000e+00 : f32
    %509 = vector.broadcast %cst_122 : f32 to vector<2x128xf32>
    %510 = arith.addf %509, %508 : vector<2x128xf32>
    %511 = arith.divf %509, %510 : vector<2x128xf32>
    %512 = arith.mulf %503, %488 : vector<2x128xf32>
    %513 = arith.mulf %497, %505 : vector<2x128xf32>
    %514 = arith.addf %512, %513 : vector<2x128xf32>
    %515 = math.tanh %514 : vector<2x128xf32>
    %516 = arith.mulf %511, %515 : vector<2x128xf32>
    %cst_123 = arith.constant dense<0.000000e+00> : vector<2x512xf32>
    %517 = tpu.matmul %516, %486, %cst_123 {dimension_numbers = #tpu.dot_dimension_numbers<[1], [0], [0], [1], [0, 0, 1, 1], [], []>} : vector<2x128xf32>, vector<128x512xf32>, vector<2x512xf32> -> vector<2x512xf32>
    %518 = vector.extract_strided_slice %485 {offsets = [2, 0], sizes = [2, 512], strides = [1, 1]} : vector<16x512xf32> to vector<2x512xf32>
    %519 = arith.addf %517, %518 : vector<2x512xf32>
    %520 = vector.extract_strided_slice %519 {offsets = [0, 0], sizes = [2, 128], strides = [1, 1]} : vector<2x512xf32> to vector<2x128xf32>
    %521 = arith.negf %520 : vector<2x128xf32>
    %522 = math.exp %521 : vector<2x128xf32>
    %cst_124 = arith.constant 1.000000e+00 : f32
    %523 = vector.broadcast %cst_124 : f32 to vector<2x128xf32>
    %524 = arith.addf %523, %522 : vector<2x128xf32>
    %525 = arith.divf %523, %524 : vector<2x128xf32>
    %526 = vector.extract_strided_slice %519 {offsets = [0, 128], sizes = [2, 128], strides = [1, 1]} : vector<2x512xf32> to vector<2x128xf32>
    %527 = arith.negf %526 : vector<2x128xf32>
    %528 = math.exp %527 : vector<2x128xf32>
    %cst_125 = arith.constant 1.000000e+00 : f32
    %529 = vector.broadcast %cst_125 : f32 to vector<2x128xf32>
    %530 = arith.addf %529, %528 : vector<2x128xf32>
    %531 = arith.divf %529, %530 : vector<2x128xf32>
    %532 = vector.extract_strided_slice %519 {offsets = [0, 256], sizes = [2, 128], strides = [1, 1]} : vector<2x512xf32> to vector<2x128xf32>
    %533 = math.tanh %532 : vector<2x128xf32>
    %534 = vector.extract_strided_slice %519 {offsets = [0, 384], sizes = [2, 128], strides = [1, 1]} : vector<2x512xf32> to vector<2x128xf32>
    %535 = arith.negf %534 : vector<2x128xf32>
    %536 = math.exp %535 : vector<2x128xf32>
    %cst_126 = arith.constant 1.000000e+00 : f32
    %537 = vector.broadcast %cst_126 : f32 to vector<2x128xf32>
    %538 = arith.addf %537, %536 : vector<2x128xf32>
    %539 = arith.divf %537, %538 : vector<2x128xf32>
    %540 = arith.mulf %531, %514 : vector<2x128xf32>
    %541 = arith.mulf %525, %533 : vector<2x128xf32>
    %542 = arith.addf %540, %541 : vector<2x128xf32>
    %543 = math.tanh %542 : vector<2x128xf32>
    %544 = arith.mulf %539, %543 : vector<2x128xf32>
    %cst_127 = arith.constant dense<0.000000e+00> : vector<2x512xf32>
    %545 = tpu.matmul %544, %486, %cst_127 {dimension_numbers = #tpu.dot_dimension_numbers<[1], [0], [0], [1], [0, 0, 1, 1], [], []>} : vector<2x128xf32>, vector<128x512xf32>, vector<2x512xf32> -> vector<2x512xf32>
    %546 = vector.extract_strided_slice %485 {offsets = [4, 0], sizes = [2, 512], strides = [1, 1]} : vector<16x512xf32> to vector<2x512xf32>
    %547 = arith.addf %545, %546 : vector<2x512xf32>
    %548 = vector.extract_strided_slice %547 {offsets = [0, 0], sizes = [2, 128], strides = [1, 1]} : vector<2x512xf32> to vector<2x128xf32>
    %549 = arith.negf %548 : vector<2x128xf32>
    %550 = math.exp %549 : vector<2x128xf32>
    %cst_128 = arith.constant 1.000000e+00 : f32
    %551 = vector.broadcast %cst_128 : f32 to vector<2x128xf32>
    %552 = arith.addf %551, %550 : vector<2x128xf32>
    %553 = arith.divf %551, %552 : vector<2x128xf32>
    %554 = vector.extract_strided_slice %547 {offsets = [0, 128], sizes = [2, 128], strides = [1, 1]} : vector<2x512xf32> to vector<2x128xf32>
    %555 = arith.negf %554 : vector<2x128xf32>
    %556 = math.exp %555 : vector<2x128xf32>
    %cst_129 = arith.constant 1.000000e+00 : f32
    %557 = vector.broadcast %cst_129 : f32 to vector<2x128xf32>
    %558 = arith.addf %557, %556 : vector<2x128xf32>
    %559 = arith.divf %557, %558 : vector<2x128xf32>
    %560 = vector.extract_strided_slice %547 {offsets = [0, 256], sizes = [2, 128], strides = [1, 1]} : vector<2x512xf32> to vector<2x128xf32>
    %561 = math.tanh %560 : vector<2x128xf32>
    %562 = vector.extract_strided_slice %547 {offsets = [0, 384], sizes = [2, 128], strides = [1, 1]} : vector<2x512xf32> to vector<2x128xf32>
    %563 = arith.negf %562 : vector<2x128xf32>
    %564 = math.exp %563 : vector<2x128xf32>
    %cst_130 = arith.constant 1.000000e+00 : f32
    %565 = vector.broadcast %cst_130 : f32 to vector<2x128xf32>
    %566 = arith.addf %565, %564 : vector<2x128xf32>
    %567 = arith.divf %565, %566 : vector<2x128xf32>
    %568 = arith.mulf %559, %542 : vector<2x128xf32>
    %569 = arith.mulf %553, %561 : vector<2x128xf32>
    %570 = arith.addf %568, %569 : vector<2x128xf32>
    %571 = math.tanh %570 : vector<2x128xf32>
    %572 = arith.mulf %567, %571 : vector<2x128xf32>
    %cst_131 = arith.constant dense<0.000000e+00> : vector<2x512xf32>
    %573 = tpu.matmul %572, %486, %cst_131 {dimension_numbers = #tpu.dot_dimension_numbers<[1], [0], [0], [1], [0, 0, 1, 1], [], []>} : vector<2x128xf32>, vector<128x512xf32>, vector<2x512xf32> -> vector<2x512xf32>
    %574 = vector.extract_strided_slice %485 {offsets = [6, 0], sizes = [2, 512], strides = [1, 1]} : vector<16x512xf32> to vector<2x512xf32>
    %575 = arith.addf %573, %574 : vector<2x512xf32>
    %576 = vector.extract_strided_slice %575 {offsets = [0, 0], sizes = [2, 128], strides = [1, 1]} : vector<2x512xf32> to vector<2x128xf32>
    %577 = arith.negf %576 : vector<2x128xf32>
    %578 = math.exp %577 : vector<2x128xf32>
    %cst_132 = arith.constant 1.000000e+00 : f32
    %579 = vector.broadcast %cst_132 : f32 to vector<2x128xf32>
    %580 = arith.addf %579, %578 : vector<2x128xf32>
    %581 = arith.divf %579, %580 : vector<2x128xf32>
    %582 = vector.extract_strided_slice %575 {offsets = [0, 128], sizes = [2, 128], strides = [1, 1]} : vector<2x512xf32> to vector<2x128xf32>
    %583 = arith.negf %582 : vector<2x128xf32>
    %584 = math.exp %583 : vector<2x128xf32>
    %cst_133 = arith.constant 1.000000e+00 : f32
    %585 = vector.broadcast %cst_133 : f32 to vector<2x128xf32>
    %586 = arith.addf %585, %584 : vector<2x128xf32>
    %587 = arith.divf %585, %586 : vector<2x128xf32>
    %588 = vector.extract_strided_slice %575 {offsets = [0, 256], sizes = [2, 128], strides = [1, 1]} : vector<2x512xf32> to vector<2x128xf32>
    %589 = math.tanh %588 : vector<2x128xf32>
    %590 = vector.extract_strided_slice %575 {offsets = [0, 384], sizes = [2, 128], strides = [1, 1]} : vector<2x512xf32> to vector<2x128xf32>
    %591 = arith.negf %590 : vector<2x128xf32>
    %592 = math.exp %591 : vector<2x128xf32>
    %cst_134 = arith.constant 1.000000e+00 : f32
    %593 = vector.broadcast %cst_134 : f32 to vector<2x128xf32>
    %594 = arith.addf %593, %592 : vector<2x128xf32>
    %595 = arith.divf %593, %594 : vector<2x128xf32>
    %596 = arith.mulf %587, %570 : vector<2x128xf32>
    %597 = arith.mulf %581, %589 : vector<2x128xf32>
    %598 = arith.addf %596, %597 : vector<2x128xf32>
    %599 = math.tanh %598 : vector<2x128xf32>
    %600 = arith.mulf %595, %599 : vector<2x128xf32>
    %cst_135 = arith.constant dense<0.000000e+00> : vector<2x512xf32>
    %601 = tpu.matmul %600, %486, %cst_135 {dimension_numbers = #tpu.dot_dimension_numbers<[1], [0], [0], [1], [0, 0, 1, 1], [], []>} : vector<2x128xf32>, vector<128x512xf32>, vector<2x512xf32> -> vector<2x512xf32>
    %602 = vector.extract_strided_slice %485 {offsets = [8, 0], sizes = [2, 512], strides = [1, 1]} : vector<16x512xf32> to vector<2x512xf32>
    %603 = arith.addf %601, %602 : vector<2x512xf32>
    %604 = vector.extract_strided_slice %603 {offsets = [0, 0], sizes = [2, 128], strides = [1, 1]} : vector<2x512xf32> to vector<2x128xf32>
    %605 = arith.negf %604 : vector<2x128xf32>
    %606 = math.exp %605 : vector<2x128xf32>
    %cst_136 = arith.constant 1.000000e+00 : f32
    %607 = vector.broadcast %cst_136 : f32 to vector<2x128xf32>
    %608 = arith.addf %607, %606 : vector<2x128xf32>
    %609 = arith.divf %607, %608 : vector<2x128xf32>
    %610 = vector.extract_strided_slice %603 {offsets = [0, 128], sizes = [2, 128], strides = [1, 1]} : vector<2x512xf32> to vector<2x128xf32>
    %611 = arith.negf %610 : vector<2x128xf32>
    %612 = math.exp %611 : vector<2x128xf32>
    %cst_137 = arith.constant 1.000000e+00 : f32
    %613 = vector.broadcast %cst_137 : f32 to vector<2x128xf32>
    %614 = arith.addf %613, %612 : vector<2x128xf32>
    %615 = arith.divf %613, %614 : vector<2x128xf32>
    %616 = vector.extract_strided_slice %603 {offsets = [0, 256], sizes = [2, 128], strides = [1, 1]} : vector<2x512xf32> to vector<2x128xf32>
    %617 = math.tanh %616 : vector<2x128xf32>
    %618 = vector.extract_strided_slice %603 {offsets = [0, 384], sizes = [2, 128], strides = [1, 1]} : vector<2x512xf32> to vector<2x128xf32>
    %619 = arith.negf %618 : vector<2x128xf32>
    %620 = math.exp %619 : vector<2x128xf32>
    %cst_138 = arith.constant 1.000000e+00 : f32
    %621 = vector.broadcast %cst_138 : f32 to vector<2x128xf32>
    %622 = arith.addf %621, %620 : vector<2x128xf32>
    %623 = arith.divf %621, %622 : vector<2x128xf32>
    %624 = arith.mulf %615, %598 : vector<2x128xf32>
    %625 = arith.mulf %609, %617 : vector<2x128xf32>
    %626 = arith.addf %624, %625 : vector<2x128xf32>
    %627 = math.tanh %626 : vector<2x128xf32>
    %628 = arith.mulf %623, %627 : vector<2x128xf32>
    %cst_139 = arith.constant dense<0.000000e+00> : vector<2x512xf32>
    %629 = tpu.matmul %628, %486, %cst_139 {dimension_numbers = #tpu.dot_dimension_numbers<[1], [0], [0], [1], [0, 0, 1, 1], [], []>} : vector<2x128xf32>, vector<128x512xf32>, vector<2x512xf32> -> vector<2x512xf32>
    %630 = vector.extract_strided_slice %485 {offsets = [10, 0], sizes = [2, 512], strides = [1, 1]} : vector<16x512xf32> to vector<2x512xf32>
    %631 = arith.addf %629, %630 : vector<2x512xf32>
    %632 = vector.extract_strided_slice %631 {offsets = [0, 0], sizes = [2, 128], strides = [1, 1]} : vector<2x512xf32> to vector<2x128xf32>
    %633 = arith.negf %632 : vector<2x128xf32>
    %634 = math.exp %633 : vector<2x128xf32>
    %cst_140 = arith.constant 1.000000e+00 : f32
    %635 = vector.broadcast %cst_140 : f32 to vector<2x128xf32>
    %636 = arith.addf %635, %634 : vector<2x128xf32>
    %637 = arith.divf %635, %636 : vector<2x128xf32>
    %638 = vector.extract_strided_slice %631 {offsets = [0, 128], sizes = [2, 128], strides = [1, 1]} : vector<2x512xf32> to vector<2x128xf32>
    %639 = arith.negf %638 : vector<2x128xf32>
    %640 = math.exp %639 : vector<2x128xf32>
    %cst_141 = arith.constant 1.000000e+00 : f32
    %641 = vector.broadcast %cst_141 : f32 to vector<2x128xf32>
    %642 = arith.addf %641, %640 : vector<2x128xf32>
    %643 = arith.divf %641, %642 : vector<2x128xf32>
    %644 = vector.extract_strided_slice %631 {offsets = [0, 256], sizes = [2, 128], strides = [1, 1]} : vector<2x512xf32> to vector<2x128xf32>
    %645 = math.tanh %644 : vector<2x128xf32>
    %646 = vector.extract_strided_slice %631 {offsets = [0, 384], sizes = [2, 128], strides = [1, 1]} : vector<2x512xf32> to vector<2x128xf32>
    %647 = arith.negf %646 : vector<2x128xf32>
    %648 = math.exp %647 : vector<2x128xf32>
    %cst_142 = arith.constant 1.000000e+00 : f32
    %649 = vector.broadcast %cst_142 : f32 to vector<2x128xf32>
    %650 = arith.addf %649, %648 : vector<2x128xf32>
    %651 = arith.divf %649, %650 : vector<2x128xf32>
    %652 = arith.mulf %643, %626 : vector<2x128xf32>
    %653 = arith.mulf %637, %645 : vector<2x128xf32>
    %654 = arith.addf %652, %653 : vector<2x128xf32>
    %655 = math.tanh %654 : vector<2x128xf32>
    %656 = arith.mulf %651, %655 : vector<2x128xf32>
    %cst_143 = arith.constant dense<0.000000e+00> : vector<2x512xf32>
    %657 = tpu.matmul %656, %486, %cst_143 {dimension_numbers = #tpu.dot_dimension_numbers<[1], [0], [0], [1], [0, 0, 1, 1], [], []>} : vector<2x128xf32>, vector<128x512xf32>, vector<2x512xf32> -> vector<2x512xf32>
    %658 = vector.extract_strided_slice %485 {offsets = [12, 0], sizes = [2, 512], strides = [1, 1]} : vector<16x512xf32> to vector<2x512xf32>
    %659 = arith.addf %657, %658 : vector<2x512xf32>
    %660 = vector.extract_strided_slice %659 {offsets = [0, 0], sizes = [2, 128], strides = [1, 1]} : vector<2x512xf32> to vector<2x128xf32>
    %661 = arith.negf %660 : vector<2x128xf32>
    %662 = math.exp %661 : vector<2x128xf32>
    %cst_144 = arith.constant 1.000000e+00 : f32
    %663 = vector.broadcast %cst_144 : f32 to vector<2x128xf32>
    %664 = arith.addf %663, %662 : vector<2x128xf32>
    %665 = arith.divf %663, %664 : vector<2x128xf32>
    %666 = vector.extract_strided_slice %659 {offsets = [0, 128], sizes = [2, 128], strides = [1, 1]} : vector<2x512xf32> to vector<2x128xf32>
    %667 = arith.negf %666 : vector<2x128xf32>
    %668 = math.exp %667 : vector<2x128xf32>
    %cst_145 = arith.constant 1.000000e+00 : f32
    %669 = vector.broadcast %cst_145 : f32 to vector<2x128xf32>
    %670 = arith.addf %669, %668 : vector<2x128xf32>
    %671 = arith.divf %669, %670 : vector<2x128xf32>
    %672 = vector.extract_strided_slice %659 {offsets = [0, 256], sizes = [2, 128], strides = [1, 1]} : vector<2x512xf32> to vector<2x128xf32>
    %673 = math.tanh %672 : vector<2x128xf32>
    %674 = vector.extract_strided_slice %659 {offsets = [0, 384], sizes = [2, 128], strides = [1, 1]} : vector<2x512xf32> to vector<2x128xf32>
    %675 = arith.negf %674 : vector<2x128xf32>
    %676 = math.exp %675 : vector<2x128xf32>
    %cst_146 = arith.constant 1.000000e+00 : f32
    %677 = vector.broadcast %cst_146 : f32 to vector<2x128xf32>
    %678 = arith.addf %677, %676 : vector<2x128xf32>
    %679 = arith.divf %677, %678 : vector<2x128xf32>
    %680 = arith.mulf %671, %654 : vector<2x128xf32>
    %681 = arith.mulf %665, %673 : vector<2x128xf32>
    %682 = arith.addf %680, %681 : vector<2x128xf32>
    %683 = math.tanh %682 : vector<2x128xf32>
    %684 = arith.mulf %679, %683 : vector<2x128xf32>
    %cst_147 = arith.constant dense<0.000000e+00> : vector<2x512xf32>
    %685 = tpu.matmul %684, %486, %cst_147 {dimension_numbers = #tpu.dot_dimension_numbers<[1], [0], [0], [1], [0, 0, 1, 1], [], []>} : vector<2x128xf32>, vector<128x512xf32>, vector<2x512xf32> -> vector<2x512xf32>
    %686 = vector.extract_strided_slice %485 {offsets = [14, 0], sizes = [2, 512], strides = [1, 1]} : vector<16x512xf32> to vector<2x512xf32>
    %687 = arith.addf %685, %686 : vector<2x512xf32>
    %688 = vector.extract_strided_slice %687 {offsets = [0, 0], sizes = [2, 128], strides = [1, 1]} : vector<2x512xf32> to vector<2x128xf32>
    %689 = arith.negf %688 : vector<2x128xf32>
    %690 = math.exp %689 : vector<2x128xf32>
    %cst_148 = arith.constant 1.000000e+00 : f32
    %691 = vector.broadcast %cst_148 : f32 to vector<2x128xf32>
    %692 = arith.addf %691, %690 : vector<2x128xf32>
    %693 = arith.divf %691, %692 : vector<2x128xf32>
    %694 = vector.extract_strided_slice %687 {offsets = [0, 128], sizes = [2, 128], strides = [1, 1]} : vector<2x512xf32> to vector<2x128xf32>
    %695 = arith.negf %694 : vector<2x128xf32>
    %696 = math.exp %695 : vector<2x128xf32>
    %cst_149 = arith.constant 1.000000e+00 : f32
    %697 = vector.broadcast %cst_149 : f32 to vector<2x128xf32>
    %698 = arith.addf %697, %696 : vector<2x128xf32>
    %699 = arith.divf %697, %698 : vector<2x128xf32>
    %700 = vector.extract_strided_slice %687 {offsets = [0, 256], sizes = [2, 128], strides = [1, 1]} : vector<2x512xf32> to vector<2x128xf32>
    %701 = math.tanh %700 : vector<2x128xf32>
    %702 = vector.extract_strided_slice %687 {offsets = [0, 384], sizes = [2, 128], strides = [1, 1]} : vector<2x512xf32> to vector<2x128xf32>
    %703 = arith.negf %702 : vector<2x128xf32>
    %704 = math.exp %703 : vector<2x128xf32>
    %cst_150 = arith.constant 1.000000e+00 : f32
    %705 = vector.broadcast %cst_150 : f32 to vector<2x128xf32>
    %706 = arith.addf %705, %704 : vector<2x128xf32>
    %707 = arith.divf %705, %706 : vector<2x128xf32>
    %708 = arith.mulf %699, %682 : vector<2x128xf32>
    %709 = arith.mulf %693, %701 : vector<2x128xf32>
    %710 = arith.addf %708, %709 : vector<2x128xf32>
    %711 = math.tanh %710 : vector<2x128xf32>
    %712 = arith.mulf %707, %711 : vector<2x128xf32>
    %c0_151 = arith.constant 0 : index
    %c0_152 = arith.constant 0 : index
    %713 = vector.load %arg10[%c0_151, %c0_152] : memref<128x128xf32, #tpu.memory_space<vmem>>, vector<128x128xf32>
    %cst_153 = arith.constant dense<0.000000e+00> : vector<2x128xf32>
    %714 = tpu.matmul %712, %713, %cst_153 {dimension_numbers = #tpu.dot_dimension_numbers<[1], [0], [0], [1], [0, 0, 1, 1], [], []>} : vector<2x128xf32>, vector<128x128xf32>, vector<2x128xf32> -> vector<2x128xf32>
    %c0_154 = arith.constant 0 : index
    %c0_155 = arith.constant 0 : index
    %715 = vector.load %arg11[%c0_154, %c0_155] : memref<1x128xf32, #tpu.memory_space<vmem>>, vector<1x128xf32>
    %716 = vector.broadcast %715 : vector<1x128xf32> to vector<2x128xf32>
    %717 = arith.addf %714, %716 : vector<2x128xf32>
    %cst_156 = arith.constant 0.000000e+00 : f32
    %718 = vector.broadcast %cst_156 : f32 to vector<2x128xf32>
    %719 = arith.maximumf %717, %718 : vector<2x128xf32>
    %c0_157 = arith.constant 0 : index
    %c0_158 = arith.constant 0 : index
    %720 = vector.load %arg12[%c0_157, %c0_158] : memref<128x4xf32, #tpu.memory_space<vmem>>, vector<128x4xf32>
    %cst_159 = arith.constant dense<0.000000e+00> : vector<2x4xf32>
    %721 = tpu.matmul %719, %720, %cst_159 {dimension_numbers = #tpu.dot_dimension_numbers<[1], [0], [0], [1], [0, 0, 1, 1], [], []>} : vector<2x128xf32>, vector<128x4xf32>, vector<2x4xf32> -> vector<2x4xf32>
    %c0_160 = arith.constant 0 : index
    %c0_161 = arith.constant 0 : index
    %722 = vector.load %arg13[%c0_160, %c0_161] : memref<1x4xf32, #tpu.memory_space<vmem>>, vector<1x4xf32>
    %723 = vector.broadcast %722 : vector<1x4xf32> to vector<2x4xf32>
    %724 = arith.addf %721, %723 : vector<2x4xf32>
    %c0_162 = arith.constant 0 : index
    %c0_163 = arith.constant 0 : index
    %725 = vector.load %arg14[%c0_162, %c0_163] : memref<2x4xf32, #tpu.memory_space<vmem>>, vector<2x4xf32>
    tpu.vector_store %arg14[%c0_162, %c0_163], %724 {strides = array<i32>} : memref<2x4xf32, #tpu.memory_space<vmem>>, vector<2x4xf32>,
    return
  }
}

</mosaic_0001>

<bundles_post_ra>
// kernel: tpu_custom_call.1
= control target key start
LH: loop header
LB: loop body
LE: loop exit
PB: predicated region body
PF: predicated region fallthrough
CT: control target
= control target key end

     0   :  { %19 = vsyncpa [#allocation4], 0  ;;  %s9566_s0 = inlined_call_operand.hbm [shape: f32[16,16], index: 0, kind: input, shape index: {}]   ;;  %s9567_s1 = inlined_call_operand.vmem [shape: f32[2,2,128], index: 1, kind: input, shape index: {}]   ;;  %s9568_s2 = inlined_call_operand.hbm [shape: f32[2,2,128], index: 2, kind: input, shape index: {}]   ;;  %s9569_s3 = inlined_call_operand.vmem [shape: f32[16,1024], index: 3, kind: input, shape index: {}]   ;;  %s9570_s4 = inlined_call_operand.hbm [shape: f32[128,512], index: 4, kind: input, shape index: {}]   ;;  %s9571_s5 = inlined_call_operand.hbm [shape: f32[128,512], index: 5, kind: input, shape index: {}]   ;;  %s9572_s6 = inlined_call_operand.vmem [shape: f32[1,1024], index: 6, kind: input, shape index: {}]   ;;  %s9573_s7 = inlined_call_operand.hbm [shape: f32[256,512], index: 7, kind: input, shape index: {}]   ;;  %s9574_s8 = inlined_call_operand.hbm [shape: f32[128,512], index: 8, kind: input, shape index: {}]   ;;  %s9575_s9 = inlined_call_operand.vmem [shape: f32[1,512], index: 9, kind: input, shape index: {}]   ;;  %s9576_s10 = inlined_call_operand.hbm [shape: f32[128,128], index: 10, kind: input, shape index: {}]   ;;  %s9577_s11 = inlined_call_operand.vmem [shape: f32[1,128], index: 11, kind: input, shape index: {}]   ;;  %s9578_s12 = inlined_call_operand.vmem [shape: f32[128,4], index: 12, kind: input, shape index: {}]   ;;  %s9579_s13 = inlined_call_operand.vmem [shape: f32[1,4], index: 13, kind: input, shape index: {}]   ;;  %s9580_s14 = inlined_call_operand.hbm [shape: f32[2,4], index: 14, kind: output, shape index: {}]  }
   0x1   :  { %20 = vsyncpa [#allocation7], 0 }
   0x2   :  { %21 = vsyncpa [#allocation10], 0 }
   0x3   :  { %22 = vsyncpa [#allocation13], 0 }
   0x4   :  { %23 = vsyncpa [#allocation5], 0  ;;  %s7936_s29 = smov [#allocation6]   ;;  %s7750_s17 = scalar_lea.hbm %s9568_s2, 64 }
   0x5   :  { %s43_s30 = sshll.u32 %s7936_s29, 4  ;;  %p7751_p0 = scmp.ne.s32.totalorder %s9568_s2, %s7750_s17  ;;  %s44_s30 = int_to_ptr.vmem [resolvable:$true] %s43_s30 }
   0x6   :  { %p7754_p1 = scmp.lt.u32.totalorder %s7750_s17, %s9568_s2 }
   0x8   :  { %p7756_p2 = pnand %p7754_p1, %p7751_p0 }
   0xa   :  { %7759 = shalt.err (!%p7756_p2)
}
   0xb   :  { %s7760_s22 = scalar_lea.vmem %s44_s30, 64  ;;  %p7765_p4 = scmp.lt.s32.totalorder %s44_s30, %s44_s30 }
   0xc   :  { %p7761_p3 = scmp.ne.s32.totalorder %s44_s30, %s7760_s22  ;;  %p7766_p5 = scmp.lt.s32.totalorder %s7760_s22, %s7760_s22 }
   0xe   :  { %p7767_p6 = por %p7766_p5, %p7765_p4 }
  0x10   :  { %p7768_p7 = pnand %p7767_p6, %p7761_p3 }
  0x12   :  { %7771 = shalt.err (!%p7768_p7)
}
  0x13   :  { %s7937_s23 = smov 32   ;;  %s7938_s24 = smov 2  }
  0x14   :  { %49 = dma.hbm_to_vmem [thread:$0]  %s9568_s2, 64, %s44_s30, [#allocation7], %s7937_s23, %s7937_s23, %s7938_s24  }
  0x15   :  { %s7939_s27 = smov [#allocation9]   ;;  %s7940_s29 = smov [#allocation12]  }
  0x16   :  { %s69_s28 = sshll.u32 %s7939_s27, 4  ;;  %s95_s15 = sshll.u32 %s7940_s29, 4  ;;  %s70_s28 = int_to_ptr.vmem [resolvable:$true] %s69_s28  ;;  %s8041_s15 = int_to_ptr.vmem [resolvable:$true] %s95_s15 }
  0x17   :  { %s7772_s18 = scalar_lea.hbm %s9571_s5, 8192 }
  0x18   :  { %p7773_p8 = scmp.ne.s32.totalorder %s9571_s5, %s7772_s18  ;;  %p7776_p9 = scmp.lt.u32.totalorder %s7772_s18, %s9571_s5 }
  0x1a   :  { %p7778_p10 = pnand %p7776_p9, %p7773_p8 }
  0x1c   :  { %7781 = shalt.err (!%p7778_p10)
}
  0x1d   :  { %s7782_s2 = scalar_lea.vmem %s70_s28, 8192  ;;  %p7787_p12 = scmp.lt.s32.totalorder %s70_s28, %s70_s28 }
  0x1e   :  { %p7783_p11 = scmp.ne.s32.totalorder %s70_s28, %s7782_s2  ;;  %p7788_p13 = scmp.lt.s32.totalorder %s7782_s2, %s7782_s2 }
  0x20   :  { %p7789_p0 = por %p7788_p13, %p7787_p12 }
  0x22   :  { %p7790_p1 = pnand %p7789_p0, %p7783_p11 }
  0x24   :  { %7793 = shalt.err (!%p7790_p1)
}
  0x25   :  { %s7941_s30 = smov 512   ;;  %s7794_s29 = scalar_lea.hbm %s9574_s8, 8192 }
  0x26   :  { %75 = dma.hbm_to_vmem [thread:$0]  %s9571_s5, 8192, %s70_s28, [#allocation10], %s7941_s30, %s7941_s30, %s7937_s23  }
  0x27   :  { %p7795_p2 = scmp.ne.s32.totalorder %s9574_s8, %s7794_s29  ;;  %p7798_p3 = scmp.lt.u32.totalorder %s7794_s29, %s9574_s8 }
  0x29   :  { %p7800_p4 = pnand %p7798_p3, %p7795_p2 }
  0x2b   :  { %7803 = shalt.err (!%p7800_p4)
}
  0x2c   :  { %s7804_s20 = scalar_lea.vmem %s8041_s15, 8192  ;;  %p7809_p6 = scmp.lt.s32.totalorder %s8041_s15, %s8041_s15 }
  0x2d   :  { %p7805_p5 = scmp.ne.s32.totalorder %s8041_s15, %s7804_s20  ;;  %p7810_p7 = scmp.lt.s32.totalorder %s7804_s20, %s7804_s20 }
  0x2f   :  { %p7811_p8 = por %p7810_p7, %p7809_p6 }
  0x31   :  { %p7812_p9 = pnand %p7811_p8, %p7805_p5 }
  0x33   :  { %7815 = shalt.err (!%p7812_p9)
}
  0x34   :  { %101 = dma.hbm_to_vmem [thread:$0]  %s9574_s8, 8192, %s8041_s15, [#allocation13], %s7941_s30, %s7941_s30, %s7937_s23  }
  0x35   :  { %s7942_s21 = smov [#allocation3]   ;;  %s7816_s25 = scalar_lea.hbm %s9566_s0, 256 }
  0x36   :  { %s29_s22 = sshll.u32 %s7942_s21, 4  ;;  %p7817_p10 = scmp.ne.s32.totalorder %s9566_s0, %s7816_s25  ;;  %s30_s22 = int_to_ptr.vmem [resolvable:$true] %s29_s22 }
  0x37   :  { %p7820_p11 = scmp.lt.u32.totalorder %s7816_s25, %s9566_s0 }
  0x39   :  { %p7822_p12 = pnand %p7820_p11, %p7817_p10 }
  0x3b   :  { %7825 = shalt.err (!%p7822_p12)
}
  0x3c   :  { %s7826_s17 = scalar_lea.vmem %s30_s22, 256  ;;  %p7831_p0 = scmp.lt.s32.totalorder %s30_s22, %s30_s22 }
  0x3d   :  { %p7827_p13 = scmp.ne.s32.totalorder %s30_s22, %s7826_s17  ;;  %p7832_p1 = scmp.lt.s32.totalorder %s7826_s17, %s7826_s17 }
  0x3f   :  { %p7833_p2 = por %p7832_p1, %p7831_p0 }
  0x41   :  { %p7834_p3 = pnand %p7833_p2, %p7827_p13 }
  0x43   :  { %7837 = shalt.err (!%p7834_p3)
}
  0x44   :  { %s7943_s8 = smov 128   ;;  %s7944_s15 = smov 8  }
  0x45   :  { %35 = dma.hbm_to_vmem [thread:$0]  %s9566_s0, 256, %s30_s22, [#allocation4], %s7943_s8, %s7943_s8, %s7944_s15  }
  0x46   :  { %s7945_s20 = smov [#allocation8]   ;;  %s7946_s28 = smov [#allocation11]  }
  0x47   :  { %s57_s5 = sshll.u32 %s7945_s20, 4  ;;  %s83_s21 = sshll.u32 %s7946_s28, 4  ;;  %s58_s5 = int_to_ptr.vmem [resolvable:$true] %s57_s5  ;;  %s84_s21 = int_to_ptr.vmem [resolvable:$true] %s83_s21 }
  0x48   :  { %s7838_s25 = scalar_lea.hbm %s9570_s4, 8192 }
  0x49   :  { %p7839_p4 = scmp.ne.s32.totalorder %s9570_s4, %s7838_s25  ;;  %p7842_p5 = scmp.lt.u32.totalorder %s7838_s25, %s9570_s4 }
  0x4b   :  { %p7844_p6 = pnand %p7842_p5, %p7839_p4 }
  0x4d   :  { %7847 = shalt.err (!%p7844_p6)
}
  0x4e   :  { %s7848_s0 = scalar_lea.vmem %s58_s5, 8192  ;;  %p7853_p8 = scmp.lt.s32.totalorder %s58_s5, %s58_s5 }
  0x4f   :  { %p7849_p7 = scmp.ne.s32.totalorder %s58_s5, %s7848_s0  ;;  %p7854_p9 = scmp.lt.s32.totalorder %s7848_s0, %s7848_s0 }
  0x51   :  { %p7855_p10 = por %p7854_p9, %p7853_p8 }
  0x53   :  { %p7856_p11 = pnand %p7855_p10, %p7849_p7 }
  0x55   :  { %7859 = shalt.err (!%p7856_p11)
}
  0x56   :  { %63 = dma.hbm_to_vmem [thread:$0]  %s9570_s4, 8192, %s58_s5, [#allocation7], %s7941_s30, %s7941_s30, %s7937_s23  }
  0x57   :  { %s7860_s20 = scalar_lea.hbm %s9573_s7, 16384 }
  0x58   :  { %p7861_p12 = scmp.ne.s32.totalorder %s9573_s7, %s7860_s20  ;;  %p7864_p13 = scmp.lt.u32.totalorder %s7860_s20, %s9573_s7 }
  0x5a   :  { %p7866_p0 = pnand %p7864_p13, %p7861_p12 }
  0x5c   :  { %7869 = shalt.err (!%p7866_p0)
}
  0x5d   :  { %s7870_s26 = scalar_lea.vmem %s84_s21, 16384  ;;  %p7875_p2 = scmp.lt.s32.totalorder %s84_s21, %s84_s21 }
  0x5e   :  { %p7871_p1 = scmp.ne.s32.totalorder %s84_s21, %s7870_s26  ;;  %p7876_p3 = scmp.lt.s32.totalorder %s7870_s26, %s7870_s26 }
  0x60   :  { %p7877_p4 = por %p7876_p3, %p7875_p2 }
  0x62   :  { %p7878_p5 = pnand %p7877_p4, %p7871_p1 }
  0x64   :  { %7881 = shalt.err (!%p7878_p5)
}
  0x65   :  { %89 = dma.hbm_to_vmem [thread:$0]  %s9573_s7, 16384, %s84_s21, [#allocation10], %s7941_s30, %s7941_s30, %s7937_s23  }
  0x66   :  { %s7947_s27 = smov [#allocation14]   ;;  %s7882_s22 = scalar_lea.hbm %s9576_s10, 2048 }
  0x67   :  { %s109_s29 = sshll.u32 %s7947_s27, 4  ;;  %p7883_p6 = scmp.ne.s32.totalorder %s9576_s10, %s7882_s22  ;;  %s110_s29 = int_to_ptr.vmem [resolvable:$true] %s109_s29 }
  0x68   :  { %p7886_p7 = scmp.lt.u32.totalorder %s7882_s22, %s9576_s10 }
  0x6a   :  { %p7888_p8 = pnand %p7886_p7, %p7883_p6 }
  0x6c   :  { %7891 = shalt.err (!%p7888_p8)
}
  0x6d   :  { %s7892_s28 = scalar_lea.vmem %s110_s29, 2048  ;;  %p7897_p10 = scmp.lt.s32.totalorder %s110_s29, %s110_s29 }
  0x6e   :  { %p7893_p9 = scmp.ne.s32.totalorder %s110_s29, %s7892_s28  ;;  %p7898_p11 = scmp.lt.s32.totalorder %s7892_s28, %s7892_s28 }
  0x70   :  { %p7899_p12 = por %p7898_p11, %p7897_p10 }
  0x72   :  { %p7900_p13 = pnand %p7899_p12, %p7893_p9 }
  0x74   :  { %7903 = shalt.err (!%p7900_p13)
}
  0x75   :  { %115 = dma.hbm_to_vmem [thread:$0]  %s9576_s10, 2048, %s110_s29, [#allocation13], %s7943_s8, %s7943_s8, %s7944_s15  }
  0x76   :  { %7926 = dma.done.wait [#allocation4], 256  }
  0x77   :  { %7927 = vsyncadd [#allocation4], 4294967040 }
  0x78   :  { %7928 = dma.done.wait [#allocation7], 8256  }
  0x79   :  { %7929 = vsyncadd [#allocation7], 4294959040 }
  0x7a   :  { %7930 = dma.done.wait [#allocation10], 24576  }
  0x7b   :  { %7931 = vsyncadd [#allocation10], 4294942720 }
  0x7c   :  { %7932 = dma.done.wait [#allocation13], 10240  }
  0x7d   :  { %7933 = vsyncadd [#allocation13], 4294957056  ;;  %v9581_v0 = vmov 0.0   ;;  %v146_v1 = vld [vmem:[%s9569_s3 + $0x8] sm:$0xff]  ;;  %v148_v3 = vld [vmem:[%s9569_s3 + $0x18] sm:$0xff]  ;;  %vm203_vm0 = vcmask 130048  }
  0x7e   :  { %274 = vmatprep.mubr.f32.mxu0 %v9581_v0  ;;  %351 = vmatprep.mubr.f32.mxu1 %v9581_v0  ;;  %v154_v2 = vld [vmem:[%s9569_s3 + $0x48] sm:$0xff]  ;;  %v156_v5 = vld [vmem:[%s9569_s3 + $0x58] sm:$0xff]  ;;  %v145_v6 = vld [vmem:[%s9569_s3] sm:$0xff]  ;;  %vm7950_vm1 = vmmov 0   ;;  %s7951_s23 = smov [#allocation15]   ;;  %vm5415_vm2 = vcmask 25600  }
  0x7f   :  { %v5622_v4 = vpack.c.bf16 %v154_v2, %v146_v1  ;;  %v153_v7 = vld [vmem:[%s9569_s3 + $0x40] sm:$0xff]  ;;  %v5626_v8 = vpack.c.bf16 %v156_v5, %v148_v3  ;;  %v147_v10 = vld [vmem:[%s9569_s3 + $0x10] sm:$0xff]  ;;  %v150_v14 = vld [vmem:[%s9569_s3 + $0x28] sm:$0xff]  ;;  %s5423_s30 = sshll.u32 %s7951_s23, 4  ;;  %s5424_s30 = int_to_ptr.vmem [resolvable:$true] %s5423_s30 }
  0x80   :  { %v5624_v9 = vpack.c.bf16 %v153_v7, %v145_v6  ;;  %v155_v11 = vld [vmem:[%s9569_s3 + $0x50] sm:$0xff]  ;;  %v143_v12 = vld [vmem:[#allocation3] sm:$0xff]  ;;  %v158_v15 = vld [vmem:[%s9569_s3 + $0x68] sm:$0xff]  ;;  %p7909_p1 = scmp.lt.s32.totalorder %s5424_s30, %s5424_s30 }
  0x81   :  { %5623 = vmatprep.subr.bf16.mxu0 %v5622_v4  ;;  %v5628_v13 = vpack.c.bf16 %v155_v11, %v147_v10  ;;  %v149_v16 = vld [vmem:[%s9569_s3 + $0x20] sm:$0xff]  ;;  %5627 = vmatprep.subr.bf16.mxu1 %v5626_v8  ;;  %v5630_v17 = vpack.c.bf16 %v158_v15, %v150_v14  ;;  %v152_v19 = vld [vmem:[%s9569_s3 + $0x38] sm:$0xff]  ;;  %v151_v23 = vld [vmem:[%s9569_s3 + $0x30] sm:$0xff] }
  0x82   :  { %5625 = vmatpush1.bf16.msra.mxu0 %v5624_v9  ;;  %v157_v18 = vld [vmem:[%s9569_s3 + $0x60] sm:$0xff]  ;;  %v160_v20 = vld [vmem:[%s9569_s3 + $0x78] sm:$0xff]  ;;  %v159_v24 = vld [vmem:[%s9569_s3 + $0x70] sm:$0xff] }
  0x83   :  { %5629 = vmatpush1.bf16.msra.mxu1 %v5628_v13  ;;  %v5632_v21 = vpack.c.bf16 %v157_v18, %v149_v16  ;;  %v5634_v22 = vpack.c.bf16 %v160_v20, %v152_v19  ;;  %5631 = vmatprep.subr.bf16.mxu0 %v5630_v17  ;;  %v5636_v25 = vpack.c.bf16 %v159_v24, %v151_v23  ;;  %v519_v26 = vld [vmem:[#allocation8 + $0x8] sm:$0xff]  ;;  %v521_v28 = vld [vmem:[#allocation8 + $0x18] sm:$0xff]  ;;  %v518_v33 = vld [vmem:[#allocation8] sm:$0xff] }
  0x84   :  { %v523_v27 = vld [vmem:[#allocation8 + $0x28] sm:$0xff]  ;;  %v525_v30 = vld [vmem:[#allocation8 + $0x38] sm:$0xff]  ;;  %v522_v34 = vld [vmem:[#allocation8 + $0x20] sm:$0xff] }
  0x85   :  { %5435 = vmatmul.mubr.msk.f32.vlgmr.msra.gmra.mrb[0].mxu0 %vm203_vm0, %v143_v12  ;;  %5635 = vmatprep.subr.bf16.mxu1 %v5634_v22  ;;  %v8189_v29 = vpack.c.bf16 %v523_v27, %v519_v26  ;;  %v144_v31 = vld [vmem:[#allocation3 + $0x8] sm:$0xff]  ;;  %v8192_v32 = vpack.c.bf16 %v525_v30, %v521_v28  ;;  %v527_v37 = vld [vmem:[#allocation8 + $0x48] sm:$0xff]  ;;  %v8201_v41 = vpack.c.bf16 %v522_v34, %v518_v33  ;;  %v526_v44 = vld [vmem:[#allocation8 + $0x40] sm:$0xff] }
  0x86   :  { %5437 = vmatmul.mubr.msk.f32.vlgmr.msra.gmra.mrb[0].mxu1 %vm203_vm0, %v143_v12  ;;  %5633 = vmatpush1.bf16.msra.mxu0 %v5632_v21  ;;  %v520_v35 = vld [vmem:[#allocation8 + $0x10] sm:$0xff]  ;;  %v531_v38 = vld [vmem:[#allocation8 + $0x68] sm:$0xff]  ;;  %v529_v39 = vld [vmem:[#allocation8 + $0x58] sm:$0xff] }
  0x87   :  { %280 = vmatprep.mubr.f32.mxu0 %v9581_v0  ;;  %357 = vmatprep.mubr.f32.mxu1 %v9581_v0  ;;  %v524_v36 = vld [vmem:[#allocation8 + $0x30] sm:$0xff]  ;;  %v533_v40 = vld [vmem:[#allocation8 + $0x78] sm:$0xff]  ;;  %v8206_v43 = vpack.c.bf16 %v531_v38, %v527_v37  ;;  %v530_v45 = vld [vmem:[#allocation8 + $0x60] sm:$0xff] }
  0x88   :  { %5637 = vmatpush1.bf16.msra.mxu1 %v5636_v25  ;;  %5639 = vmatprep.subr.bf16.mxu0 %v8189_v29  ;;  %v8204_v42 = vpack.c.bf16 %v524_v36, %v520_v35  ;;  %v528_v46 = vld [vmem:[#allocation8 + $0x50] sm:$0xff]  ;;  %v8208_v47 = vpack.c.bf16 %v533_v40, %v529_v39  ;;  %v535_v49 = vld [vmem:[#allocation8 + $0x88] sm:$0xff]  ;;  %v537_v51 = vld [vmem:[#allocation8 + $0x98] sm:$0xff]  ;;  %v8213_v53 = vpack.c.bf16 %v530_v45, %v526_v44 }
  0x89   :  { %5436 = vmatmul.mubr.msk.f32.gmra.mrb[2].mxu0 %vm203_vm0, %v144_v31  ;;  %5671 = vmatprep.subr.bf16.mxu1 %v8192_v32  ;;  %v532_v48 = vld [vmem:[#allocation8 + $0x70] sm:$0xff]  ;;  %v539_v50 = vld [vmem:[#allocation8 + $0xa8] sm:$0xff]  ;;  %v541_v52 = vld [vmem:[#allocation8 + $0xb8] sm:$0xff] }
  0x8a   :  { %5438 = vmatmul.mubr.msk.f32.gmra.mrb[2].mxu1 %vm203_vm0, %v144_v31  ;;  %428 = vmatprep.mubr.f32.mxu0 %v9581_v0  ;;  %9679 = vst [vmem:[#allocation21_spill] sm:$0xff] %v8213_v53  ;;  %v8217_v54 = vpack.c.bf16 %v532_v48, %v528_v46  ;;  %v8219_v55 = vpack.c.bf16 %v539_v50, %v535_v49  ;;  %v534_v56 = vld [vmem:[#allocation8 + $0x80] sm:$0xff]  ;;  %v536_v58 = vld [vmem:[#allocation8 + $0x90] sm:$0xff]  ;;  %v543_v61 = vld [vmem:[#allocation8 + $0xc8] sm:$0xff] }
  0x8b   :  { %505 = vmatprep.mubr.f32.mxu1 %v9581_v0  ;;  %v538_v57 = vld [vmem:[#allocation8 + $0xa0] sm:$0xff]  ;;  %v8222_v59 = vpack.c.bf16 %v541_v52, %v537_v51  ;;  %v540_v60 = vld [vmem:[#allocation8 + $0xb0] sm:$0xff]  ;;  %v547_v62 = vld [vmem:[#allocation8 + $0xe8] sm:$0xff] }
  0x8c   :  { %9680 = vst [vmem:[#allocation22_spill] sm:$0xff] %v8217_v54  ;;  %9681 = vst [vmem:[#allocation23_spill] sm:$0xff] %v8219_v55  ;;  %v545_v63 = vld [vmem:[#allocation8 + $0xd8] sm:$0xff]  ;;  %v8228_v2 = vpack.c.bf16 %v538_v57, %v534_v56  ;;  %v8233_v3 = vpack.c.bf16 %v540_v60, %v536_v58  ;;  %v8235_v4 = vpack.c.bf16 %v547_v62, %v543_v61  ;;  %v542_v5 = vld [vmem:[#allocation8 + $0xc0] sm:$0xff] }
  0x8d   :  { %5439 = vmatmul.mubr.msk.f32.vlgmr.msra.gmra.mrb[4].mxu0 %vm203_vm0, %v143_v12  ;;  %9682 = vst [vmem:[#allocation24_spill] sm:$0xff] %v8222_v59  ;;  %v549_v1 = vld [vmem:[#allocation8 + $0xf8] sm:$0xff]  ;;  %v546_v6 = vld [vmem:[#allocation8 + $0xe0] sm:$0xff]  ;;  %v544_v7 = vld [vmem:[#allocation8 + $0xd0] sm:$0xff] }
  0x8e   :  { %5441 = vmatmul.mubr.msk.f32.vlgmr.msra.gmra.mrb[4].mxu1 %vm203_vm0, %v143_v12  ;;  %5641 = vmatpush1.bf16.msra.mxu0 %v8201_v41  ;;  %9683 = vst [vmem:[#allocation25_spill] sm:$0xff] %v8228_v2  ;;  %9684 = vst [vmem:[#allocation26_spill] sm:$0xff] %v8233_v3  ;;  %v8238_v8 = vpack.c.bf16 %v549_v1, %v545_v63  ;;  %v548_v9 = vld [vmem:[#allocation8 + $0xf0] sm:$0xff]  ;;  %v551_v10 = vld [vmem:[#allocation8 + $0x108] sm:$0xff]  ;;  %v8243_v14 = vpack.c.bf16 %v546_v6, %v542_v5 }
  0x8f   :  { %5673 = vmatpush1.bf16.msra.mxu1 %v8204_v42  ;;  %5643 = vmatprep.subr.bf16.mxu0 %v8206_v43  ;;  %9685 = vst [vmem:[#allocation27_spill] sm:$0xff] %v8235_v4  ;;  %v555_v11 = vld [vmem:[#allocation8 + $0x128] sm:$0xff]  ;;  %v553_v12 = vld [vmem:[#allocation8 + $0x118] sm:$0xff]  ;;  %v8247_v15 = vpack.c.bf16 %v548_v9, %v544_v7  ;;  %v550_v17 = vld [vmem:[#allocation8 + $0x100] sm:$0xff] }
  0x90   :  { %5675 = vmatprep.subr.bf16.mxu1 %v8208_v47  ;;  %434 = vmatprep.mubr.f32.mxu0 %v9581_v0  ;;  %9686 = vst [vmem:[#allocation28_spill] sm:$0xff] %v8238_v8  ;;  %v557_v13 = vld [vmem:[#allocation8 + $0x138] sm:$0xff]  ;;  %9687 = vst [vmem:[#allocation29_spill] sm:$0xff] %v8243_v14  ;;  %v8249_v16 = vpack.c.bf16 %v555_v11, %v551_v10  ;;  %v554_v18 = vld [vmem:[#allocation8 + $0x120] sm:$0xff] }
  0x91   :  { %511 = vmatprep.mubr.f32.mxu1 %v9581_v0  ;;  %5440 = vmatmul.mubr.msk.f32.gmra.mrb[6].mxu0 %vm203_vm0, %v144_v31  ;;  %9688 = vst [vmem:[#allocation30_spill] sm:$0xff] %v8247_v15  ;;  %v552_v19 = vld [vmem:[#allocation8 + $0x110] sm:$0xff]  ;;  %v8252_v20 = vpack.c.bf16 %v557_v13, %v553_v12  ;;  %v559_v22 = vld [vmem:[#allocation8 + $0x148] sm:$0xff]  ;;  %v561_v24 = vld [vmem:[#allocation8 + $0x158] sm:$0xff]  ;;  %v8255_v26 = vpack.c.bf16 %v554_v18, %v550_v17 }
  0x92   :  { %5645 = vmatpush1.bf16.msra.mxu0 %v8213_v53  ;;  %5442 = vmatmul.mubr.msk.f32.gmra.mrb[6].mxu1 %vm203_vm0, %v144_v31  ;;  %9689 = vst [vmem:[#allocation31_spill] sm:$0xff] %v8249_v16  ;;  %v556_v21 = vld [vmem:[#allocation8 + $0x130] sm:$0xff]  ;;  %v563_v23 = vld [vmem:[#allocation8 + $0x168] sm:$0xff]  ;;  %v565_v25 = vld [vmem:[#allocation8 + $0x178] sm:$0xff] }
  0x93   :  { %5677 = vmatpush1.bf16.msra.mxu1 %v8217_v54  ;;  %5647 = vmatprep.subr.bf16.mxu0 %v8219_v55  ;;  %9690 = vst [vmem:[#allocation32_spill] sm:$0xff] %v8252_v20  ;;  %9691 = vst [vmem:[#allocation33_spill] sm:$0xff] %v8255_v26  ;;  %v8259_v27 = vpack.c.bf16 %v556_v21, %v552_v19  ;;  %v8261_v28 = vpack.c.bf16 %v563_v23, %v559_v22  ;;  %v558_v30 = vld [vmem:[#allocation8 + $0x140] sm:$0xff]  ;;  %v560_v33 = vld [vmem:[#allocation8 + $0x150] sm:$0xff] }
  0x94   :  { %5679 = vmatprep.subr.bf16.mxu1 %v8222_v59  ;;  %716 = vmatprep.mubr.f32.mxu0 %v9581_v0  ;;  %v562_v31 = vld [vmem:[#allocation8 + $0x160] sm:$0xff]  ;;  %v8264_v34 = vpack.c.bf16 %v565_v25, %v561_v24  ;;  %v564_v35 = vld [vmem:[#allocation8 + $0x170] sm:$0xff]  ;;  %v567_v36 = vld [vmem:[#allocation8 + $0x188] sm:$0xff] }
  0x95   :  { %787 = vmatprep.mubr.f32.mxu1 %v9581_v0  ;;  %9692 = vst [vmem:[#allocation34_spill] sm:$0xff] %v8259_v27  ;;  %9693 = vst [vmem:[#allocation35_spill] sm:$0xff] %v8261_v28  ;;  %v571_v37 = vld [vmem:[#allocation8 + $0x1a8] sm:$0xff]  ;;  %v569_v38 = vld [vmem:[#allocation8 + $0x198] sm:$0xff]  ;;  %v8267_v40 = vpack.c.bf16 %v562_v31, %v558_v30  ;;  %v8271_v44 = vpack.c.bf16 %v564_v35, %v560_v33 }
  0x96   :  { %5649 = vmatpush1.bf16.msra.mxu0 %v8228_v2  ;;  %9694 = vst [vmem:[#allocation36_spill] sm:$0xff] %v8264_v34  ;;  %v573_v39 = vld [vmem:[#allocation8 + $0x1b8] sm:$0xff]  ;;  %v8273_v45 = vpack.c.bf16 %v571_v37, %v567_v36  ;;  %v566_v46 = vld [vmem:[#allocation8 + $0x180] sm:$0xff]  ;;  %v568_v49 = vld [vmem:[#allocation8 + $0x190] sm:$0xff] }
  0x97   :  { %5681 = vmatpush1.bf16.msra.mxu1 %v8233_v3  ;;  %5651 = vmatprep.subr.bf16.mxu0 %v8235_v4  ;;  %9695 = vst [vmem:[#allocation37_spill] sm:$0xff] %v8267_v40  ;;  %9696 = vst [vmem:[#allocation38_spill] sm:$0xff] %v8271_v44  ;;  %v570_v48 = vld [vmem:[#allocation8 + $0x1a0] sm:$0xff]  ;;  %v8276_v50 = vpack.c.bf16 %v573_v39, %v569_v38  ;;  %v572_v51 = vld [vmem:[#allocation8 + $0x1b0] sm:$0xff] }
  0x98   :  { %5683 = vmatprep.subr.bf16.mxu1 %v8238_v8  ;;  %9697 = vst [vmem:[#allocation39_spill] sm:$0xff] %v8273_v45  ;;  %v575_v52 = vld [vmem:[#allocation8 + $0x1c8] sm:$0xff]  ;;  %v577_v57 = vld [vmem:[#allocation8 + $0x1d8] sm:$0xff]  ;;  %v8279_v60 = vpack.c.bf16 %v570_v48, %v566_v46  ;;  %v8283_v61 = vpack.c.bf16 %v572_v51, %v568_v49  ;;  %v574_v63 = vld [vmem:[#allocation8 + $0x1c0] sm:$0xff] }
  0x99   :  { %9698 = vst [vmem:[#allocation40_spill] sm:$0xff] %v8276_v50  ;;  %v579_v56 = vld [vmem:[#allocation8 + $0x1e8] sm:$0xff]  ;;  %v581_v58 = vld [vmem:[#allocation8 + $0x1f8] sm:$0xff]  ;;  %v578_v1 = vld [vmem:[#allocation8 + $0x1e0] sm:$0xff] }
  0x9a   :  { %5653 = vmatpush1.bf16.msra.mxu0 %v8243_v14  ;;  %9699 = vst [vmem:[#allocation41_spill] sm:$0xff] %v8279_v60  ;;  %9700 = vst [vmem:[#allocation42_spill] sm:$0xff] %v8283_v61  ;;  %v8285_v62 = vpack.c.bf16 %v579_v56, %v575_v52  ;;  %v576_v5 = vld [vmem:[#allocation8 + $0x1d0] sm:$0xff]  ;;  %v8288_v6 = vpack.c.bf16 %v581_v58, %v577_v57  ;;  %v583_v9 = vld [vmem:[#allocation9 + $0x8] sm:$0xff]  ;;  %v8291_v13 = vpack.c.bf16 %v578_v1, %v574_v63 }
  0x9b   :  { %5685 = vmatpush1.bf16.msra.mxu1 %v8247_v15  ;;  %5655 = vmatprep.subr.bf16.mxu0 %v8249_v16  ;;  %v580_v7 = vld [vmem:[#allocation8 + $0x1f0] sm:$0xff]  ;;  %v587_v10 = vld [vmem:[#allocation9 + $0x28] sm:$0xff]  ;;  %v585_v11 = vld [vmem:[#allocation9 + $0x18] sm:$0xff] }
  0x9c   :  { %5687 = vmatprep.subr.bf16.mxu1 %v8252_v20  ;;  %9701 = vst [vmem:[#allocation43_spill] sm:$0xff] %v8285_v62  ;;  %9702 = vst [vmem:[#allocation44_spill] sm:$0xff] %v8288_v6  ;;  %v589_v12 = vld [vmem:[#allocation9 + $0x38] sm:$0xff]  ;;  %v8295_v17 = vpack.c.bf16 %v580_v7, %v576_v5  ;;  %v8297_v18 = vpack.c.bf16 %v587_v10, %v583_v9  ;;  %v582_v19 = vld [vmem:[#allocation9] sm:$0xff] }
  0x9d   :  { %9703 = vst [vmem:[#allocation45_spill] sm:$0xff] %v8291_v13  ;;  %v586_v21 = vld [vmem:[#allocation9 + $0x20] sm:$0xff]  ;;  %v584_v22 = vld [vmem:[#allocation9 + $0x10] sm:$0xff]  ;;  %v8300_v23 = vpack.c.bf16 %v589_v12, %v585_v11  ;;  %v591_v25 = vld [vmem:[#allocation9 + $0x48] sm:$0xff] }
  0x9e   :  { %5657 = vmatpush1.bf16.msra.mxu0 %v8255_v26  ;;  %9704 = vst [vmem:[#allocation46_spill] sm:$0xff] %v8295_v17  ;;  %9705 = vst [vmem:[#allocation47_spill] sm:$0xff] %v8297_v18  ;;  %v588_v24 = vld [vmem:[#allocation9 + $0x30] sm:$0xff]  ;;  %v595_v30 = vld [vmem:[#allocation9 + $0x68] sm:$0xff]  ;;  %v8306_v36 = vpack.c.bf16 %v586_v21, %v582_v19 }
  0x9f   :  { %5689 = vmatpush1.bf16.msra.mxu1 %v8259_v27  ;;  %5659 = vmatprep.subr.bf16.mxu0 %v8261_v28  ;;  %9706 = vst [vmem:[#allocation48_spill] sm:$0xff] %v8300_v23  ;;  %v593_v31 = vld [vmem:[#allocation9 + $0x58] sm:$0xff]  ;;  %v646_v35 = vld [vmem:[%s9567_s1] sm:$0x3]  ;;  %v8310_v37 = vpack.c.bf16 %v588_v24, %v584_v22  ;;  %v8312_v38 = vpack.c.bf16 %v595_v30, %v591_v25  ;;  %v590_v39 = vld [vmem:[#allocation9 + $0x40] sm:$0xff] }
  0xa0   :  { %5691 = vmatprep.subr.bf16.mxu1 %v8264_v34  ;;  %v597_v33 = vld [vmem:[#allocation9 + $0x78] sm:$0xff]  ;;  %v594_v46 = vld [vmem:[#allocation9 + $0x60] sm:$0xff]  ;;  %v592_v48 = vld [vmem:[#allocation9 + $0x50] sm:$0xff] }
  0xa1   :  { %v8315_v49 = vpack.c.bf16 %v597_v33, %v593_v31  ;;  %v596_v51 = vld [vmem:[#allocation9 + $0x70] sm:$0xff]  ;;  %v599_v52 = vld [vmem:[#allocation9 + $0x88] sm:$0xff]  ;;  %v601_v57 = vld [vmem:[#allocation9 + $0x98] sm:$0xff]  ;;  %v8318_v63 = vpack.c.bf16 %v594_v46, %v590_v39 }
  0xa2   :  { %5661 = vmatpush1.bf16.msra.mxu0 %v8267_v40  ;;  %v603_v56 = vld [vmem:[#allocation9 + $0xa8] sm:$0xff]  ;;  %v605_v58 = vld [vmem:[#allocation9 + $0xb8] sm:$0xff]  ;;  %v8322_v1 = vpack.c.bf16 %v596_v51, %v592_v48  ;;  %v598_v7 = vld [vmem:[#allocation9 + $0x80] sm:$0xff] }
  0xa3   :  { %5693 = vmatpush1.bf16.msra.mxu1 %v8271_v44  ;;  %5663 = vmatprep.subr.bf16.mxu0 %v8273_v45  ;;  %v8324_v5 = vpack.c.bf16 %v603_v56, %v599_v52  ;;  %v602_v9 = vld [vmem:[#allocation9 + $0xa0] sm:$0xff]  ;;  %v600_v10 = vld [vmem:[#allocation9 + $0x90] sm:$0xff]  ;;  %v8327_v11 = vpack.c.bf16 %v605_v58, %v601_v57  ;;  %v607_v19 = vld [vmem:[#allocation9 + $0xc8] sm:$0xff] }
  0xa4   :  { %5695 = vmatprep.subr.bf16.mxu1 %v8276_v50  ;;  %v604_v12 = vld [vmem:[#allocation9 + $0xb0] sm:$0xff]  ;;  %v611_v21 = vld [vmem:[#allocation9 + $0xe8] sm:$0xff]  ;;  %v609_v22 = vld [vmem:[#allocation9 + $0xd8] sm:$0xff]  ;;  %v8332_v25 = vpack.c.bf16 %v602_v9, %v598_v7 }
  0xa5   :  { %v613_v24 = vld [vmem:[#allocation9 + $0xf8] sm:$0xff]  ;;  %v8336_v30 = vpack.c.bf16 %v604_v12, %v600_v10  ;;  %v8338_v31 = vpack.c.bf16 %v611_v21, %v607_v19  ;;  %v606_v33 = vld [vmem:[#allocation9 + $0xc0] sm:$0xff]  ;;  %v608_v39 = vld [vmem:[#allocation9 + $0xd0] sm:$0xff] }
  0xa6   :  { %5665 = vmatpush1.bf16.msra.mxu0 %v8279_v60  ;;  %v8341_v46 = vpack.c.bf16 %v613_v24, %v609_v22  ;;  %v612_v48 = vld [vmem:[#allocation9 + $0xf0] sm:$0xff]  ;;  %v615_v51 = vld [vmem:[#allocation9 + $0x108] sm:$0xff]  ;;  %v617_v56 = vld [vmem:[#allocation9 + $0x118] sm:$0xff] }
  0xa7   :  { %5697 = vmatpush1.bf16.msra.mxu1 %v8283_v61  ;;  %5667 = vmatprep.subr.bf16.mxu0 %v8285_v62  ;;  %9707 = vst [vmem:[#allocation49_spill] sm:$0xff] %v8336_v30  ;;  %9708 = vst [vmem:[#allocation50_spill] sm:$0xff] %v8338_v31  ;;  %v619_v52 = vld [vmem:[#allocation9 + $0x128] sm:$0xff]  ;;  %v621_v57 = vld [vmem:[#allocation9 + $0x138] sm:$0xff]  ;;  %v8348_v7 = vpack.c.bf16 %v612_v48, %v608_v39 }
  0xa8   :  { %5699 = vmatprep.subr.bf16.mxu1 %v8288_v6  ;;  %9709 = vst [vmem:[#allocation51_spill] sm:$0xff] %v8341_v46  ;;  %v8350_v9 = vpack.c.bf16 %v619_v52, %v615_v51  ;;  %v614_v10 = vld [vmem:[#allocation9 + $0x100] sm:$0xff]  ;;  %v616_v19 = vld [vmem:[#allocation9 + $0x110] sm:$0xff]  ;;  %v8353_v21 = vpack.c.bf16 %v621_v57, %v617_v56  ;;  %v623_v24 = vld [vmem:[#allocation9 + $0x148] sm:$0xff] }
  0xa9   :  { %9711 = vst [vmem:[#allocation53_spill] sm:$0xff] %v8348_v7  ;;  %v618_v12 = vld [vmem:[#allocation9 + $0x120] sm:$0xff]  ;;  %v620_v22 = vld [vmem:[#allocation9 + $0x130] sm:$0xff] }
  0xaa   :  { %5669 = vmatpush1.bf16.msra.mxu0 %v8291_v13  ;;  %9712 = vst [vmem:[#allocation54_spill] sm:$0xff] %v8350_v9  ;;  %9713 = vst [vmem:[#allocation55_spill] sm:$0xff] %v8353_v21  ;;  %v8360_v39 = vpack.c.bf16 %v620_v22, %v616_v19  ;;  %v622_v51 = vld [vmem:[#allocation9 + $0x140] sm:$0xff]  ;;  %v624_v56 = vld [vmem:[#allocation9 + $0x150] sm:$0xff] }
  0xab   :  { %5701 = vmatpush1.bf16.msra.mxu1 %v8295_v17  ;;  %5703 = vmatprep.subr.bf16.mxu0 %v8297_v18  ;;  %v626_v52 = vld [vmem:[#allocation9 + $0x160] sm:$0xff] }
  0xac   :  { %5735 = vmatprep.subr.bf16.mxu1 %v8300_v23  ;;  %9715 = vst [vmem:[#allocation57_spill] sm:$0xff] %v8360_v39  ;;  %v630_v22 = vld [vmem:[#allocation9 + $0x180] sm:$0xff] }
  0xad   :  { %717 = vmatmul.mubr.f32.vlgmr.msra.gmra.mrb[8].mxu0 %v646_v35 }
  0xae   :  { %788 = vmatmul.mubr.f32.vlgmr.msra.gmra.mrb[8].mxu1 %v646_v35  ;;  %5705 = vmatpush1.bf16.msra.mxu0 %v8306_v36  ;;  %v610_v35 = vld [vmem:[#allocation9 + $0xe0] sm:$0xff] }
  0xaf   :  { %5737 = vmatpush1.bf16.msra.mxu1 %v8310_v37  ;;  %5707 = vmatprep.subr.bf16.mxu0 %v8312_v38  ;;  %v8344_v58 = vpack.c.bf16 %v610_v35, %v606_v33  ;;  %v625_v33 = vld [vmem:[#allocation9 + $0x158] sm:$0xff] }
  0xb0   :  { %5739 = vmatprep.subr.bf16.mxu1 %v8315_v49  ;;  %870 = vmatprep.mubr.f32.mxu0 %v9581_v0  ;;  %v629_v35 = vld [vmem:[#allocation9 + $0x178] sm:$0xff] }
  0xb1   :  { %941 = vmatprep.mubr.f32.mxu1 %v9581_v0  ;;  %9710 = vst [vmem:[#allocation52_spill] sm:$0xff] %v8344_v58  ;;  %v627_v0 = vld [vmem:[#allocation9 + $0x168] sm:$0xff]  ;;  %v8365_v57 = vpack.c.bf16 %v629_v35, %v625_v33  ;;  %v632_v33 = vld [vmem:[#allocation9 + $0x190] sm:$0xff] }
  0xb2   :  { %5709 = vmatpush1.bf16.msra.mxu0 %v8318_v63  ;;  %v8362_v48 = vpack.c.bf16 %v627_v0, %v623_v24  ;;  %v634_v24 = vld [vmem:[#allocation9 + $0x1a0] sm:$0xff] }
  0xb3   :  { %5741 = vmatpush1.bf16.msra.mxu1 %v8322_v1  ;;  %5711 = vmatprep.subr.bf16.mxu0 %v8324_v5  ;;  %9716 = vst [vmem:[#allocation58_spill] sm:$0xff] %v8365_v57 }
  0xb4   :  { %5743 = vmatprep.subr.bf16.mxu1 %v8327_v11 }
  0xb6   :  { %5713 = vmatpush1.bf16.msra.mxu0 %v8332_v25 }
  0xb7   :  { %5745 = vmatpush1.bf16.msra.mxu1 %v8336_v30  ;;  %5715 = vmatprep.subr.bf16.mxu0 %v8338_v31  ;;  %v8356_v30 = vpack.c.bf16 %v618_v12, %v614_v10  ;;  %v631_v31 = vld [vmem:[#allocation9 + $0x188] sm:$0xff]  ;;  %v633_v10 = vld [vmem:[#allocation9 + $0x198] sm:$0xff] }
  0xb8   :  { %5747 = vmatprep.subr.bf16.mxu1 %v8341_v46  ;;  %v628_v46 = vld [vmem:[#allocation9 + $0x170] sm:$0xff]  ;;  %v637_v12 = vld [vmem:[#allocation9 + $0x1b8] sm:$0xff] }
  0xb9   :  { %9714 = vst [vmem:[#allocation56_spill] sm:$0xff] %v8356_v30  ;;  %v8372_v0 = vpack.c.bf16 %v628_v46, %v624_v56  ;;  %v8377_v35 = vpack.c.bf16 %v637_v12, %v633_v10  ;;  %v642_v56 = vld [vmem:[#allocation9 + $0x1e0] sm:$0xff]  ;;  %v640_v12 = vld [vmem:[#allocation9 + $0x1d0] sm:$0xff] }
  0xba   :  { %5717 = vmatpush1.bf16.msra.mxu0 %v8344_v58  ;;  %v635_v58 = vld [vmem:[#allocation9 + $0x1a8] sm:$0xff] }
  0xbb   :  { %5749 = vmatpush1.bf16.msra.mxu1 %v8348_v7  ;;  %5719 = vmatprep.subr.bf16.mxu0 %v8350_v9  ;;  %v8368_v7 = vpack.c.bf16 %v626_v52, %v622_v51  ;;  %v8374_v19 = vpack.c.bf16 %v635_v58, %v631_v31  ;;  %v639_v9 = vld [vmem:[#allocation9 + $0x1c8] sm:$0xff]  ;;  %v641_v51 = vld [vmem:[#allocation9 + $0x1d8] sm:$0xff]  ;;  %v638_v58 = vld [vmem:[#allocation9 + $0x1c0] sm:$0xff] }
  0xbc   :  { %5751 = vmatprep.subr.bf16.mxu1 %v8353_v21  ;;  %v636_v21 = vld [vmem:[#allocation9 + $0x1b0] sm:$0xff]  ;;  %v645_v52 = vld [vmem:[#allocation9 + $0x1f8] sm:$0xff] }
  0xbd   :  { %v8384_v31 = vpack.c.bf16 %v636_v21, %v632_v33  ;;  %v8389_v10 = vpack.c.bf16 %v645_v52, %v641_v51  ;;  %v161_v51 = vld [vmem:[%s9572_s6] sm:$0xff] }
  0xbe   :  { %5721 = vmatpush1.bf16.msra.mxu0 %v8356_v30  ;;  %v643_v30 = vld [vmem:[#allocation9 + $0x1e8] sm:$0xff] }
  0xbf   :  { %5753 = vmatpush1.bf16.msra.mxu1 %v8360_v39  ;;  %5723 = vmatprep.subr.bf16.mxu0 %v8362_v48  ;;  %v8380_v39 = vpack.c.bf16 %v634_v24, %v630_v22  ;;  %v8386_v46 = vpack.c.bf16 %v643_v30, %v639_v9  ;;  %v8392_v22 = vpack.c.bf16 %v642_v56, %v638_v58  ;;  %v5443_v30 = vld [vmem:[%s9567_s1 + $0x2] sm:$0x3]  ;;  %v9717_v9 = vmov 0.0  }
  0xc0   :  { %5755 = vmatprep.subr.bf16.mxu1 %v8365_v57  ;;  %v644_v57 = vld [vmem:[#allocation9 + $0x1f0] sm:$0xff] }
  0xc1   :  { %v8396_v21 = vpack.c.bf16 %v644_v57, %v640_v12  ;;  %v163_v57 = vlaneseq }
  0xc2   :  { %5725 = vmatpush1.bf16.msra.mxu0 %v8368_v7 }
  0xc3   :  { %5757 = vmatpush1.bf16.msra.mxu1 %v8372_v0  ;;  %5727 = vmatprep.subr.bf16.mxu0 %v8374_v19  ;;  %v8440_v24 = vshrl.u32 %v163_v57, 7 }
  0xc4   :  { %5759 = vmatprep.subr.bf16.mxu1 %v8377_v35 }
  0xc5   :  { %9718 = vst [vmem:[#allocation59_spill] sm:$0xff] %v8440_v24  ;;  %v9639_v58 = vsub.s32 1, %v8440_v24  ;;  %v185_v57 = vsub.s32 5, %v8440_v24  ;;  %v189_v33 = vsub.s32 6, %v8440_v24 }
  0xc6   :  { %5729 = vmatpush1.bf16.msra.mxu0 %v8380_v39 }
  0xc7   :  { %5761 = vmatpush1.bf16.msra.mxu1 %v8384_v31  ;;  %5731 = vmatprep.subr.bf16.mxu0 %v8386_v46 }
  0xc8   :  { %5763 = vmatprep.subr.bf16.mxu1 %v8389_v10 }
  0xca   :  { %5733 = vmatpush1.bf16.msra.mxu0 %v8392_v22 }
  0xcb   :  { %5765 = vmatpush1.bf16.msra.mxu1 %v8396_v21  ;;  %5767 = vmatprep.subr.bf16.mxu0 %v8189_v29 }
  0xcc   :  { %5799 = vmatprep.subr.bf16.mxu1 %v8192_v32 }
  0xcd   :  { %871 = vmatmul.mubr.f32.vlgmr.msra.gmra.mrb[10].mxu0 %v5443_v30 }
  0xce   :  { %942 = vmatmul.mubr.f32.vlgmr.msra.gmra.mrb[10].mxu1 %v5443_v30  ;;  %5769 = vmatpush1.bf16.msra.mxu0 %v8201_v41  ;;  %v181_v30 = vsub.s32 4, %v8440_v24 }
  0xcf   :  { %5801 = vmatpush1.bf16.msra.mxu1 %v8204_v42  ;;  %5771 = vmatprep.subr.bf16.mxu0 %v8206_v43 }
  0xd0   :  { %5803 = vmatprep.subr.bf16.mxu1 %v8208_v47  ;;  %1077 = vmatprep.mubr.f32.mxu0 %v9717_v9 }
  0xd1   :  { %1148 = vmatprep.mubr.f32.mxu1 %v9717_v9 }
  0xd2   :  { %5773 = vmatpush1.bf16.msra.mxu0 %v8213_v53 }
  0xd3   :  { %5805 = vmatpush1.bf16.msra.mxu1 %v8217_v54  ;;  %5775 = vmatprep.subr.bf16.mxu0 %v8219_v55 }
  0xd4   :  { %5807 = vmatprep.subr.bf16.mxu1 %v8222_v59 }
  0xd6   :  { %5777 = vmatpush1.bf16.msra.mxu0 %v8228_v2 }
  0xd7   :  { %5809 = vmatpush1.bf16.msra.mxu1 %v8233_v3  ;;  %5779 = vmatprep.subr.bf16.mxu0 %v8235_v4 }
  0xd8   :  { %5811 = vmatprep.subr.bf16.mxu1 %v8238_v8 }
  0xda   :  { %5781 = vmatpush1.bf16.msra.mxu0 %v8243_v14 }
  0xdb   :  { %5813 = vmatpush1.bf16.msra.mxu1 %v8247_v15  ;;  %5783 = vmatprep.subr.bf16.mxu0 %v8249_v16  ;;  %v8467_v16 = vrot.slane %v161_v51, %v189_v33 }
  0xdc   :  { %5815 = vmatprep.subr.bf16.mxu1 %v8252_v20 }
  0xde   :  { %5785 = vmatpush1.bf16.msra.mxu0 %v8255_v26 }
  0xdf   :  { %5817 = vmatpush1.bf16.msra.mxu1 %v8259_v27  ;;  %5787 = vmatprep.subr.bf16.mxu0 %v8261_v28 }
  0xe0   :  { %5819 = vmatprep.subr.bf16.mxu1 %v8264_v34 }
  0xe2   :  { %5789 = vmatpush1.bf16.msra.mxu0 %v8267_v40  ;;  %v9722_v40 = vsub.s32 3, %v8440_v24 }
  0xe3   :  { %5821 = vmatpush1.bf16.msra.mxu1 %v8271_v44  ;;  %5791 = vmatprep.subr.bf16.mxu0 %v8273_v45  ;;  %v182_v44 = vrot.slane %v161_v51, %v181_v30 }
  0xe4   :  { %5823 = vmatprep.subr.bf16.mxu1 %v8276_v50  ;;  %v178_v34 = vrot.slane %v161_v51, %v9722_v40 }
  0xe6   :  { %5793 = vmatpush1.bf16.msra.mxu0 %v8279_v60  ;;  %v9720_v60 = vsub.s32 2, %v8440_v24 }
  0xe7   :  { %5825 = vmatpush1.bf16.msra.mxu1 %v8283_v61  ;;  %5795 = vmatprep.subr.bf16.mxu0 %v8285_v62  ;;  %v193_v62 = vsub.s32 7, %v8440_v24  ;;  %v170_v61 = vrot.slane %v161_v51, %v9639_v58 }
  0xe8   :  { %5827 = vmatprep.subr.bf16.mxu1 %v8288_v6  ;;  %v174_v50 = vrot.slane %v161_v51, %v9720_v60 }
  0xe9   :  { %v194_v15 = vrot.slane %v161_v51, %v193_v62 }
  0xea   :  { %5797 = vmatpush1.bf16.msra.mxu0 %v8291_v13  ;;  %v9719_v13 = vsub.s32 0, %v8440_v24 }
  0xeb   :  { %5829 = vmatpush1.bf16.msra.mxu1 %v8295_v17  ;;  %5831 = vmatprep.subr.bf16.mxu0 %v8297_v18 }
  0xec   :  { %5863 = vmatprep.subr.bf16.mxu1 %v8300_v23  ;;  %v166_v6 = vrot.slane %v161_v51, %v9719_v13  ;;  %v186_v13 = vrot.slane %v161_v51, %v185_v57 }
 0x158   :  { %v276_v52 = vpop.f32.mrb[0].mxu0 }
 0x159   :  { %v278_v12 = vpop.f32.mrb[1].mxu0  ;;  %v353_v18 = vpop.f32.mrb[0].mxu1 }
 0x15a   :  { %v355_v17 = vpop.f32.mrb[1].mxu1  ;;  %v8482_v62 = vadd.f32 %v278_v12, %v170_v61  ;;  %v8484_v51 = vadd.f32 %v353_v18, %v174_v50 }
 0x15c   :  { %v282_v56 = vpop.f32.mrb[2].mxu0  ;;  %9731 = vst [vmem:[#allocation69_spill] sm:$0xff] %v8484_v51 }
 0x15d   :  { %v8459_v45 = vadd.f32 %v282_v56, %v166_v6  ;;  %v284_v23 = vpop.f32.mrb[3].mxu0  ;;  %v359_v28 = vpop.f32.mrb[2].mxu1 }
 0x15e   :  { %v8463_v27 = vadd.f32 %v284_v23, %v170_v61  ;;  %v8465_v26 = vadd.f32 %v359_v28, %v174_v50  ;;  %v361_v20 = vpop.f32.mrb[3].mxu1 }
 0x15f   :  { %9721 = vst [vmem:[#allocation60_spill] sm:$0xff] %v8459_v45  ;;  %v8469_v58 = vadd.f32 %v361_v20, %v178_v34  ;;  %v8480_v20 = vadd.f32 %v276_v52, %v166_v6 }
 0x160   :  { %9723 = vst [vmem:[#allocation61_spill] sm:$0xff] %v8463_v27  ;;  %9724 = vst [vmem:[#allocation62_spill] sm:$0xff] %v8465_v26  ;;  %v430_v60 = vpop.f32.mrb[4].mxu0 }
 0x161   :  { %9725 = vst [vmem:[#allocation63_spill] sm:$0xff] %v8469_v58  ;;  %v8471_v56 = vadd.f32 %v430_v60, %v182_v44  ;;  %v432_v45 = vpop.f32.mrb[5].mxu0  ;;  %v507_v30 = vpop.f32.mrb[4].mxu1  ;;  %9730 = vst [vmem:[#allocation68_spill] sm:$0xff] %v8480_v20 }
 0x162   :  { %v8473_v14 = vadd.f32 %v432_v45, %v186_v13  ;;  %v8476_v40 = vadd.f32 %v507_v30, %v8467_v16  ;;  %v509_v23 = vpop.f32.mrb[5].mxu1 }
 0x163   :  { %9726 = vst [vmem:[#allocation64_spill] sm:$0xff] %v8471_v56  ;;  %v8478_v57 = vadd.f32 %v509_v23, %v194_v15  ;;  %v8486_v56 = vadd.f32 %v355_v17, %v178_v34 }
 0x164   :  { %9727 = vst [vmem:[#allocation65_spill] sm:$0xff] %v8473_v14  ;;  %9728 = vst [vmem:[#allocation66_spill] sm:$0xff] %v8476_v40  ;;  %v436_v28 = vpop.f32.mrb[6].mxu0 }
 0x165   :  { %9729 = vst [vmem:[#allocation67_spill] sm:$0xff] %v8478_v57  ;;  %v438_v24 = vpop.f32.mrb[7].mxu0  ;;  %v513_v33 = vpop.f32.mrb[6].mxu1  ;;  %9732 = vst [vmem:[#allocation70_spill] sm:$0xff] %v8486_v56 }
 0x166   :  { %v515_v26 = vpop.f32.mrb[7].mxu1  ;;  %v8494_v27 = vadd.f32 %v438_v24, %v186_v13 }
 0x180   :  { %v718_v60 = vpop.f32.mrb[8].mxu0 }
 0x181   :  { %v719_v45 = vadd.f32 %v718_v60, %v8480_v20  ;;  %v789_v30 = vpop.f32.mrb[8].mxu1  ;;  %v720_v40 = vpop.f32.mrb[9].mxu0 }
 0x182   :  { %v790_v23 = vadd.f32 %v789_v30, %v8484_v51  ;;  %v721_v57 = vadd.f32 %v720_v40, %v8482_v62  ;;  %v791_v14 = vpop.f32.mrb[9].mxu1  ;;  %v8492_v30 = vadd.f32 %v436_v28, %v182_v44  ;;  %v647_v40 = vld [vmem:[#allocation6] sm:$0x3]  ;;  %v8500_v28 = vadd.f32 %v515_v26, %v194_v15 }
 0x183   :  { %v5444_v58 = vmul.f32 -1.442695, %v719_v45  ;;  %v792_v6 = vadd.f32 %v791_v14, %v8486_v56 }
 0x184   :  { %v5445_v52 = vmul.f32 -1.442695, %v721_v57 }
 0x185   :  { %7366 = vpow2.f32 %v5444_v58  ;;  %v5446_v50 = vmul.f32 -1.442695, %v792_v6 }
 0x186   :  { %7368 = vpow2.f32 %v5445_v52  ;;  %v798_v52 = vrot.slane %v8492_v30, 6 }
 0x187   :  { %7370 = vpow2.f32 %v5446_v50  ;;  %v799_v50 = vrot.slane %v8494_v27, 6 }
 0x188   :  { %7372 = vtanh.f32 %v790_v23 }
 0x18f   :  { %v7367_v61 = vpop.eup %7366 }
 0x190   :  { %v7369_v18 = vpop.eup %7368  ;;  %v951_v34 = vadd.f32 1.0, %v7367_v61 }
 0x191   :  { %v957_v17 = vadd.f32 1.0, %v7369_v18  ;;  %v7371_v12 = vpop.eup %7370 }
 0x192   :  { %7374 = vrcp.f32 %v951_v34  ;;  %v7373_v60 = vpop.eup %7372  ;;  %v964_v57 = vadd.f32 1.0, %v7371_v12 }
 0x193   :  { %7376 = vrcp.f32 %v957_v17 }
 0x194   :  { %7378 = vrcp.f32 %v964_v57 }
 0x19c   :  { %v7375_v45 = vpop.eup %7374 }
 0x19d   :  { %v7377_v14 = vpop.eup %7376  ;;  %v968_v58 = vmul.f32 %v7375_v45, %v7373_v60  ;;  %v801_v60 = vrot.slane %v8500_v28, 6 }
 0x19e   :  { %v967_v6 = vmul.f32 %v7377_v14, %v647_v40  ;;  %v8505_v40 = vadd.f32 %v513_v33, %v8467_v16  ;;  %v7379_v14 = vpop.eup %7378  ;;  %v9733_v33 = vld [vmem:[#allocation49_spill] sm:$0xff] }
 0x1a0   :  { %v8497_v61 = vadd.f32 %v968_v58, %v967_v6  ;;  %v872_v23 = vpop.f32.mrb[10].mxu0  ;;  %v800_v58 = vrot.slane %v8505_v40, 6 }
 0x1a1   :  { %v873_v18 = vadd.f32 %v872_v23, %v798_v52  ;;  %v943_v34 = vpop.f32.mrb[10].mxu1  ;;  %v874_v44 = vpop.f32.mrb[11].mxu0 }
 0x1a2   :  { %v875_v17 = vadd.f32 %v874_v44, %v799_v50  ;;  %v945_v24 = vpop.f32.mrb[11].mxu1  ;;  %7380 = vtanh.f32 %v8497_v61  ;;  %v944_v26 = vadd.f32 %v943_v34, %v800_v58  ;;  %v9735_v34 = vld [vmem:[#allocation51_spill] sm:$0xff] }
 0x1a3   :  { %v5447_v13 = vmul.f32 -1.442695, %v873_v18  ;;  %v946_v45 = vadd.f32 %v945_v24, %v801_v60  ;;  %v9734_v18 = vld [vmem:[#allocation50_spill] sm:$0xff]  ;;  %v651_v24 = vld [vmem:[#allocation6 + $0x2] sm:$0x3]  ;;  %v9737_v60 = vld [vmem:[#allocation53_spill] sm:$0xff] }
 0x1a4   :  { %v5448_v12 = vmul.f32 -1.442695, %v875_v17 }
 0x1a5   :  { %7382 = vpow2.f32 %v5447_v13  ;;  %v5449_v15 = vmul.f32 -1.442695, %v946_v45 }
 0x1a6   :  { %7384 = vpow2.f32 %v5448_v12  ;;  %v9736_v12 = vld [vmem:[#allocation52_spill] sm:$0xff] }
 0x1a7   :  { %7386 = vpow2.f32 %v5449_v15  ;;  %v9739_v15 = vld [vmem:[#allocation55_spill] sm:$0xff] }
 0x1a8   :  { %7388 = vtanh.f32 %v944_v26 }
 0x1ac   :  { %v7381_v57 = vpop.eup %7380 }
 0x1ad   :  { %v971_v6 = vmul.f32 %v7381_v57, %v7379_v14  ;;  %v9738_v57 = vld [vmem:[#allocation54_spill] sm:$0xff] }
 0x1af   :  { %v7383_v52 = vpop.eup %7382  ;;  %996 = vst [vmem:[#allocation2] sm:$0x3] %v971_v6  ;;  %1078 = vmatmul.mubr.f32.vlgmr.msra.gmra.mrb[12].mxu0 %v971_v6  ;;  %1149 = vmatmul.mubr.f32.vlgmr.msra.gmra.mrb[12].mxu1 %v971_v6 }
 0x1b0   :  { %v7385_v23 = vpop.eup %7384  ;;  %v975_v50 = vadd.f32 1.0, %v7383_v52  ;;  %5833 = vmatpush1.bf16.msra.mxu0 %v8306_v36  ;;  %5865 = vmatpush1.bf16.msra.mxu1 %v8310_v37  ;;  %v9740_v52 = vld [vmem:[#allocation56_spill] sm:$0xff] }
 0x1b1   :  { %v981_v16 = vadd.f32 1.0, %v7385_v23  ;;  %5835 = vmatprep.subr.bf16.mxu0 %v8312_v38  ;;  %5867 = vmatprep.subr.bf16.mxu1 %v8315_v49  ;;  %v7387_v44 = vpop.eup %7386  ;;  %v9741_v23 = vld [vmem:[#allocation57_spill] sm:$0xff] }
 0x1b2   :  { %7390 = vrcp.f32 %v975_v50  ;;  %1227 = vmatprep.mubr.f32.mxu0 %v9717_v9  ;;  %1298 = vmatprep.mubr.f32.mxu1 %v9717_v9  ;;  %v7389_v17 = vpop.eup %7388  ;;  %v988_v58 = vadd.f32 1.0, %v7387_v44  ;;  %v9742_v50 = vld [vmem:[#allocation58_spill] sm:$0xff] }
 0x1b3   :  { %7392 = vrcp.f32 %v981_v16 }
 0x1b4   :  { %5837 = vmatpush1.bf16.msra.mxu0 %v8318_v63  ;;  %5869 = vmatpush1.bf16.msra.mxu1 %v8322_v1  ;;  %7394 = vrcp.f32 %v988_v58  ;;  %v9746_v58 = vld [vmem:[#allocation32_spill] sm:$0xff] }
 0x1b5   :  { %5839 = vmatprep.subr.bf16.mxu0 %v8324_v5  ;;  %5871 = vmatprep.subr.bf16.mxu1 %v8327_v11 }
 0x1b8   :  { %5841 = vmatpush1.bf16.msra.mxu0 %v8332_v25  ;;  %5873 = vmatpush1.bf16.msra.mxu1 %v9733_v33 }
 0x1b9   :  { %5843 = vmatprep.subr.bf16.mxu0 %v9734_v18  ;;  %5875 = vmatprep.subr.bf16.mxu1 %v9735_v34 }
 0x1bc   :  { %v7391_v13 = vpop.eup %7390  ;;  %5845 = vmatpush1.bf16.msra.mxu0 %v9736_v12  ;;  %5877 = vmatpush1.bf16.msra.mxu1 %v9737_v60 }
 0x1bd   :  { %v7393_v45 = vpop.eup %7392  ;;  %v992_v14 = vmul.f32 %v7391_v13, %v7389_v17  ;;  %5847 = vmatprep.subr.bf16.mxu0 %v9738_v57  ;;  %5879 = vmatprep.subr.bf16.mxu1 %v9739_v15  ;;  %v9743_v13 = vld [vmem:[#allocation29_spill] sm:$0xff] }
 0x1be   :  { %v991_v26 = vmul.f32 %v7393_v45, %v651_v24  ;;  %v7395_v16 = vpop.eup %7394  ;;  %v9744_v45 = vld [vmem:[#allocation30_spill] sm:$0xff] }
 0x1c0   :  { %v8526_v6 = vadd.f32 %v992_v14, %v991_v26  ;;  %5849 = vmatpush1.bf16.msra.mxu0 %v9740_v52  ;;  %5881 = vmatpush1.bf16.msra.mxu1 %v9741_v23  ;;  %v9745_v14 = vld [vmem:[#allocation31_spill] sm:$0xff]  ;;  %v9747_v26 = vld [vmem:[#allocation33_spill] sm:$0xff] }
 0x1c1   :  { %5851 = vmatprep.subr.bf16.mxu0 %v8362_v48  ;;  %5883 = vmatprep.subr.bf16.mxu1 %v9742_v50 }
 0x1c2   :  { %7396 = vtanh.f32 %v8526_v6 }
 0x1c4   :  { %5853 = vmatpush1.bf16.msra.mxu0 %v8368_v7  ;;  %5885 = vmatpush1.bf16.msra.mxu1 %v8372_v0 }
 0x1c5   :  { %5855 = vmatprep.subr.bf16.mxu0 %v8374_v19  ;;  %5887 = vmatprep.subr.bf16.mxu1 %v8377_v35 }
 0x1c8   :  { %5857 = vmatpush1.bf16.msra.mxu0 %v8380_v39  ;;  %5889 = vmatpush1.bf16.msra.mxu1 %v8384_v31 }
 0x1c9   :  { %5859 = vmatprep.subr.bf16.mxu0 %v8386_v46  ;;  %5891 = vmatprep.subr.bf16.mxu1 %v8389_v10 }
 0x1cc   :  { %v7397_v44 = vpop.eup %7396  ;;  %5861 = vmatpush1.bf16.msra.mxu0 %v8392_v22  ;;  %5893 = vmatpush1.bf16.msra.mxu1 %v8396_v21 }
 0x1cd   :  { %v995_v17 = vmul.f32 %v7397_v44, %v7395_v16  ;;  %5895 = vmatprep.subr.bf16.mxu0 %v8189_v29  ;;  %5927 = vmatprep.subr.bf16.mxu1 %v8192_v32  ;;  %v9748_v16 = vld [vmem:[#allocation34_spill] sm:$0xff]  ;;  %v9749_v44 = vld [vmem:[#allocation35_spill] sm:$0xff] }
 0x1cf   :  { %v998_v24 = vrot.slane %v995_v17, 2  ;;  %1228 = vmatmul.mubr.f32.vlgmr.msra.gmra.mrb[14].mxu0 %v995_v17  ;;  %1299 = vmatmul.mubr.f32.vlgmr.msra.gmra.mrb[14].mxu1 %v995_v17  ;;  %v9750_v17 = vld [vmem:[#allocation36_spill] sm:$0xff] }
 0x1d0   :  { %5897 = vmatpush1.bf16.msra.mxu0 %v8201_v41  ;;  %5929 = vmatpush1.bf16.msra.mxu1 %v8204_v42 }
 0x1d1   :  { %1000 = vst [vmem:[#allocation2 + $0x18] sm:$0xc0] %v998_v24  ;;  %5899 = vmatprep.subr.bf16.mxu0 %v8206_v43  ;;  %5931 = vmatprep.subr.bf16.mxu1 %v8208_v47  ;;  %v9751_v24 = vld [vmem:[#allocation37_spill] sm:$0xff] }
 0x1d2   :  { %1433 = vmatprep.mubr.f32.mxu0 %v9717_v9  ;;  %1504 = vmatprep.mubr.f32.mxu1 %v9717_v9 }
 0x1d4   :  { %5901 = vmatpush1.bf16.msra.mxu0 %v8213_v53  ;;  %5933 = vmatpush1.bf16.msra.mxu1 %v8217_v54 }
 0x1d5   :  { %5903 = vmatprep.subr.bf16.mxu0 %v8219_v55  ;;  %5935 = vmatprep.subr.bf16.mxu1 %v8222_v59 }
 0x1d8   :  { %5905 = vmatpush1.bf16.msra.mxu0 %v8228_v2  ;;  %5937 = vmatpush1.bf16.msra.mxu1 %v8233_v3 }
 0x1d9   :  { %5907 = vmatprep.subr.bf16.mxu0 %v8235_v4  ;;  %5939 = vmatprep.subr.bf16.mxu1 %v8238_v8  ;;  %v9752_v4 = vld [vmem:[#allocation38_spill] sm:$0xff]  ;;  %v9753_v8 = vld [vmem:[#allocation39_spill] sm:$0xff] }
 0x1dc   :  { %5909 = vmatpush1.bf16.msra.mxu0 %v9743_v13  ;;  %5941 = vmatpush1.bf16.msra.mxu1 %v9744_v45  ;;  %v9754_v13 = vld [vmem:[#allocation40_spill] sm:$0xff]  ;;  %v9755_v45 = vld [vmem:[#allocation41_spill] sm:$0xff] }
 0x1dd   :  { %5911 = vmatprep.subr.bf16.mxu0 %v9745_v14  ;;  %5943 = vmatprep.subr.bf16.mxu1 %v9746_v58  ;;  %v9756_v14 = vld [vmem:[#allocation42_spill] sm:$0xff]  ;;  %v9757_v58 = vld [vmem:[#allocation43_spill] sm:$0xff] }
 0x1e0   :  { %5913 = vmatpush1.bf16.msra.mxu0 %v9747_v26  ;;  %5945 = vmatpush1.bf16.msra.mxu1 %v9748_v16  ;;  %v9758_v26 = vld [vmem:[#allocation44_spill] sm:$0xff]  ;;  %v9759_v16 = vld [vmem:[#allocation45_spill] sm:$0xff] }
 0x1e1   :  { %5915 = vmatprep.subr.bf16.mxu0 %v9749_v44  ;;  %5947 = vmatprep.subr.bf16.mxu1 %v9750_v17  ;;  %v9760_v44 = vld [vmem:[#allocation46_spill] sm:$0xff]  ;;  %v9761_v17 = vld [vmem:[#allocation47_spill] sm:$0xff] }
 0x1e4   :  { %5917 = vmatpush1.bf16.msra.mxu0 %v9751_v24  ;;  %5949 = vmatpush1.bf16.msra.mxu1 %v9752_v4  ;;  %v9762_v24 = vld [vmem:[#allocation48_spill] sm:$0xff] }
 0x1e5   :  { %5919 = vmatprep.subr.bf16.mxu0 %v9753_v8  ;;  %5951 = vmatprep.subr.bf16.mxu1 %v9754_v13  ;;  %v1005_v8 = vrot.slane %v8480_v20, 2  ;;  %v1007_v13 = vrot.slane %v8484_v51, 2 }
 0x1e8   :  { %5921 = vmatpush1.bf16.msra.mxu0 %v9755_v45  ;;  %5953 = vmatpush1.bf16.msra.mxu1 %v9756_v14  ;;  %v1006_v14 = vrot.slane %v8482_v62, 2 }
 0x1e9   :  { %5923 = vmatprep.subr.bf16.mxu0 %v9757_v58  ;;  %5955 = vmatprep.subr.bf16.mxu1 %v9758_v26  ;;  %v1008_v58 = vrot.slane %v8486_v56, 2 }
 0x1ec   :  { %5925 = vmatpush1.bf16.msra.mxu0 %v9759_v16  ;;  %5957 = vmatpush1.bf16.msra.mxu1 %v9760_v44 }
 0x1ed   :  { %5959 = vmatprep.subr.bf16.mxu0 %v9761_v17  ;;  %5991 = vmatprep.subr.bf16.mxu1 %v9762_v24 }
 0x282   :  { %v1079_v4 = vpop.f32.mrb[12].mxu0  ;;  %v1150_v45 = vpop.f32.mrb[12].mxu1 }
 0x283   :  { %v1080_v3 = vadd.f32 %v1079_v4, %v1005_v8  ;;  %v1151_v26 = vadd.f32 %v1150_v45, %v1007_v13  ;;  %v1081_v2 = vpop.f32.mrb[13].mxu0  ;;  %v1152_v16 = vpop.f32.mrb[13].mxu1 }
 0x284   :  { %v1082_v59 = vadd.f32 %v1081_v2, %v1006_v14  ;;  %v1153_v44 = vadd.f32 %v1152_v16, %v1008_v58 }
 0x285   :  { %v5450_v55 = vmul.f32 -1.442695, %v1080_v3 }
 0x286   :  { %v5451_v17 = vmul.f32 -1.442695, %v1082_v59  ;;  %v5452_v24 = vmul.f32 -1.442695, %v1153_v44 }
 0x287   :  { %7398 = vpow2.f32 %v5450_v55  ;;  %v1155_v55 = vrot.slane %v8492_v30, 4 }
 0x288   :  { %7400 = vpow2.f32 %v5451_v17 }
 0x289   :  { %7402 = vpow2.f32 %v5452_v24  ;;  %v1157_v24 = vrot.slane %v8505_v40, 4 }
 0x28a   :  { %7404 = vtanh.f32 %v1151_v26 }
 0x291   :  { %v7399_v20 = vpop.eup %7398 }
 0x292   :  { %v7401_v54 = vpop.eup %7400  ;;  %v1308_v51 = vadd.f32 1.0, %v7399_v20  ;;  %v1156_v20 = vrot.slane %v8494_v27, 4 }
 0x293   :  { %v1314_v53 = vadd.f32 1.0, %v7401_v54  ;;  %v7403_v56 = vpop.eup %7402 }
 0x294   :  { %7406 = vrcp.f32 %v1308_v51  ;;  %v7405_v4 = vpop.eup %7404  ;;  %v1321_v2 = vadd.f32 1.0, %v7403_v56  ;;  %v1158_v56 = vrot.slane %v8500_v28, 4 }
 0x295   :  { %7408 = vrcp.f32 %v1314_v53 }
 0x296   :  { %7410 = vrcp.f32 %v1321_v2 }
 0x29e   :  { %v7407_v8 = vpop.eup %7406 }
 0x29f   :  { %v7409_v13 = vpop.eup %7408  ;;  %v1325_v45 = vmul.f32 %v7407_v8, %v7405_v4 }
 0x2a0   :  { %v1324_v3 = vmul.f32 %v7409_v13, %v8497_v61  ;;  %v7411_v17 = vpop.eup %7410 }
 0x2a2   :  { %v8585_v59 = vadd.f32 %v1325_v45, %v1324_v3  ;;  %v1229_v14 = vpop.f32.mrb[14].mxu0  ;;  %v1300_v58 = vpop.f32.mrb[14].mxu1 }
 0x2a3   :  { %v1230_v54 = vadd.f32 %v1229_v14, %v1155_v55  ;;  %v1231_v51 = vpop.f32.mrb[15].mxu0  ;;  %v1302_v53 = vpop.f32.mrb[15].mxu1  ;;  %v1301_v13 = vadd.f32 %v1300_v58, %v1157_v24 }
 0x2a4   :  { %v1232_v26 = vadd.f32 %v1231_v51, %v1156_v20  ;;  %7412 = vtanh.f32 %v8585_v59  ;;  %v1303_v61 = vadd.f32 %v1302_v53, %v1158_v56 }
 0x2a5   :  { %v5453_v16 = vmul.f32 -1.442695, %v1230_v54 }
 0x2a6   :  { %v5454_v44 = vmul.f32 -1.442695, %v1232_v26  ;;  %v5455_v8 = vmul.f32 -1.442695, %v1303_v61 }
 0x2a7   :  { %7414 = vpow2.f32 %v5453_v16 }
 0x2a8   :  { %7416 = vpow2.f32 %v5454_v44 }
 0x2a9   :  { %7418 = vpow2.f32 %v5455_v8  ;;  %v9764_v8 = vld [vmem:[#allocation22_spill] sm:$0xff] }
 0x2aa   :  { %7420 = vtanh.f32 %v1301_v13  ;;  %v9765_v13 = vld [vmem:[#allocation23_spill] sm:$0xff] }
 0x2ae   :  { %v7413_v4 = vpop.eup %7412 }
 0x2af   :  { %v1328_v45 = vmul.f32 %v7413_v4, %v7411_v17  ;;  %v9763_v4 = vld [vmem:[#allocation21_spill] sm:$0xff] }
 0x2b1   :  { %v7415_v2 = vpop.eup %7414  ;;  %v1354_v3 = vrot.slane %v1328_v45, 6  ;;  %1434 = vmatmul.mubr.f32.vlgmr.msra.gmra.mrb[16].mxu0 %v1328_v45  ;;  %1505 = vmatmul.mubr.f32.vlgmr.msra.gmra.mrb[16].mxu1 %v1328_v45  ;;  %v9766_v45 = vld [vmem:[#allocation24_spill] sm:$0xff] }
 0x2b2   :  { %v7417_v55 = vpop.eup %7416  ;;  %v1332_v14 = vadd.f32 1.0, %v7415_v2  ;;  %5961 = vmatpush1.bf16.msra.mxu0 %v8306_v36  ;;  %5993 = vmatpush1.bf16.msra.mxu1 %v8310_v37  ;;  %v9767_v2 = vld [vmem:[#allocation25_spill] sm:$0xff] }
 0x2b3   :  { %v1338_v20 = vadd.f32 1.0, %v7417_v55  ;;  %1356 = vst [vmem:[#allocation2] sm:$0xc] %v1354_v3  ;;  %5963 = vmatprep.subr.bf16.mxu0 %v8312_v38  ;;  %5995 = vmatprep.subr.bf16.mxu1 %v8315_v49  ;;  %v7419_v58 = vpop.eup %7418  ;;  %v9768_v3 = vld [vmem:[#allocation26_spill] sm:$0xff]  ;;  %v9769_v55 = vld [vmem:[#allocation27_spill] sm:$0xff] }
 0x2b4   :  { %7422 = vrcp.f32 %v1332_v14  ;;  %1583 = vmatprep.mubr.f32.mxu0 %v9717_v9  ;;  %1654 = vmatprep.mubr.f32.mxu1 %v9717_v9  ;;  %v7421_v54 = vpop.eup %7420  ;;  %v1345_v16 = vadd.f32 1.0, %v7419_v58  ;;  %v9770_v14 = vld [vmem:[#allocation28_spill] sm:$0xff]  ;;  %v9772_v58 = vld [vmem:[#allocation30_spill] sm:$0xff] }
 0x2b5   :  { %7424 = vrcp.f32 %v1338_v20  ;;  %v9771_v20 = vld [vmem:[#allocation29_spill] sm:$0xff] }
 0x2b6   :  { %5965 = vmatpush1.bf16.msra.mxu0 %v8318_v63  ;;  %5997 = vmatpush1.bf16.msra.mxu1 %v8322_v1  ;;  %7426 = vrcp.f32 %v1345_v16  ;;  %v9777_v16 = vld [vmem:[#allocation35_spill] sm:$0xff] }
 0x2b7   :  { %5967 = vmatprep.subr.bf16.mxu0 %v8324_v5  ;;  %5999 = vmatprep.subr.bf16.mxu1 %v8327_v11 }
 0x2ba   :  { %5969 = vmatpush1.bf16.msra.mxu0 %v8332_v25  ;;  %6001 = vmatpush1.bf16.msra.mxu1 %v9733_v33 }
 0x2bb   :  { %5971 = vmatprep.subr.bf16.mxu0 %v9734_v18  ;;  %6003 = vmatprep.subr.bf16.mxu1 %v9735_v34 }
 0x2be   :  { %v7423_v51 = vpop.eup %7422  ;;  %5973 = vmatpush1.bf16.msra.mxu0 %v9736_v12  ;;  %6005 = vmatpush1.bf16.msra.mxu1 %v9737_v60 }
 0x2bf   :  { %v7425_v53 = vpop.eup %7424  ;;  %v1349_v26 = vmul.f32 %v7423_v51, %v7421_v54  ;;  %5975 = vmatprep.subr.bf16.mxu0 %v9738_v57  ;;  %6007 = vmatprep.subr.bf16.mxu1 %v9739_v15  ;;  %v9773_v54 = vld [vmem:[#allocation31_spill] sm:$0xff]  ;;  %v9774_v51 = vld [vmem:[#allocation32_spill] sm:$0xff] }
 0x2c0   :  { %v1348_v44 = vmul.f32 %v7425_v53, %v8526_v6  ;;  %v7427_v6 = vpop.eup %7426  ;;  %v9775_v53 = vld [vmem:[#allocation33_spill] sm:$0xff] }
 0x2c2   :  { %v8610_v56 = vadd.f32 %v1349_v26, %v1348_v44  ;;  %5977 = vmatpush1.bf16.msra.mxu0 %v9740_v52  ;;  %6009 = vmatpush1.bf16.msra.mxu1 %v9741_v23  ;;  %v9776_v26 = vld [vmem:[#allocation34_spill] sm:$0xff]  ;;  %v9778_v44 = vld [vmem:[#allocation36_spill] sm:$0xff] }
 0x2c3   :  { %5979 = vmatprep.subr.bf16.mxu0 %v8362_v48  ;;  %6011 = vmatprep.subr.bf16.mxu1 %v9742_v50 }
 0x2c4   :  { %7428 = vtanh.f32 %v8610_v56 }
 0x2c6   :  { %5981 = vmatpush1.bf16.msra.mxu0 %v8368_v7  ;;  %6013 = vmatpush1.bf16.msra.mxu1 %v8372_v0 }
 0x2c7   :  { %5983 = vmatprep.subr.bf16.mxu0 %v8374_v19  ;;  %6015 = vmatprep.subr.bf16.mxu1 %v8377_v35 }
 0x2ca   :  { %5985 = vmatpush1.bf16.msra.mxu0 %v8380_v39  ;;  %6017 = vmatpush1.bf16.msra.mxu1 %v8384_v31 }
 0x2cb   :  { %5987 = vmatprep.subr.bf16.mxu0 %v8386_v46  ;;  %6019 = vmatprep.subr.bf16.mxu1 %v8389_v10 }
 0x2ce   :  { %v7429_v61 = vpop.eup %7428  ;;  %5989 = vmatpush1.bf16.msra.mxu0 %v8392_v22  ;;  %6021 = vmatpush1.bf16.msra.mxu1 %v8396_v21 }
 0x2cf   :  { %v1352_v17 = vmul.f32 %v7429_v61, %v7427_v6  ;;  %6023 = vmatprep.subr.bf16.mxu0 %v8189_v29  ;;  %6055 = vmatprep.subr.bf16.mxu1 %v8192_v32  ;;  %v9779_v6 = vld [vmem:[#allocation37_spill] sm:$0xff]  ;;  %v9780_v61 = vld [vmem:[#allocation38_spill] sm:$0xff] }
 0x2d1   :  { %v1358_v24 = vrot.slane %v1352_v17, 4  ;;  %1584 = vmatmul.mubr.f32.vlgmr.msra.gmra.mrb[18].mxu0 %v1352_v17  ;;  %1655 = vmatmul.mubr.f32.vlgmr.msra.gmra.mrb[18].mxu1 %v1352_v17  ;;  %v9781_v17 = vld [vmem:[#allocation39_spill] sm:$0xff] }
 0x2d2   :  { %6025 = vmatpush1.bf16.msra.mxu0 %v8201_v41  ;;  %6057 = vmatpush1.bf16.msra.mxu1 %v8204_v42 }
 0x2d3   :  { %1360 = vst [vmem:[#allocation2 + $0x18] sm:$0x30] %v1358_v24  ;;  %6027 = vmatprep.subr.bf16.mxu0 %v8206_v43  ;;  %6059 = vmatprep.subr.bf16.mxu1 %v8208_v47  ;;  %v9782_v24 = vld [vmem:[#allocation40_spill] sm:$0xff] }
 0x2d4   :  { %1789 = vmatprep.mubr.f32.mxu0 %v9717_v9  ;;  %1860 = vmatprep.mubr.f32.mxu1 %v9717_v9 }
 0x2d6   :  { %6029 = vmatpush1.bf16.msra.mxu0 %v9763_v4  ;;  %6061 = vmatpush1.bf16.msra.mxu1 %v9764_v8 }
 0x2d7   :  { %6031 = vmatprep.subr.bf16.mxu0 %v9765_v13  ;;  %6063 = vmatprep.subr.bf16.mxu1 %v9766_v45 }
 0x2da   :  { %6033 = vmatpush1.bf16.msra.mxu0 %v9767_v2  ;;  %6065 = vmatpush1.bf16.msra.mxu1 %v9768_v3 }
 0x2db   :  { %6035 = vmatprep.subr.bf16.mxu0 %v9769_v55  ;;  %6067 = vmatprep.subr.bf16.mxu1 %v9770_v14  ;;  %v9793_v55 = vld [vmem:[#allocation70_spill] sm:$0xff] }
 0x2de   :  { %6037 = vmatpush1.bf16.msra.mxu0 %v9771_v20  ;;  %6069 = vmatpush1.bf16.msra.mxu1 %v9772_v58  ;;  %v9783_v58 = vld [vmem:[#allocation41_spill] sm:$0xff] }
 0x2df   :  { %6039 = vmatprep.subr.bf16.mxu0 %v9773_v54  ;;  %6071 = vmatprep.subr.bf16.mxu1 %v9774_v51  ;;  %v9784_v54 = vld [vmem:[#allocation42_spill] sm:$0xff]  ;;  %v9785_v51 = vld [vmem:[#allocation43_spill] sm:$0xff]  ;;  %v9792_v20 = vld [vmem:[#allocation69_spill] sm:$0xff] }
 0x2e2   :  { %6041 = vmatpush1.bf16.msra.mxu0 %v9775_v53  ;;  %6073 = vmatpush1.bf16.msra.mxu1 %v9776_v26  ;;  %v9786_v53 = vld [vmem:[#allocation44_spill] sm:$0xff]  ;;  %v9787_v26 = vld [vmem:[#allocation45_spill] sm:$0xff] }
 0x2e3   :  { %6043 = vmatprep.subr.bf16.mxu0 %v9777_v16  ;;  %6075 = vmatprep.subr.bf16.mxu1 %v9778_v44  ;;  %v9788_v16 = vld [vmem:[#allocation46_spill] sm:$0xff]  ;;  %v9789_v44 = vld [vmem:[#allocation47_spill] sm:$0xff] }
 0x2e6   :  { %6045 = vmatpush1.bf16.msra.mxu0 %v9779_v6  ;;  %6077 = vmatpush1.bf16.msra.mxu1 %v9780_v61  ;;  %v9790_v6 = vld [vmem:[#allocation48_spill] sm:$0xff] }
 0x2e7   :  { %6047 = vmatprep.subr.bf16.mxu0 %v9781_v17  ;;  %6079 = vmatprep.subr.bf16.mxu1 %v9782_v24  ;;  %v9791_v61 = vld [vmem:[#allocation68_spill] sm:$0xff]  ;;  %v1363_v24 = vrot.slane %v9792_v20, 4 }
 0x2e8   :  { %v1361_v17 = vrot.slane %v9791_v61, 4 }
 0x2ea   :  { %6049 = vmatpush1.bf16.msra.mxu0 %v9783_v58  ;;  %6081 = vmatpush1.bf16.msra.mxu1 %v9784_v54  ;;  %v1362_v54 = vrot.slane %v8482_v62, 4 }
 0x2eb   :  { %6051 = vmatprep.subr.bf16.mxu0 %v9785_v51  ;;  %6083 = vmatprep.subr.bf16.mxu1 %v9786_v53  ;;  %v1364_v51 = vrot.slane %v9793_v55, 4 }
 0x2ee   :  { %6053 = vmatpush1.bf16.msra.mxu0 %v9787_v26  ;;  %6085 = vmatpush1.bf16.msra.mxu1 %v9788_v16 }
 0x2ef   :  { %6087 = vmatprep.subr.bf16.mxu0 %v9789_v44  ;;  %6119 = vmatprep.subr.bf16.mxu1 %v9790_v6 }
 0x384   :  { %v1435_v14 = vpop.f32.mrb[16].mxu0  ;;  %v1506_v58 = vpop.f32.mrb[16].mxu1 }
 0x385   :  { %v1436_v3 = vadd.f32 %v1435_v14, %v1361_v17  ;;  %v1507_v53 = vadd.f32 %v1506_v58, %v1363_v24  ;;  %v1437_v2 = vpop.f32.mrb[17].mxu0  ;;  %v1508_v26 = vpop.f32.mrb[17].mxu1 }
 0x386   :  { %v1438_v45 = vadd.f32 %v1437_v2, %v1362_v54  ;;  %v1509_v16 = vadd.f32 %v1508_v26, %v1364_v51  ;;  %v1512_v26 = vrot.slane %v8494_v27, 2 }
 0x387   :  { %v5456_v13 = vmul.f32 -1.442695, %v1436_v3 }
 0x388   :  { %v5457_v44 = vmul.f32 -1.442695, %v1438_v45  ;;  %v5458_v6 = vmul.f32 -1.442695, %v1509_v16 }
 0x389   :  { %7430 = vpow2.f32 %v5456_v13  ;;  %v1511_v13 = vrot.slane %v8492_v30, 2 }
 0x38a   :  { %7432 = vpow2.f32 %v5457_v44 }
 0x38b   :  { %7434 = vpow2.f32 %v5458_v6 }
 0x38c   :  { %7436 = vtanh.f32 %v1507_v53 }
 0x393   :  { %v7431_v61 = vpop.eup %7430 }
 0x394   :  { %v7433_v8 = vpop.eup %7432  ;;  %v1664_v20 = vadd.f32 1.0, %v7431_v61  ;;  %v1513_v61 = vrot.slane %v8505_v40, 2 }
 0x395   :  { %v1670_v4 = vadd.f32 1.0, %v7433_v8  ;;  %v7435_v55 = vpop.eup %7434 }
 0x396   :  { %7438 = vrcp.f32 %v1664_v20  ;;  %v7437_v14 = vpop.eup %7436  ;;  %v1677_v2 = vadd.f32 1.0, %v7435_v55 }
 0x397   :  { %7440 = vrcp.f32 %v1670_v4 }
 0x398   :  { %7442 = vrcp.f32 %v1677_v2 }
 0x3a0   :  { %v7439_v58 = vpop.eup %7438 }
 0x3a1   :  { %v7441_v17 = vpop.eup %7440  ;;  %v1681_v24 = vmul.f32 %v7439_v58, %v7437_v14 }
 0x3a2   :  { %v1680_v3 = vmul.f32 %v7441_v17, %v8585_v59  ;;  %v1514_v59 = vrot.slane %v8500_v28, 2  ;;  %v7443_v6 = vpop.eup %7442 }
 0x3a4   :  { %v8669_v45 = vadd.f32 %v1681_v24, %v1680_v3  ;;  %v1585_v54 = vpop.f32.mrb[18].mxu0  ;;  %v1656_v51 = vpop.f32.mrb[18].mxu1 }
 0x3a5   :  { %v1586_v8 = vadd.f32 %v1585_v54, %v1511_v13  ;;  %v1587_v20 = vpop.f32.mrb[19].mxu0  ;;  %v1658_v4 = vpop.f32.mrb[19].mxu1  ;;  %v1657_v17 = vadd.f32 %v1656_v51, %v1513_v61 }
 0x3a6   :  { %v1588_v53 = vadd.f32 %v1587_v20, %v1512_v26  ;;  %7444 = vtanh.f32 %v8669_v45  ;;  %v1659_v55 = vadd.f32 %v1658_v4, %v1514_v59 }
 0x3a7   :  { %v5459_v16 = vmul.f32 -1.442695, %v1586_v8 }
 0x3a8   :  { %v5460_v44 = vmul.f32 -1.442695, %v1588_v53  ;;  %v5461_v58 = vmul.f32 -1.442695, %v1659_v55 }
 0x3a9   :  { %7446 = vpow2.f32 %v5459_v16 }
 0x3aa   :  { %7448 = vpow2.f32 %v5460_v44 }
 0x3ab   :  { %7450 = vpow2.f32 %v5461_v58  ;;  %v9795_v58 = vld [vmem:[#allocation22_spill] sm:$0xff] }
 0x3ac   :  { %7452 = vtanh.f32 %v1657_v17  ;;  %v9796_v17 = vld [vmem:[#allocation23_spill] sm:$0xff] }
 0x3b0   :  { %v7445_v14 = vpop.eup %7444 }
 0x3b1   :  { %v1684_v24 = vmul.f32 %v7445_v14, %v7443_v6  ;;  %v9794_v14 = vld [vmem:[#allocation21_spill] sm:$0xff] }
 0x3b3   :  { %v7447_v2 = vpop.eup %7446  ;;  %v1710_v3 = vrot.slane %v1684_v24, 4  ;;  %1790 = vmatmul.mubr.f32.vlgmr.msra.gmra.mrb[20].mxu0 %v1684_v24  ;;  %1861 = vmatmul.mubr.f32.vlgmr.msra.gmra.mrb[20].mxu1 %v1684_v24  ;;  %v9797_v24 = vld [vmem:[#allocation24_spill] sm:$0xff] }
 0x3b4   :  { %v7449_v13 = vpop.eup %7448  ;;  %v1688_v54 = vadd.f32 1.0, %v7447_v2  ;;  %6089 = vmatpush1.bf16.msra.mxu0 %v8306_v36  ;;  %6121 = vmatpush1.bf16.msra.mxu1 %v8310_v37  ;;  %v9798_v2 = vld [vmem:[#allocation25_spill] sm:$0xff] }
 0x3b5   :  { %v1694_v26 = vadd.f32 1.0, %v7449_v13  ;;  %1712 = vst [vmem:[#allocation2] sm:$0x30] %v1710_v3  ;;  %6091 = vmatprep.subr.bf16.mxu0 %v8312_v38  ;;  %6123 = vmatprep.subr.bf16.mxu1 %v8315_v49  ;;  %v7451_v51 = vpop.eup %7450  ;;  %v9799_v3 = vld [vmem:[#allocation26_spill] sm:$0xff]  ;;  %v9800_v13 = vld [vmem:[#allocation27_spill] sm:$0xff] }
 0x3b6   :  { %7454 = vrcp.f32 %v1688_v54  ;;  %1931 = vmatprep.mubr.f32.mxu0 %v9717_v9  ;;  %2002 = vmatprep.mubr.f32.mxu1 %v9717_v9  ;;  %v7453_v8 = vpop.eup %7452  ;;  %v1701_v16 = vadd.f32 1.0, %v7451_v51  ;;  %v9801_v54 = vld [vmem:[#allocation28_spill] sm:$0xff]  ;;  %v9803_v51 = vld [vmem:[#allocation30_spill] sm:$0xff] }
 0x3b7   :  { %7456 = vrcp.f32 %v1694_v26  ;;  %v9802_v26 = vld [vmem:[#allocation29_spill] sm:$0xff] }
 0x3b8   :  { %6093 = vmatpush1.bf16.msra.mxu0 %v8318_v63  ;;  %6125 = vmatpush1.bf16.msra.mxu1 %v8322_v1  ;;  %7458 = vrcp.f32 %v1701_v16  ;;  %v9808_v16 = vld [vmem:[#allocation35_spill] sm:$0xff] }
 0x3b9   :  { %6095 = vmatprep.subr.bf16.mxu0 %v8324_v5  ;;  %6127 = vmatprep.subr.bf16.mxu1 %v8327_v11 }
 0x3bc   :  { %6097 = vmatpush1.bf16.msra.mxu0 %v8332_v25  ;;  %6129 = vmatpush1.bf16.msra.mxu1 %v9733_v33 }
 0x3bd   :  { %6099 = vmatprep.subr.bf16.mxu0 %v9734_v18  ;;  %6131 = vmatprep.subr.bf16.mxu1 %v9735_v34 }
 0x3c0   :  { %v7455_v20 = vpop.eup %7454  ;;  %6101 = vmatpush1.bf16.msra.mxu0 %v9736_v12  ;;  %6133 = vmatpush1.bf16.msra.mxu1 %v9737_v60 }
 0x3c1   :  { %v7457_v4 = vpop.eup %7456  ;;  %v1705_v53 = vmul.f32 %v7455_v20, %v7453_v8  ;;  %6103 = vmatprep.subr.bf16.mxu0 %v9738_v57  ;;  %6135 = vmatprep.subr.bf16.mxu1 %v9739_v15  ;;  %v9804_v8 = vld [vmem:[#allocation31_spill] sm:$0xff]  ;;  %v9805_v20 = vld [vmem:[#allocation32_spill] sm:$0xff] }
 0x3c2   :  { %v1704_v44 = vmul.f32 %v7457_v4, %v8610_v56  ;;  %v7459_v56 = vpop.eup %7458  ;;  %v9806_v4 = vld [vmem:[#allocation33_spill] sm:$0xff] }
 0x3c4   :  { %v8694_v59 = vadd.f32 %v1705_v53, %v1704_v44  ;;  %6105 = vmatpush1.bf16.msra.mxu0 %v9740_v52  ;;  %6137 = vmatpush1.bf16.msra.mxu1 %v9741_v23  ;;  %v9807_v53 = vld [vmem:[#allocation34_spill] sm:$0xff]  ;;  %v9809_v44 = vld [vmem:[#allocation36_spill] sm:$0xff] }
 0x3c5   :  { %6107 = vmatprep.subr.bf16.mxu0 %v8362_v48  ;;  %6139 = vmatprep.subr.bf16.mxu1 %v9742_v50 }
 0x3c6   :  { %7460 = vtanh.f32 %v8694_v59 }
 0x3c8   :  { %6109 = vmatpush1.bf16.msra.mxu0 %v8368_v7  ;;  %6141 = vmatpush1.bf16.msra.mxu1 %v8372_v0 }
 0x3c9   :  { %6111 = vmatprep.subr.bf16.mxu0 %v8374_v19  ;;  %6143 = vmatprep.subr.bf16.mxu1 %v8377_v35 }
 0x3cc   :  { %6113 = vmatpush1.bf16.msra.mxu0 %v8380_v39  ;;  %6145 = vmatpush1.bf16.msra.mxu1 %v8384_v31 }
 0x3cd   :  { %6115 = vmatprep.subr.bf16.mxu0 %v8386_v46  ;;  %6147 = vmatprep.subr.bf16.mxu1 %v8389_v10 }
 0x3d0   :  { %v7461_v55 = vpop.eup %7460  ;;  %6117 = vmatpush1.bf16.msra.mxu0 %v8392_v22  ;;  %6149 = vmatpush1.bf16.msra.mxu1 %v8396_v21 }
 0x3d1   :  { %v1708_v6 = vmul.f32 %v7461_v55, %v7459_v56  ;;  %6151 = vmatprep.subr.bf16.mxu0 %v8189_v29  ;;  %6183 = vmatprep.subr.bf16.mxu1 %v8192_v32  ;;  %v9810_v56 = vld [vmem:[#allocation37_spill] sm:$0xff]  ;;  %v9811_v55 = vld [vmem:[#allocation38_spill] sm:$0xff] }
 0x3d3   :  { %v1714_v61 = vrot.slane %v1708_v6, 6  ;;  %1932 = vmatmul.mubr.f32.vlgmr.msra.gmra.mrb[22].mxu0 %v1708_v6  ;;  %2003 = vmatmul.mubr.f32.vlgmr.msra.gmra.mrb[22].mxu1 %v1708_v6  ;;  %v9812_v6 = vld [vmem:[#allocation39_spill] sm:$0xff] }
 0x3d4   :  { %6153 = vmatpush1.bf16.msra.mxu0 %v8201_v41  ;;  %6185 = vmatpush1.bf16.msra.mxu1 %v8204_v42 }
 0x3d5   :  { %1716 = vst [vmem:[#allocation2 + $0x18] sm:$0xc] %v1714_v61  ;;  %6155 = vmatprep.subr.bf16.mxu0 %v8206_v43  ;;  %6187 = vmatprep.subr.bf16.mxu1 %v8208_v47  ;;  %v9813_v61 = vld [vmem:[#allocation40_spill] sm:$0xff] }
 0x3d6   :  { %2126 = vmatprep.mubr.f32.mxu0 %v9717_v9  ;;  %2197 = vmatprep.mubr.f32.mxu1 %v9717_v9 }
 0x3d8   :  { %6157 = vmatpush1.bf16.msra.mxu0 %v9794_v14  ;;  %6189 = vmatpush1.bf16.msra.mxu1 %v9795_v58 }
 0x3d9   :  { %6159 = vmatprep.subr.bf16.mxu0 %v9796_v17  ;;  %6191 = vmatprep.subr.bf16.mxu1 %v9797_v24 }
 0x3dc   :  { %6161 = vmatpush1.bf16.msra.mxu0 %v9798_v2  ;;  %6193 = vmatpush1.bf16.msra.mxu1 %v9799_v3 }
 0x3dd   :  { %6163 = vmatprep.subr.bf16.mxu0 %v9800_v13  ;;  %6195 = vmatprep.subr.bf16.mxu1 %v9801_v54  ;;  %v9824_v13 = vld [vmem:[#allocation70_spill] sm:$0xff] }
 0x3e0   :  { %6165 = vmatpush1.bf16.msra.mxu0 %v9802_v26  ;;  %6197 = vmatpush1.bf16.msra.mxu1 %v9803_v51  ;;  %v9814_v51 = vld [vmem:[#allocation41_spill] sm:$0xff] }
 0x3e1   :  { %6167 = vmatprep.subr.bf16.mxu0 %v9804_v8  ;;  %6199 = vmatprep.subr.bf16.mxu1 %v9805_v20  ;;  %v9815_v8 = vld [vmem:[#allocation42_spill] sm:$0xff]  ;;  %v9816_v20 = vld [vmem:[#allocation43_spill] sm:$0xff]  ;;  %v9823_v26 = vld [vmem:[#allocation69_spill] sm:$0xff] }
 0x3e4   :  { %6169 = vmatpush1.bf16.msra.mxu0 %v9806_v4  ;;  %6201 = vmatpush1.bf16.msra.mxu1 %v9807_v53  ;;  %v9817_v4 = vld [vmem:[#allocation44_spill] sm:$0xff]  ;;  %v9818_v53 = vld [vmem:[#allocation45_spill] sm:$0xff] }
 0x3e5   :  { %6171 = vmatprep.subr.bf16.mxu0 %v9808_v16  ;;  %6203 = vmatprep.subr.bf16.mxu1 %v9809_v44  ;;  %v9819_v16 = vld [vmem:[#allocation46_spill] sm:$0xff]  ;;  %v9820_v44 = vld [vmem:[#allocation47_spill] sm:$0xff] }
 0x3e8   :  { %6173 = vmatpush1.bf16.msra.mxu0 %v9810_v56  ;;  %6205 = vmatpush1.bf16.msra.mxu1 %v9811_v55  ;;  %v9821_v56 = vld [vmem:[#allocation48_spill] sm:$0xff] }
 0x3e9   :  { %6175 = vmatprep.subr.bf16.mxu0 %v9812_v6  ;;  %6207 = vmatprep.subr.bf16.mxu1 %v9813_v61  ;;  %v9822_v55 = vld [vmem:[#allocation68_spill] sm:$0xff]  ;;  %v1719_v61 = vrot.slane %v9823_v26, 6 }
 0x3ea   :  { %v1717_v6 = vrot.slane %v9822_v55, 6 }
 0x3ec   :  { %6177 = vmatpush1.bf16.msra.mxu0 %v9814_v51  ;;  %6209 = vmatpush1.bf16.msra.mxu1 %v9815_v8  ;;  %v1718_v8 = vrot.slane %v8482_v62, 6 }
 0x3ed   :  { %6179 = vmatprep.subr.bf16.mxu0 %v9816_v20  ;;  %6211 = vmatprep.subr.bf16.mxu1 %v9817_v4  ;;  %v1720_v20 = vrot.slane %v9824_v13, 6 }
 0x3f0   :  { %6181 = vmatpush1.bf16.msra.mxu0 %v9818_v53  ;;  %6213 = vmatpush1.bf16.msra.mxu1 %v9819_v16 }
 0x3f1   :  { %6215 = vmatprep.subr.bf16.mxu0 %v9820_v44  ;;  %6247 = vmatprep.subr.bf16.mxu1 %v9821_v56 }
 0x486   :  { %v1791_v54 = vpop.f32.mrb[20].mxu0  ;;  %v1862_v51 = vpop.f32.mrb[20].mxu1 }
 0x487   :  { %v1792_v3 = vadd.f32 %v1791_v54, %v1717_v6  ;;  %v1863_v4 = vadd.f32 %v1862_v51, %v1719_v61  ;;  %v1793_v2 = vpop.f32.mrb[21].mxu0  ;;  %v1864_v53 = vpop.f32.mrb[21].mxu1 }
 0x488   :  { %v1794_v24 = vadd.f32 %v1793_v2, %v1718_v8  ;;  %v1865_v16 = vadd.f32 %v1864_v53, %v1720_v20 }
 0x489   :  { %v5462_v17 = vmul.f32 -1.442695, %v1792_v3 }
 0x48a   :  { %v5463_v44 = vmul.f32 -1.442695, %v1794_v24  ;;  %v5464_v56 = vmul.f32 -1.442695, %v1865_v16 }
 0x48b   :  { %7462 = vpow2.f32 %v5462_v17 }
 0x48c   :  { %7464 = vpow2.f32 %v5463_v44 }
 0x48d   :  { %7466 = vpow2.f32 %v5464_v56 }
 0x48e   :  { %7468 = vtanh.f32 %v1863_v4 }
 0x495   :  { %v7463_v55 = vpop.eup %7462 }
 0x496   :  { %v7465_v58 = vpop.eup %7464  ;;  %v2012_v26 = vadd.f32 1.0, %v7463_v55 }
 0x497   :  { %v2018_v14 = vadd.f32 1.0, %v7465_v58  ;;  %v7467_v62 = vpop.eup %7466 }
 0x498   :  { %7470 = vrcp.f32 %v2012_v26  ;;  %v7469_v13 = vpop.eup %7468  ;;  %v2025_v2 = vadd.f32 1.0, %v7467_v62 }
 0x499   :  { %7472 = vrcp.f32 %v2018_v14 }
 0x49a   :  { %7474 = vrcp.f32 %v2025_v2 }
 0x4a2   :  { %v7471_v54 = vpop.eup %7470 }
 0x4a3   :  { %v7473_v51 = vpop.eup %7472  ;;  %v2029_v6 = vmul.f32 %v7471_v54, %v7469_v13 }
 0x4a4   :  { %v2028_v3 = vmul.f32 %v7473_v51, %v8669_v45  ;;  %v7475_v45 = vpop.eup %7474 }
 0x4a6   :  { %v8752_v24 = vadd.f32 %v2029_v6, %v2028_v3  ;;  %v1933_v17 = vpop.f32.mrb[22].mxu0  ;;  %v2004_v8 = vpop.f32.mrb[22].mxu1 }
 0x4a7   :  { %v1934_v20 = vadd.f32 %v1933_v17, %v8492_v30  ;;  %v1935_v53 = vpop.f32.mrb[23].mxu0  ;;  %v2006_v4 = vpop.f32.mrb[23].mxu1  ;;  %v2005_v55 = vadd.f32 %v2004_v8, %v8505_v40 }
 0x4a8   :  { %v1936_v58 = vadd.f32 %v1935_v53, %v8494_v27  ;;  %7476 = vtanh.f32 %v8752_v24  ;;  %v2007_v44 = vadd.f32 %v2006_v4, %v8500_v28  ;;  %v9825_v4 = vld [vmem:[#allocation21_spill] sm:$0xff] }
 0x4a9   :  { %v5465_v14 = vmul.f32 -1.442695, %v1934_v20 }
 0x4aa   :  { %v5466_v16 = vmul.f32 -1.442695, %v1936_v58  ;;  %v5467_v61 = vmul.f32 -1.442695, %v2007_v44  ;;  %v9826_v58 = vld [vmem:[#allocation22_spill] sm:$0xff]  ;;  %v9829_v44 = vld [vmem:[#allocation25_spill] sm:$0xff] }
 0x4ab   :  { %7478 = vpow2.f32 %v5465_v14  ;;  %v9827_v14 = vld [vmem:[#allocation23_spill] sm:$0xff] }
 0x4ac   :  { %7480 = vpow2.f32 %v5466_v16  ;;  %v9828_v16 = vld [vmem:[#allocation24_spill] sm:$0xff] }
 0x4ad   :  { %7482 = vpow2.f32 %v5467_v61  ;;  %v9832_v61 = vld [vmem:[#allocation28_spill] sm:$0xff] }
 0x4ae   :  { %7484 = vtanh.f32 %v2005_v55  ;;  %v9833_v55 = vld [vmem:[#allocation29_spill] sm:$0xff] }
 0x4b2   :  { %v7477_v56 = vpop.eup %7476 }
 0x4b3   :  { %v2032_v26 = vmul.f32 %v7477_v56, %v7475_v45  ;;  %v9830_v45 = vld [vmem:[#allocation26_spill] sm:$0xff]  ;;  %v9831_v56 = vld [vmem:[#allocation27_spill] sm:$0xff] }
 0x4b5   :  { %v7479_v62 = vpop.eup %7478  ;;  %v2058_v30 = vrot.slane %v2032_v26, 2  ;;  %2127 = vmatmul.mubr.f32.vlgmr.msra.gmra.mrb[24].mxu0 %v2032_v26  ;;  %2198 = vmatmul.mubr.f32.vlgmr.msra.gmra.mrb[24].mxu1 %v2032_v26  ;;  %v9834_v26 = vld [vmem:[#allocation30_spill] sm:$0xff] }
 0x4b6   :  { %v7481_v13 = vpop.eup %7480  ;;  %v2036_v27 = vadd.f32 1.0, %v7479_v62  ;;  %6217 = vmatpush1.bf16.msra.mxu0 %v8306_v36  ;;  %6249 = vmatpush1.bf16.msra.mxu1 %v8310_v37  ;;  %v9835_v62 = vld [vmem:[#allocation31_spill] sm:$0xff] }
 0x4b7   :  { %v2042_v54 = vadd.f32 1.0, %v7481_v13  ;;  %2060 = vst [vmem:[#allocation2] sm:$0xc0] %v2058_v30  ;;  %6219 = vmatprep.subr.bf16.mxu0 %v8312_v38  ;;  %6251 = vmatprep.subr.bf16.mxu1 %v8315_v49  ;;  %v7483_v28 = vpop.eup %7482  ;;  %v9836_v30 = vld [vmem:[#allocation32_spill] sm:$0xff]  ;;  %v9837_v13 = vld [vmem:[#allocation33_spill] sm:$0xff] }
 0x4b8   :  { %7486 = vrcp.f32 %v2036_v27  ;;  %2280 = vmatprep.mubr.f32.mxu0 %v9717_v9  ;;  %2351 = vmatprep.mubr.f32.mxu1 %v9717_v9  ;;  %v7485_v40 = vpop.eup %7484  ;;  %v2049_v3 = vadd.f32 1.0, %v7483_v28  ;;  %v9838_v27 = vld [vmem:[#allocation34_spill] sm:$0xff]  ;;  %v9840_v28 = vld [vmem:[#allocation36_spill] sm:$0xff] }
 0x4b9   :  { %7488 = vrcp.f32 %v2042_v54  ;;  %v9839_v54 = vld [vmem:[#allocation35_spill] sm:$0xff] }
 0x4ba   :  { %6221 = vmatpush1.bf16.msra.mxu0 %v8318_v63  ;;  %6253 = vmatpush1.bf16.msra.mxu1 %v8322_v1  ;;  %7490 = vrcp.f32 %v2049_v3  ;;  %v9845_v3 = vld [vmem:[#allocation41_spill] sm:$0xff] }
 0x4bb   :  { %6223 = vmatprep.subr.bf16.mxu0 %v8324_v5  ;;  %6255 = vmatprep.subr.bf16.mxu1 %v8327_v11 }
 0x4be   :  { %6225 = vmatpush1.bf16.msra.mxu0 %v8332_v25  ;;  %6257 = vmatpush1.bf16.msra.mxu1 %v9733_v33 }
 0x4bf   :  { %6227 = vmatprep.subr.bf16.mxu0 %v9734_v18  ;;  %6259 = vmatprep.subr.bf16.mxu1 %v9735_v34 }
 0x4c2   :  { %v7487_v51 = vpop.eup %7486  ;;  %6229 = vmatpush1.bf16.msra.mxu0 %v9736_v12  ;;  %6261 = vmatpush1.bf16.msra.mxu1 %v9737_v60 }
 0x4c3   :  { %v7489_v6 = vpop.eup %7488  ;;  %v2053_v2 = vmul.f32 %v7487_v51, %v7485_v40  ;;  %6231 = vmatprep.subr.bf16.mxu0 %v9738_v57  ;;  %6263 = vmatprep.subr.bf16.mxu1 %v9739_v15  ;;  %v9841_v40 = vld [vmem:[#allocation37_spill] sm:$0xff]  ;;  %v9842_v51 = vld [vmem:[#allocation38_spill] sm:$0xff] }
 0x4c4   :  { %v2052_v17 = vmul.f32 %v7489_v6, %v8694_v59  ;;  %v7491_v59 = vpop.eup %7490  ;;  %v9843_v6 = vld [vmem:[#allocation39_spill] sm:$0xff] }
 0x4c6   :  { %v8778_v8 = vadd.f32 %v2053_v2, %v2052_v17  ;;  %6233 = vmatpush1.bf16.msra.mxu0 %v9740_v52  ;;  %6265 = vmatpush1.bf16.msra.mxu1 %v9741_v23  ;;  %v9844_v2 = vld [vmem:[#allocation40_spill] sm:$0xff]  ;;  %v9846_v17 = vld [vmem:[#allocation42_spill] sm:$0xff] }
 0x4c7   :  { %6235 = vmatprep.subr.bf16.mxu0 %v8362_v48  ;;  %6267 = vmatprep.subr.bf16.mxu1 %v9742_v50 }
 0x4c8   :  { %7492 = vtanh.f32 %v8778_v8 }
 0x4ca   :  { %6237 = vmatpush1.bf16.msra.mxu0 %v8368_v7  ;;  %6269 = vmatpush1.bf16.msra.mxu1 %v8372_v0 }
 0x4cb   :  { %6239 = vmatprep.subr.bf16.mxu0 %v8374_v19  ;;  %6271 = vmatprep.subr.bf16.mxu1 %v8377_v35 }
 0x4ce   :  { %6241 = vmatpush1.bf16.msra.mxu0 %v8380_v39  ;;  %6273 = vmatpush1.bf16.msra.mxu1 %v8384_v31 }
 0x4cf   :  { %6243 = vmatprep.subr.bf16.mxu0 %v8386_v46  ;;  %6275 = vmatprep.subr.bf16.mxu1 %v8389_v10 }
 0x4d2   :  { %v7493_v20 = vpop.eup %7492  ;;  %6245 = vmatpush1.bf16.msra.mxu0 %v8392_v22  ;;  %6277 = vmatpush1.bf16.msra.mxu1 %v8396_v21 }
 0x4d3   :  { %v2056_v53 = vmul.f32 %v7493_v20, %v7491_v59  ;;  %6279 = vmatprep.subr.bf16.mxu0 %v8189_v29  ;;  %6311 = vmatprep.subr.bf16.mxu1 %v8192_v32  ;;  %v9847_v59 = vld [vmem:[#allocation43_spill] sm:$0xff]  ;;  %v9848_v20 = vld [vmem:[#allocation44_spill] sm:$0xff] }
 0x4d5   :  { %2061 = vst [vmem:[#allocation2 + $0x18] sm:$0x3] %v2056_v53  ;;  %2281 = vmatmul.mubr.f32.vlgmr.msra.gmra.mrb[26].mxu0 %v2056_v53  ;;  %2352 = vmatmul.mubr.f32.vlgmr.msra.gmra.mrb[26].mxu1 %v2056_v53  ;;  %v9849_v53 = vld [vmem:[#allocation45_spill] sm:$0xff] }
 0x4d6   :  { %6281 = vmatpush1.bf16.msra.mxu0 %v8201_v41  ;;  %6313 = vmatpush1.bf16.msra.mxu1 %v8204_v42 }
 0x4d7   :  { %6283 = vmatprep.subr.bf16.mxu0 %v8206_v43  ;;  %6315 = vmatprep.subr.bf16.mxu1 %v8208_v47 }
 0x4d8   :  { %2487 = vmatprep.mubr.f32.mxu0 %v9717_v9  ;;  %2558 = vmatprep.mubr.f32.mxu1 %v9717_v9 }
 0x4da   :  { %6285 = vmatpush1.bf16.msra.mxu0 %v9825_v4  ;;  %6317 = vmatpush1.bf16.msra.mxu1 %v9826_v58 }
 0x4db   :  { %6287 = vmatprep.subr.bf16.mxu0 %v9827_v14  ;;  %6319 = vmatprep.subr.bf16.mxu1 %v9828_v16 }
 0x4de   :  { %6289 = vmatpush1.bf16.msra.mxu0 %v9829_v44  ;;  %6321 = vmatpush1.bf16.msra.mxu1 %v9830_v45 }
 0x4df   :  { %6291 = vmatprep.subr.bf16.mxu0 %v9831_v56  ;;  %6323 = vmatprep.subr.bf16.mxu1 %v9832_v61 }
 0x4e2   :  { %6293 = vmatpush1.bf16.msra.mxu0 %v9833_v55  ;;  %6325 = vmatpush1.bf16.msra.mxu1 %v9834_v26 }
 0x4e3   :  { %6295 = vmatprep.subr.bf16.mxu0 %v9835_v62  ;;  %6327 = vmatprep.subr.bf16.mxu1 %v9836_v30  ;;  %v9854_v30 = vld [vmem:[#allocation61_spill] sm:$0xff] }
 0x4e6   :  { %6297 = vmatpush1.bf16.msra.mxu0 %v9837_v13  ;;  %6329 = vmatpush1.bf16.msra.mxu1 %v9838_v27  ;;  %v9853_v27 = vld [vmem:[#allocation60_spill] sm:$0xff] }
 0x4e7   :  { %6299 = vmatprep.subr.bf16.mxu0 %v9839_v54  ;;  %6331 = vmatprep.subr.bf16.mxu1 %v9840_v28  ;;  %v9850_v54 = vld [vmem:[#allocation46_spill] sm:$0xff]  ;;  %v9851_v28 = vld [vmem:[#allocation47_spill] sm:$0xff] }
 0x4ea   :  { %6301 = vmatpush1.bf16.msra.mxu0 %v9841_v40  ;;  %6333 = vmatpush1.bf16.msra.mxu1 %v9842_v51  ;;  %v9852_v40 = vld [vmem:[#allocation48_spill] sm:$0xff] }
 0x4eb   :  { %6303 = vmatprep.subr.bf16.mxu0 %v9843_v6  ;;  %6335 = vmatprep.subr.bf16.mxu1 %v9844_v2 }
 0x4ee   :  { %6305 = vmatpush1.bf16.msra.mxu0 %v9845_v3  ;;  %6337 = vmatpush1.bf16.msra.mxu1 %v9846_v17 }
 0x4ef   :  { %6307 = vmatprep.subr.bf16.mxu0 %v9847_v59  ;;  %6339 = vmatprep.subr.bf16.mxu1 %v9848_v20  ;;  %v9855_v20 = vld [vmem:[#allocation63_spill] sm:$0xff] }
 0x4f2   :  { %6309 = vmatpush1.bf16.msra.mxu0 %v9849_v53  ;;  %6341 = vmatpush1.bf16.msra.mxu1 %v9850_v54  ;;  %v9856_v54 = vld [vmem:[#allocation62_spill] sm:$0xff] }
 0x4f3   :  { %6343 = vmatprep.subr.bf16.mxu0 %v9851_v28  ;;  %6375 = vmatprep.subr.bf16.mxu1 %v9852_v40 }
 0x588   :  { %v2128_v51 = vpop.f32.mrb[24].mxu0  ;;  %v2199_v6 = vpop.f32.mrb[24].mxu1 }
 0x589   :  { %v2129_v2 = vadd.f32 %v2128_v51, %v9853_v27  ;;  %v2130_v13 = vpop.f32.mrb[25].mxu0  ;;  %v2201_v3 = vpop.f32.mrb[25].mxu1  ;;  %v2200_v55 = vadd.f32 %v2199_v6, %v9856_v54 }
 0x58a   :  { %v2131_v17 = vadd.f32 %v2130_v13, %v9854_v30  ;;  %v2202_v53 = vadd.f32 %v2201_v3, %v9855_v20  ;;  %v9857_v3 = vld [vmem:[#allocation64_spill] sm:$0xff] }
 0x58b   :  { %v5468_v62 = vmul.f32 -1.442695, %v2129_v2 }
 0x58c   :  { %v5469_v59 = vmul.f32 -1.442695, %v2131_v17  ;;  %v5470_v26 = vmul.f32 -1.442695, %v2202_v53  ;;  %v2208_v53 = vrot.slane %v9857_v3, 6 }
 0x58d   :  { %7494 = vpow2.f32 %v5468_v62 }
 0x58e   :  { %7496 = vpow2.f32 %v5469_v59 }
 0x58f   :  { %7498 = vpow2.f32 %v5470_v26 }
 0x590   :  { %7500 = vtanh.f32 %v2200_v55 }
 0x597   :  { %v7495_v28 = vpop.eup %7494 }
 0x598   :  { %v7497_v61 = vpop.eup %7496  ;;  %v2361_v40 = vadd.f32 1.0, %v7495_v28  ;;  %v9858_v28 = vld [vmem:[#allocation65_spill] sm:$0xff] }
 0x599   :  { %v2367_v56 = vadd.f32 1.0, %v7497_v61  ;;  %v7499_v51 = vpop.eup %7498  ;;  %v2209_v26 = vrot.slane %v9858_v28, 6 }
 0x59a   :  { %7502 = vrcp.f32 %v2361_v40  ;;  %v7501_v27 = vpop.eup %7500  ;;  %v2374_v62 = vadd.f32 1.0, %v7499_v51 }
 0x59b   :  { %7504 = vrcp.f32 %v2367_v56 }
 0x59c   :  { %7506 = vrcp.f32 %v2374_v62 }
 0x5a4   :  { %v7503_v13 = vpop.eup %7502 }
 0x5a5   :  { %v7505_v2 = vpop.eup %7504  ;;  %v2378_v17 = vmul.f32 %v7503_v13, %v7501_v27 }
 0x5a6   :  { %v2377_v59 = vmul.f32 %v7505_v2, %v8752_v24  ;;  %v9859_v24 = vld [vmem:[#allocation67_spill] sm:$0xff]  ;;  %v7507_v2 = vpop.eup %7506 }
 0x5a7   :  { %v2211_v51 = vrot.slane %v9859_v24, 6 }
 0x5a8   :  { %v8837_v20 = vadd.f32 %v2378_v17, %v2377_v59  ;;  %v2282_v6 = vpop.f32.mrb[26].mxu0  ;;  %v2353_v54 = vpop.f32.mrb[26].mxu1  ;;  %v9860_v17 = vld [vmem:[#allocation66_spill] sm:$0xff] }
 0x5a9   :  { %v2283_v61 = vadd.f32 %v2282_v6, %v2208_v53  ;;  %v2284_v55 = vpop.f32.mrb[27].mxu0  ;;  %v2355_v56 = vpop.f32.mrb[27].mxu1  ;;  %v2210_v59 = vrot.slane %v9860_v17, 6 }
 0x5aa   :  { %v2285_v40 = vadd.f32 %v2284_v55, %v2209_v26  ;;  %7508 = vtanh.f32 %v8837_v20  ;;  %v2356_v13 = vadd.f32 %v2355_v56, %v2211_v51 }
 0x5ab   :  { %v5471_v30 = vmul.f32 -1.442695, %v2283_v61  ;;  %v2354_v28 = vadd.f32 %v2353_v54, %v2210_v59  ;;  %v9862_v59 = vld [vmem:[#allocation27_spill] sm:$0xff] }
 0x5ac   :  { %v5472_v27 = vmul.f32 -1.442695, %v2285_v40  ;;  %v5473_v45 = vmul.f32 -1.442695, %v2356_v13 }
 0x5ad   :  { %7510 = vpow2.f32 %v5471_v30 }
 0x5ae   :  { %7512 = vpow2.f32 %v5472_v27 }
 0x5af   :  { %7514 = vpow2.f32 %v5473_v45 }
 0x5b0   :  { %7516 = vtanh.f32 %v2354_v28 }
 0x5b4   :  { %v7509_v3 = vpop.eup %7508 }
 0x5b5   :  { %v2381_v62 = vmul.f32 %v7509_v3, %v7507_v2  ;;  %v9861_v2 = vld [vmem:[#allocation26_spill] sm:$0xff] }
 0x5b7   :  { %v7511_v53 = vpop.eup %7510  ;;  %2406 = vst [vmem:[#allocation2 + $0x10] sm:$0x3] %v2381_v62  ;;  %2488 = vmatmul.mubr.f32.vlgmr.msra.gmra.mrb[28].mxu0 %v2381_v62  ;;  %2559 = vmatmul.mubr.f32.vlgmr.msra.gmra.mrb[28].mxu1 %v2381_v62  ;;  %v9863_v62 = vld [vmem:[#allocation28_spill] sm:$0xff] }
 0x5b8   :  { %v7513_v6 = vpop.eup %7512  ;;  %v2385_v26 = vadd.f32 1.0, %v7511_v53  ;;  %6345 = vmatpush1.bf16.msra.mxu0 %v8306_v36  ;;  %6377 = vmatpush1.bf16.msra.mxu1 %v8310_v37  ;;  %v9864_v53 = vld [vmem:[#allocation29_spill] sm:$0xff] }
 0x5b9   :  { %v2391_v30 = vadd.f32 1.0, %v7513_v6  ;;  %6347 = vmatprep.subr.bf16.mxu0 %v8312_v38  ;;  %6379 = vmatprep.subr.bf16.mxu1 %v8315_v49  ;;  %v7515_v45 = vpop.eup %7514  ;;  %v9865_v6 = vld [vmem:[#allocation30_spill] sm:$0xff] }
 0x5ba   :  { %7518 = vrcp.f32 %v2385_v26  ;;  %2637 = vmatprep.mubr.f32.mxu0 %v9717_v9  ;;  %2708 = vmatprep.mubr.f32.mxu1 %v9717_v9  ;;  %v7517_v54 = vpop.eup %7516  ;;  %v2398_v55 = vadd.f32 1.0, %v7515_v45  ;;  %v9866_v26 = vld [vmem:[#allocation31_spill] sm:$0xff]  ;;  %v9868_v45 = vld [vmem:[#allocation33_spill] sm:$0xff] }
 0x5bb   :  { %7520 = vrcp.f32 %v2391_v30  ;;  %v9867_v30 = vld [vmem:[#allocation32_spill] sm:$0xff] }
 0x5bc   :  { %6349 = vmatpush1.bf16.msra.mxu0 %v8318_v63  ;;  %6381 = vmatpush1.bf16.msra.mxu1 %v8322_v1  ;;  %7522 = vrcp.f32 %v2398_v55  ;;  %v9873_v55 = vld [vmem:[#allocation38_spill] sm:$0xff] }
 0x5bd   :  { %6351 = vmatprep.subr.bf16.mxu0 %v8324_v5  ;;  %6383 = vmatprep.subr.bf16.mxu1 %v8327_v11 }
 0x5c0   :  { %6353 = vmatpush1.bf16.msra.mxu0 %v8332_v25  ;;  %6385 = vmatpush1.bf16.msra.mxu1 %v9733_v33 }
 0x5c1   :  { %6355 = vmatprep.subr.bf16.mxu0 %v9734_v18  ;;  %6387 = vmatprep.subr.bf16.mxu1 %v9735_v34 }
 0x5c4   :  { %v7519_v3 = vpop.eup %7518  ;;  %6357 = vmatpush1.bf16.msra.mxu0 %v9736_v12  ;;  %6389 = vmatpush1.bf16.msra.mxu1 %v9737_v60 }
 0x5c5   :  { %v7521_v28 = vpop.eup %7520  ;;  %v2402_v61 = vmul.f32 %v7519_v3, %v7517_v54  ;;  %6359 = vmatprep.subr.bf16.mxu0 %v9738_v57  ;;  %6391 = vmatprep.subr.bf16.mxu1 %v9739_v15  ;;  %v9869_v54 = vld [vmem:[#allocation34_spill] sm:$0xff]  ;;  %v9870_v3 = vld [vmem:[#allocation35_spill] sm:$0xff] }
 0x5c6   :  { %v2401_v56 = vmul.f32 %v7521_v28, %v8778_v8  ;;  %v7523_v8 = vpop.eup %7522  ;;  %v9871_v28 = vld [vmem:[#allocation36_spill] sm:$0xff] }
 0x5c8   :  { %v8862_v40 = vadd.f32 %v2402_v61, %v2401_v56  ;;  %6361 = vmatpush1.bf16.msra.mxu0 %v9740_v52  ;;  %6393 = vmatpush1.bf16.msra.mxu1 %v9741_v23  ;;  %v9872_v61 = vld [vmem:[#allocation37_spill] sm:$0xff]  ;;  %v9874_v56 = vld [vmem:[#allocation39_spill] sm:$0xff] }
 0x5c9   :  { %6363 = vmatprep.subr.bf16.mxu0 %v8362_v48  ;;  %6395 = vmatprep.subr.bf16.mxu1 %v9742_v50 }
 0x5ca   :  { %7524 = vtanh.f32 %v8862_v40 }
 0x5cc   :  { %6365 = vmatpush1.bf16.msra.mxu0 %v8368_v7  ;;  %6397 = vmatpush1.bf16.msra.mxu1 %v8372_v0 }
 0x5cd   :  { %6367 = vmatprep.subr.bf16.mxu0 %v8374_v19  ;;  %6399 = vmatprep.subr.bf16.mxu1 %v8377_v35 }
 0x5d0   :  { %6369 = vmatpush1.bf16.msra.mxu0 %v8380_v39  ;;  %6401 = vmatpush1.bf16.msra.mxu1 %v8384_v31 }
 0x5d1   :  { %6371 = vmatprep.subr.bf16.mxu0 %v8386_v46  ;;  %6403 = vmatprep.subr.bf16.mxu1 %v8389_v10 }
 0x5d4   :  { %v7525_v27 = vpop.eup %7524  ;;  %6373 = vmatpush1.bf16.msra.mxu0 %v8392_v22  ;;  %6405 = vmatpush1.bf16.msra.mxu1 %v8396_v21 }
 0x5d5   :  { %v2405_v51 = vmul.f32 %v7525_v27, %v7523_v8  ;;  %6407 = vmatprep.subr.bf16.mxu0 %v8189_v29  ;;  %6439 = vmatprep.subr.bf16.mxu1 %v8192_v32  ;;  %v9875_v8 = vld [vmem:[#allocation40_spill] sm:$0xff]  ;;  %v9876_v27 = vld [vmem:[#allocation41_spill] sm:$0xff] }
 0x5d7   :  { %v2408_v13 = vrot.slane %v2405_v51, 2  ;;  %2638 = vmatmul.mubr.f32.vlgmr.msra.gmra.mrb[30].mxu0 %v2405_v51  ;;  %2709 = vmatmul.mubr.f32.vlgmr.msra.gmra.mrb[30].mxu1 %v2405_v51  ;;  %v9877_v51 = vld [vmem:[#allocation42_spill] sm:$0xff] }
 0x5d8   :  { %6409 = vmatpush1.bf16.msra.mxu0 %v8201_v41  ;;  %6441 = vmatpush1.bf16.msra.mxu1 %v8204_v42 }
 0x5d9   :  { %2410 = vst [vmem:[#allocation2 + $0x8] sm:$0xc0] %v2408_v13  ;;  %6411 = vmatprep.subr.bf16.mxu0 %v8206_v43  ;;  %6443 = vmatprep.subr.bf16.mxu1 %v8208_v47  ;;  %v9878_v13 = vld [vmem:[#allocation43_spill] sm:$0xff] }
 0x5da   :  { %2843 = vmatprep.mubr.f32.mxu0 %v9717_v9  ;;  %2914 = vmatprep.mubr.f32.mxu1 %v9717_v9 }
 0x5dc   :  { %6413 = vmatpush1.bf16.msra.mxu0 %v9825_v4  ;;  %6445 = vmatpush1.bf16.msra.mxu1 %v9826_v58 }
 0x5dd   :  { %6415 = vmatprep.subr.bf16.mxu0 %v9827_v14  ;;  %6447 = vmatprep.subr.bf16.mxu1 %v9828_v16 }
 0x5e0   :  { %6417 = vmatpush1.bf16.msra.mxu0 %v9829_v44  ;;  %6449 = vmatpush1.bf16.msra.mxu1 %v9861_v2 }
 0x5e1   :  { %6419 = vmatprep.subr.bf16.mxu0 %v9862_v59  ;;  %6451 = vmatprep.subr.bf16.mxu1 %v9863_v62 }
 0x5e4   :  { %6421 = vmatpush1.bf16.msra.mxu0 %v9864_v53  ;;  %6453 = vmatpush1.bf16.msra.mxu1 %v9865_v6 }
 0x5e5   :  { %6423 = vmatprep.subr.bf16.mxu0 %v9866_v26  ;;  %6455 = vmatprep.subr.bf16.mxu1 %v9867_v30  ;;  %v9885_v26 = vld [vmem:[#allocation61_spill] sm:$0xff] }
 0x5e8   :  { %6425 = vmatpush1.bf16.msra.mxu0 %v9868_v45  ;;  %6457 = vmatpush1.bf16.msra.mxu1 %v9869_v54  ;;  %v9879_v45 = vld [vmem:[#allocation44_spill] sm:$0xff]  ;;  %v9880_v54 = vld [vmem:[#allocation45_spill] sm:$0xff] }
 0x5e9   :  { %6427 = vmatprep.subr.bf16.mxu0 %v9870_v3  ;;  %6459 = vmatprep.subr.bf16.mxu1 %v9871_v28  ;;  %v9881_v3 = vld [vmem:[#allocation46_spill] sm:$0xff]  ;;  %v9882_v28 = vld [vmem:[#allocation47_spill] sm:$0xff] }
 0x5ec   :  { %6429 = vmatpush1.bf16.msra.mxu0 %v9872_v61  ;;  %6461 = vmatpush1.bf16.msra.mxu1 %v9873_v55  ;;  %v9883_v61 = vld [vmem:[#allocation48_spill] sm:$0xff] }
 0x5ed   :  { %6431 = vmatprep.subr.bf16.mxu0 %v9874_v56  ;;  %6463 = vmatprep.subr.bf16.mxu1 %v9875_v8  ;;  %v9884_v55 = vld [vmem:[#allocation60_spill] sm:$0xff] }
 0x5ee   :  { %v2415_v56 = vrot.slane %v9884_v55, 2 }
 0x5f0   :  { %6433 = vmatpush1.bf16.msra.mxu0 %v9876_v27  ;;  %6465 = vmatpush1.bf16.msra.mxu1 %v9877_v51  ;;  %v2416_v27 = vrot.slane %v9885_v26, 2 }
 0x5f1   :  { %6435 = vmatprep.subr.bf16.mxu0 %v9878_v13  ;;  %6467 = vmatprep.subr.bf16.mxu1 %v9879_v45 }
 0x5f4   :  { %6437 = vmatpush1.bf16.msra.mxu0 %v9880_v54  ;;  %6469 = vmatpush1.bf16.msra.mxu1 %v9881_v3  ;;  %v9886_v54 = vld [vmem:[#allocation63_spill] sm:$0xff] }
 0x5f5   :  { %6471 = vmatprep.subr.bf16.mxu0 %v9882_v28  ;;  %6503 = vmatprep.subr.bf16.mxu1 %v9883_v61  ;;  %v2418_v3 = vrot.slane %v9886_v54, 2  ;;  %v9887_v28 = vld [vmem:[#allocation62_spill] sm:$0xff] }
 0x5f6   :  { %v2417_v2 = vrot.slane %v9887_v28, 2 }
 0x68a   :  { %v2489_v30 = vpop.f32.mrb[28].mxu0  ;;  %v2560_v8 = vpop.f32.mrb[28].mxu1 }
 0x68b   :  { %v2490_v6 = vadd.f32 %v2489_v30, %v2415_v56  ;;  %v2491_v51 = vpop.f32.mrb[29].mxu0  ;;  %v2562_v53 = vpop.f32.mrb[29].mxu1  ;;  %v2561_v44 = vadd.f32 %v2560_v8, %v2417_v2 }
 0x68c   :  { %v2492_v13 = vadd.f32 %v2491_v51, %v2416_v27  ;;  %v2563_v59 = vadd.f32 %v2562_v53, %v2418_v3  ;;  %v9888_v3 = vld [vmem:[#allocation64_spill] sm:$0xff] }
 0x68d   :  { %v5474_v62 = vmul.f32 -1.442695, %v2490_v6 }
 0x68e   :  { %v5475_v45 = vmul.f32 -1.442695, %v2492_v13  ;;  %v5476_v61 = vmul.f32 -1.442695, %v2563_v59  ;;  %v2565_v13 = vrot.slane %v9888_v3, 4 }
 0x68f   :  { %7526 = vpow2.f32 %v5474_v62 }
 0x690   :  { %7528 = vpow2.f32 %v5475_v45 }
 0x691   :  { %7530 = vpow2.f32 %v5476_v61 }
 0x692   :  { %7532 = vtanh.f32 %v2561_v44 }
 0x699   :  { %v7527_v55 = vpop.eup %7526 }
 0x69a   :  { %v7529_v16 = vpop.eup %7528  ;;  %v2718_v14 = vadd.f32 1.0, %v7527_v55  ;;  %v9889_v55 = vld [vmem:[#allocation65_spill] sm:$0xff] }
 0x69b   :  { %v2724_v30 = vadd.f32 1.0, %v7529_v16  ;;  %v7531_v56 = vpop.eup %7530  ;;  %v2566_v61 = vrot.slane %v9889_v55, 4 }
 0x69c   :  { %7534 = vrcp.f32 %v2718_v14  ;;  %v7533_v6 = vpop.eup %7532  ;;  %v2731_v51 = vadd.f32 1.0, %v7531_v56 }
 0x69d   :  { %7536 = vrcp.f32 %v2724_v30 }
 0x69e   :  { %7538 = vrcp.f32 %v2731_v51 }
 0x6a6   :  { %v7535_v27 = vpop.eup %7534 }
 0x6a7   :  { %v7537_v62 = vpop.eup %7536  ;;  %v2735_v45 = vmul.f32 %v7535_v27, %v7533_v6 }
 0x6a8   :  { %v2734_v53 = vmul.f32 %v7537_v62, %v8837_v20  ;;  %v2568_v20 = vrot.slane %v9859_v24, 4  ;;  %v7539_v27 = vpop.eup %7538  ;;  %v2567_v62 = vrot.slane %v9860_v17, 4 }
 0x6aa   :  { %v8921_v59 = vadd.f32 %v2735_v45, %v2734_v53  ;;  %v2639_v2 = vpop.f32.mrb[30].mxu0  ;;  %v2710_v8 = vpop.f32.mrb[30].mxu1 }
 0x6ab   :  { %v2640_v16 = vadd.f32 %v2639_v2, %v2565_v13  ;;  %v2641_v14 = vpop.f32.mrb[31].mxu0  ;;  %v2712_v44 = vpop.f32.mrb[31].mxu1  ;;  %v2711_v55 = vadd.f32 %v2710_v8, %v2567_v62 }
 0x6ac   :  { %v2642_v30 = vadd.f32 %v2641_v14, %v2566_v61  ;;  %7540 = vtanh.f32 %v8921_v59  ;;  %v2713_v56 = vadd.f32 %v2712_v44, %v2568_v20 }
 0x6ad   :  { %v5477_v28 = vmul.f32 -1.442695, %v2640_v16 }
 0x6ae   :  { %v5478_v6 = vmul.f32 -1.442695, %v2642_v30  ;;  %v5479_v53 = vmul.f32 -1.442695, %v2713_v56 }
 0x6af   :  { %7542 = vpow2.f32 %v5477_v28 }
 0x6b0   :  { %7544 = vpow2.f32 %v5478_v6 }
 0x6b1   :  { %7546 = vpow2.f32 %v5479_v53  ;;  %v9894_v53 = vld [vmem:[#allocation27_spill] sm:$0xff] }
 0x6b2   :  { %7548 = vtanh.f32 %v2711_v55 }
 0x6b6   :  { %v7541_v45 = vpop.eup %7540 }
 0x6b7   :  { %v2738_v51 = vmul.f32 %v7541_v45, %v7539_v27 }
 0x6b9   :  { %v7543_v13 = vpop.eup %7542  ;;  %v2764_v2 = vrot.slane %v2738_v51, 6  ;;  %2844 = vmatmul.mubr.f32.vlgmr.msra.gmra.mrb[32].mxu0 %v2738_v51  ;;  %2915 = vmatmul.mubr.f32.vlgmr.msra.gmra.mrb[32].mxu1 %v2738_v51  ;;  %v9897_v51 = vld [vmem:[#allocation30_spill] sm:$0xff] }
 0x6ba   :  { %v7545_v61 = vpop.eup %7544  ;;  %v2742_v14 = vadd.f32 1.0, %v7543_v13  ;;  %6473 = vmatpush1.bf16.msra.mxu0 %v8306_v36  ;;  %6505 = vmatpush1.bf16.msra.mxu1 %v8310_v37  ;;  %v9898_v13 = vld [vmem:[#allocation31_spill] sm:$0xff] }
 0x6bb   :  { %v2748_v28 = vadd.f32 1.0, %v7545_v61  ;;  %2766 = vst [vmem:[#allocation2 + $0x10] sm:$0xc] %v2764_v2  ;;  %6475 = vmatprep.subr.bf16.mxu0 %v8312_v38  ;;  %6507 = vmatprep.subr.bf16.mxu1 %v8315_v49  ;;  %v7547_v8 = vpop.eup %7546  ;;  %v9901_v2 = vld [vmem:[#allocation34_spill] sm:$0xff]  ;;  %v9902_v61 = vld [vmem:[#allocation35_spill] sm:$0xff] }
 0x6bc   :  { %7550 = vrcp.f32 %v2742_v14  ;;  %2993 = vmatprep.mubr.f32.mxu0 %v9717_v9  ;;  %3064 = vmatprep.mubr.f32.mxu1 %v9717_v9  ;;  %v7549_v55 = vpop.eup %7548  ;;  %v2755_v6 = vadd.f32 1.0, %v7547_v8  ;;  %v9903_v14 = vld [vmem:[#allocation36_spill] sm:$0xff]  ;;  %v9905_v8 = vld [vmem:[#allocation38_spill] sm:$0xff] }
 0x6bd   :  { %7552 = vrcp.f32 %v2748_v28  ;;  %v9904_v28 = vld [vmem:[#allocation37_spill] sm:$0xff] }
 0x6be   :  { %6477 = vmatpush1.bf16.msra.mxu0 %v8318_v63  ;;  %6509 = vmatpush1.bf16.msra.mxu1 %v8322_v1  ;;  %7554 = vrcp.f32 %v2755_v6  ;;  %v9910_v6 = vld [vmem:[#allocation43_spill] sm:$0xff] }
 0x6bf   :  { %6479 = vmatprep.subr.bf16.mxu0 %v8324_v5  ;;  %6511 = vmatprep.subr.bf16.mxu1 %v8327_v11 }
 0x6c2   :  { %6481 = vmatpush1.bf16.msra.mxu0 %v8332_v25  ;;  %6513 = vmatpush1.bf16.msra.mxu1 %v9733_v33 }
 0x6c3   :  { %6483 = vmatprep.subr.bf16.mxu0 %v9734_v18  ;;  %6515 = vmatprep.subr.bf16.mxu1 %v9735_v34 }
 0x6c6   :  { %v7551_v16 = vpop.eup %7550  ;;  %6485 = vmatpush1.bf16.msra.mxu0 %v9736_v12  ;;  %6517 = vmatpush1.bf16.msra.mxu1 %v9737_v60 }
 0x6c7   :  { %v7553_v44 = vpop.eup %7552  ;;  %v2759_v30 = vmul.f32 %v7551_v16, %v7549_v55  ;;  %6487 = vmatprep.subr.bf16.mxu0 %v9738_v57  ;;  %6519 = vmatprep.subr.bf16.mxu1 %v9739_v15  ;;  %v9906_v55 = vld [vmem:[#allocation39_spill] sm:$0xff]  ;;  %v9907_v16 = vld [vmem:[#allocation40_spill] sm:$0xff] }
 0x6c8   :  { %v2758_v20 = vmul.f32 %v7553_v44, %v8862_v40  ;;  %v7555_v40 = vpop.eup %7554  ;;  %v9908_v44 = vld [vmem:[#allocation41_spill] sm:$0xff] }
 0x6ca   :  { %v8946_v56 = vadd.f32 %v2759_v30, %v2758_v20  ;;  %6489 = vmatpush1.bf16.msra.mxu0 %v9740_v52  ;;  %6521 = vmatpush1.bf16.msra.mxu1 %v9741_v23  ;;  %v9909_v30 = vld [vmem:[#allocation42_spill] sm:$0xff]  ;;  %v9911_v20 = vld [vmem:[#allocation44_spill] sm:$0xff] }
 0x6cb   :  { %6491 = vmatprep.subr.bf16.mxu0 %v8362_v48  ;;  %6523 = vmatprep.subr.bf16.mxu1 %v9742_v50 }
 0x6cc   :  { %7556 = vtanh.f32 %v8946_v56 }
 0x6ce   :  { %6493 = vmatpush1.bf16.msra.mxu0 %v8368_v7  ;;  %6525 = vmatpush1.bf16.msra.mxu1 %v8372_v0 }
 0x6cf   :  { %6495 = vmatprep.subr.bf16.mxu0 %v8374_v19  ;;  %6527 = vmatprep.subr.bf16.mxu1 %v8377_v35 }
 0x6d2   :  { %6497 = vmatpush1.bf16.msra.mxu0 %v8380_v39  ;;  %6529 = vmatpush1.bf16.msra.mxu1 %v8384_v31 }
 0x6d3   :  { %6499 = vmatprep.subr.bf16.mxu0 %v8386_v46  ;;  %6531 = vmatprep.subr.bf16.mxu1 %v8389_v10 }
 0x6d6   :  { %v7557_v27 = vpop.eup %7556  ;;  %6501 = vmatpush1.bf16.msra.mxu0 %v8392_v22  ;;  %6533 = vmatpush1.bf16.msra.mxu1 %v8396_v21 }
 0x6d7   :  { %v2762_v62 = vmul.f32 %v7557_v27, %v7555_v40  ;;  %6535 = vmatprep.subr.bf16.mxu0 %v8189_v29  ;;  %6567 = vmatprep.subr.bf16.mxu1 %v8192_v32  ;;  %v9890_v29 = vld [vmem:[#allocation23_spill] sm:$0xff]  ;;  %v9891_v32 = vld [vmem:[#allocation24_spill] sm:$0xff]  ;;  %v9912_v40 = vld [vmem:[#allocation45_spill] sm:$0xff] }
 0x6d8   :  { %v9913_v27 = vld [vmem:[#allocation46_spill] sm:$0xff] }
 0x6d9   :  { %v2768_v45 = vrot.slane %v2762_v62, 4  ;;  %2994 = vmatmul.mubr.f32.vlgmr.msra.gmra.mrb[34].mxu0 %v2762_v62  ;;  %3065 = vmatmul.mubr.f32.vlgmr.msra.gmra.mrb[34].mxu1 %v2762_v62  ;;  %v9914_v62 = vld [vmem:[#allocation47_spill] sm:$0xff] }
 0x6da   :  { %6537 = vmatpush1.bf16.msra.mxu0 %v8201_v41  ;;  %6569 = vmatpush1.bf16.msra.mxu1 %v8204_v42  ;;  %v9892_v41 = vld [vmem:[#allocation25_spill] sm:$0xff]  ;;  %v9893_v42 = vld [vmem:[#allocation26_spill] sm:$0xff] }
 0x6db   :  { %2770 = vst [vmem:[#allocation2 + $0x8] sm:$0x30] %v2768_v45  ;;  %6539 = vmatprep.subr.bf16.mxu0 %v8206_v43  ;;  %6571 = vmatprep.subr.bf16.mxu1 %v8208_v47  ;;  %v9895_v43 = vld [vmem:[#allocation28_spill] sm:$0xff]  ;;  %v9896_v47 = vld [vmem:[#allocation29_spill] sm:$0xff] }
 0x6dc   :  { %3199 = vmatprep.mubr.f32.mxu0 %v9717_v9  ;;  %3270 = vmatprep.mubr.f32.mxu1 %v9717_v9  ;;  %v9915_v45 = vld [vmem:[#allocation48_spill] sm:$0xff] }
 0x6de   :  { %6541 = vmatpush1.bf16.msra.mxu0 %v9825_v4  ;;  %6573 = vmatpush1.bf16.msra.mxu1 %v9826_v58  ;;  %v9899_v4 = vld [vmem:[#allocation32_spill] sm:$0xff]  ;;  %v9900_v58 = vld [vmem:[#allocation33_spill] sm:$0xff] }
 0x6df   :  { %6543 = vmatprep.subr.bf16.mxu0 %v9890_v29  ;;  %6575 = vmatprep.subr.bf16.mxu1 %v9891_v32  ;;  %v9916_v29 = vld [vmem:[#allocation60_spill] sm:$0xff] }
 0x6e0   :  { %v2771_v32 = vrot.slane %v9916_v29, 4 }
 0x6e2   :  { %6545 = vmatpush1.bf16.msra.mxu0 %v9892_v41  ;;  %6577 = vmatpush1.bf16.msra.mxu1 %v9893_v42 }
 0x6e3   :  { %6547 = vmatprep.subr.bf16.mxu0 %v9894_v53  ;;  %6579 = vmatprep.subr.bf16.mxu1 %v9895_v43  ;;  %v2772_v53 = vrot.slane %v9885_v26, 4 }
 0x6e6   :  { %6549 = vmatpush1.bf16.msra.mxu0 %v9896_v47  ;;  %6581 = vmatpush1.bf16.msra.mxu1 %v9897_v51 }
 0x6e7   :  { %6551 = vmatprep.subr.bf16.mxu0 %v9898_v13  ;;  %6583 = vmatprep.subr.bf16.mxu1 %v9899_v4 }
 0x6ea   :  { %6553 = vmatpush1.bf16.msra.mxu0 %v9900_v58  ;;  %6585 = vmatpush1.bf16.msra.mxu1 %v9901_v2  ;;  %v2774_v2 = vrot.slane %v9886_v54, 4 }
 0x6eb   :  { %6555 = vmatprep.subr.bf16.mxu0 %v9902_v61  ;;  %6587 = vmatprep.subr.bf16.mxu1 %v9903_v14  ;;  %v9917_v14 = vld [vmem:[#allocation62_spill] sm:$0xff] }
 0x6ee   :  { %6557 = vmatpush1.bf16.msra.mxu0 %v9904_v28  ;;  %6589 = vmatpush1.bf16.msra.mxu1 %v9905_v8  ;;  %v2773_v28 = vrot.slane %v9917_v14, 4 }
 0x6ef   :  { %6559 = vmatprep.subr.bf16.mxu0 %v9906_v55  ;;  %6591 = vmatprep.subr.bf16.mxu1 %v9907_v16 }
 0x6f2   :  { %6561 = vmatpush1.bf16.msra.mxu0 %v9908_v44  ;;  %6593 = vmatpush1.bf16.msra.mxu1 %v9909_v30 }
 0x6f3   :  { %6563 = vmatprep.subr.bf16.mxu0 %v9910_v6  ;;  %6595 = vmatprep.subr.bf16.mxu1 %v9911_v20 }
 0x6f6   :  { %6565 = vmatpush1.bf16.msra.mxu0 %v9912_v40  ;;  %6597 = vmatpush1.bf16.msra.mxu1 %v9913_v27 }
 0x6f7   :  { %6599 = vmatprep.subr.bf16.mxu0 %v9914_v62  ;;  %6631 = vmatprep.subr.bf16.mxu1 %v9915_v45 }
 0x78c   :  { %v2845_v41 = vpop.f32.mrb[32].mxu0  ;;  %v2916_v42 = vpop.f32.mrb[32].mxu1 }
 0x78d   :  { %v2846_v43 = vadd.f32 %v2845_v41, %v2771_v32  ;;  %v2847_v47 = vpop.f32.mrb[33].mxu0  ;;  %v2918_v51 = vpop.f32.mrb[33].mxu1  ;;  %v2917_v55 = vadd.f32 %v2916_v42, %v2773_v28 }
 0x78e   :  { %v2848_v13 = vadd.f32 %v2847_v47, %v2772_v53  ;;  %v2919_v61 = vadd.f32 %v2918_v51, %v2774_v2  ;;  %v2921_v53 = vrot.slane %v9888_v3, 2  ;;  %v9918_v51 = vld [vmem:[#allocation65_spill] sm:$0xff] }
 0x78f   :  { %v5480_v4 = vmul.f32 -1.442695, %v2846_v43 }
 0x790   :  { %v5481_v58 = vmul.f32 -1.442695, %v2848_v13  ;;  %v5482_v8 = vmul.f32 -1.442695, %v2919_v61  ;;  %v2922_v13 = vrot.slane %v9918_v51, 2 }
 0x791   :  { %7558 = vpow2.f32 %v5480_v4 }
 0x792   :  { %7560 = vpow2.f32 %v5481_v58 }
 0x793   :  { %7562 = vpow2.f32 %v5482_v8 }
 0x794   :  { %7564 = vtanh.f32 %v2917_v55 }
 0x79b   :  { %v7559_v16 = vpop.eup %7558 }
 0x79c   :  { %v7561_v44 = vpop.eup %7560  ;;  %v3074_v30 = vadd.f32 1.0, %v7559_v16 }
 0x79d   :  { %v3080_v6 = vadd.f32 1.0, %v7561_v44  ;;  %v7563_v20 = vpop.eup %7562  ;;  %v2923_v44 = vrot.slane %v9860_v17, 2 }
 0x79e   :  { %7566 = vrcp.f32 %v3074_v30  ;;  %v7565_v40 = vpop.eup %7564  ;;  %v3087_v32 = vadd.f32 1.0, %v7563_v20 }
 0x79f   :  { %7568 = vrcp.f32 %v3080_v6 }
 0x7a0   :  { %7570 = vrcp.f32 %v3087_v32 }
 0x7a8   :  { %v7567_v27 = vpop.eup %7566 }
 0x7a9   :  { %v7569_v62 = vpop.eup %7568  ;;  %v3091_v45 = vmul.f32 %v7567_v27, %v7565_v40 }
 0x7aa   :  { %v3090_v41 = vmul.f32 %v7569_v62, %v8921_v59  ;;  %v2924_v59 = vrot.slane %v9859_v24, 2  ;;  %v7571_v16 = vpop.eup %7570 }
 0x7ac   :  { %v9005_v43 = vadd.f32 %v3091_v45, %v3090_v41  ;;  %v2995_v42 = vpop.f32.mrb[34].mxu0  ;;  %v3066_v47 = vpop.f32.mrb[34].mxu1 }
 0x7ad   :  { %v2996_v4 = vadd.f32 %v2995_v42, %v2921_v53  ;;  %v2997_v58 = vpop.f32.mrb[35].mxu0  ;;  %v3068_v2 = vpop.f32.mrb[35].mxu1  ;;  %v3067_v20 = vadd.f32 %v3066_v47, %v2923_v44  ;;  %v3486_v47 = vld [vmem:[#allocation11 + $0x50] sm:$0xff] }
 0x7ae   :  { %v2998_v61 = vadd.f32 %v2997_v58, %v2922_v13  ;;  %7572 = vtanh.f32 %v9005_v43  ;;  %v3069_v55 = vadd.f32 %v3068_v2, %v2924_v59  ;;  %v3490_v13 = vld [vmem:[#allocation11 + $0x70] sm:$0xff]  ;;  %v3493_v58 = vld [vmem:[#allocation11 + $0x88] sm:$0xff]  ;;  %v3492_v59 = vld [vmem:[#allocation11 + $0x80] sm:$0xff] }
 0x7af   :  { %v5483_v28 = vmul.f32 -1.442695, %v2996_v4  ;;  %v6732_v4 = vpack.c.bf16 %v3490_v13, %v3486_v47  ;;  %v3497_v2 = vld [vmem:[#allocation11 + $0xa8] sm:$0xff]  ;;  %v3527_v47 = vld [vmem:[#allocation11 + $0x198] sm:$0xff] }
 0x7b0   :  { %v5484_v8 = vmul.f32 -1.442695, %v2998_v61  ;;  %v5485_v6 = vmul.f32 -1.442695, %v3069_v55  ;;  %v3495_v61 = vld [vmem:[#allocation11 + $0x98] sm:$0xff]  ;;  %v3496_v55 = vld [vmem:[#allocation11 + $0xa0] sm:$0xff] }
 0x7b1   :  { %7574 = vpow2.f32 %v5483_v28  ;;  %v6670_v28 = vpack.c.bf16 %v3497_v2, %v3493_v58  ;;  %v6672_v44 = vpack.c.bf16 %v3496_v55, %v3492_v59  ;;  %v3524_v58 = vld [vmem:[#allocation11 + $0x180] sm:$0xff]  ;;  %v3530_v59 = vld [vmem:[#allocation11 + $0x1b0] sm:$0xff] }
 0x7b2   :  { %7576 = vpow2.f32 %v5484_v8  ;;  %v3499_v8 = vld [vmem:[#allocation11 + $0xb8] sm:$0xff]  ;;  %v3528_v2 = vld [vmem:[#allocation11 + $0x1a0] sm:$0xff] }
 0x7b3   :  { %7578 = vpow2.f32 %v5485_v6  ;;  %v3498_v6 = vld [vmem:[#allocation11 + $0xb0] sm:$0xff] }
 0x7b4   :  { %7580 = vtanh.f32 %v3067_v20 }
 0x7b8   :  { %v7573_v30 = vpop.eup %7572 }
 0x7b9   :  { %v3094_v40 = vmul.f32 %v7573_v30, %v7571_v16  ;;  %v6734_v16 = vpack.c.bf16 %v3499_v8, %v3495_v61  ;;  %v3494_v30 = vld [vmem:[#allocation11 + $0x90] sm:$0xff] }
 0x7ba   :  { %v6736_v20 = vpack.c.bf16 %v3498_v6, %v3494_v30  ;;  %v3526_v8 = vld [vmem:[#allocation11 + $0x190] sm:$0xff]  ;;  %v3535_v30 = vld [vmem:[#allocation11 + $0x1d8] sm:$0xff] }
 0x7bb   :  { %v7575_v27 = vpop.eup %7574  ;;  %v3120_v62 = vrot.slane %v3094_v40, 4  ;;  %3200 = vmatmul.mubr.f32.vlgmr.msra.gmra.mrb[36].mxu0 %v3094_v40  ;;  %3271 = vmatmul.mubr.f32.vlgmr.msra.gmra.mrb[36].mxu1 %v3094_v40  ;;  %v3501_v40 = vld [vmem:[#allocation11 + $0xc8] sm:$0xff]  ;;  %v6752_v55 = vpack.c.bf16 %v3530_v59, %v3526_v8  ;;  %v3567_v8 = vld [vmem:[#allocation11 + $0x2d8] sm:$0xff] }
 0x7bc   :  { %v7577_v45 = vpop.eup %7576  ;;  %v3098_v32 = vadd.f32 1.0, %v7575_v27  ;;  %6601 = vmatpush1.bf16.msra.mxu0 %v8306_v36  ;;  %6633 = vmatpush1.bf16.msra.mxu1 %v8310_v37  ;;  %v3505_v27 = vld [vmem:[#allocation11 + $0xe8] sm:$0xff] }
 0x7bd   :  { %v3104_v41 = vadd.f32 1.0, %v7577_v45  ;;  %3122 = vst [vmem:[#allocation2 + $0x10] sm:$0x30] %v3120_v62  ;;  %6603 = vmatprep.subr.bf16.mxu0 %v8312_v38  ;;  %6635 = vmatprep.subr.bf16.mxu1 %v8315_v49  ;;  %v7579_v36 = vpop.eup %7578  ;;  %v3503_v62 = vld [vmem:[#allocation11 + $0xd8] sm:$0xff]  ;;  %v6674_v45 = vpack.c.bf16 %v3505_v27, %v3501_v40  ;;  %v3532_v40 = vld [vmem:[#allocation11 + $0x1c0] sm:$0xff] }
 0x7be   :  { %7582 = vrcp.f32 %v3098_v32  ;;  %3341 = vmatprep.mubr.f32.mxu0 %v9717_v9  ;;  %3412 = vmatprep.mubr.f32.mxu1 %v9717_v9  ;;  %v7581_v37 = vpop.eup %7580  ;;  %v3507_v32 = vld [vmem:[#allocation11 + $0xf8] sm:$0xff]  ;;  %v3536_v27 = vld [vmem:[#allocation11 + $0x1e0] sm:$0xff] }
 0x7bf   :  { %7584 = vrcp.f32 %v3104_v41  ;;  %v3500_v41 = vld [vmem:[#allocation11 + $0xc0] sm:$0xff] }
 0x7c0   :  { %6605 = vmatpush1.bf16.msra.mxu0 %v8318_v63  ;;  %6637 = vmatpush1.bf16.msra.mxu1 %v8322_v1  ;;  %v3111_v1 = vadd.f32 1.0, %v7579_v36  ;;  %v3504_v36 = vld [vmem:[#allocation11 + $0xe0] sm:$0xff] }
 0x7c1   :  { %6607 = vmatprep.subr.bf16.mxu0 %v8324_v5  ;;  %6639 = vmatprep.subr.bf16.mxu1 %v8327_v11 }
 0x7c2   :  { %7586 = vrcp.f32 %v3111_v1 }
 0x7c4   :  { %6609 = vmatpush1.bf16.msra.mxu0 %v8332_v25  ;;  %6641 = vmatpush1.bf16.msra.mxu1 %v9733_v33 }
 0x7c5   :  { %6611 = vmatprep.subr.bf16.mxu0 %v9734_v18  ;;  %6643 = vmatprep.subr.bf16.mxu1 %v9735_v34  ;;  %v3476_v18 = vld [vmem:[#allocation11] sm:$0xff] }
 0x7c8   :  { %v7583_v38 = vpop.eup %7582  ;;  %6613 = vmatpush1.bf16.msra.mxu0 %v9736_v12  ;;  %6645 = vmatpush1.bf16.msra.mxu1 %v9737_v60  ;;  %v3478_v12 = vld [vmem:[#allocation11 + $0x10] sm:$0xff] }
 0x7c9   :  { %v7585_v49 = vpop.eup %7584  ;;  %v3115_v63 = vmul.f32 %v7583_v38, %v7581_v37  ;;  %6615 = vmatprep.subr.bf16.mxu0 %v9738_v57  ;;  %6647 = vmatprep.subr.bf16.mxu1 %v9739_v15  ;;  %v3482_v60 = vld [vmem:[#allocation11 + $0x30] sm:$0xff]  ;;  %v3489_v57 = vld [vmem:[#allocation11 + $0x68] sm:$0xff]  ;;  %v3487_v15 = vld [vmem:[#allocation11 + $0x58] sm:$0xff]  ;;  %v6738_v37 = vpack.c.bf16 %v3507_v32, %v3503_v62  ;;  %v6676_v38 = vpack.c.bf16 %v3504_v36, %v3500_v41 }
 0x7ca   :  { %v3114_v5 = vmul.f32 %v7585_v49, %v8946_v56  ;;  %v3488_v56 = vld [vmem:[#allocation11 + $0x60] sm:$0xff]  ;;  %v3502_v49 = vld [vmem:[#allocation11 + $0xd0] sm:$0xff] }
 0x7cb   :  { %v3534_v32 = vld [vmem:[#allocation11 + $0x1d0] sm:$0xff] }
 0x7cc   :  { %v9030_v11 = vadd.f32 %v3115_v63, %v3114_v5  ;;  %6617 = vmatpush1.bf16.msra.mxu0 %v9740_v52  ;;  %6649 = vmatpush1.bf16.msra.mxu1 %v9741_v23  ;;  %v7587_v25 = vpop.eup %7586  ;;  %v3491_v23 = vld [vmem:[#allocation11 + $0x78] sm:$0xff]  ;;  %v3506_v63 = vld [vmem:[#allocation11 + $0xf0] sm:$0xff]  ;;  %v3509_v5 = vld [vmem:[#allocation11 + $0x108] sm:$0xff] }
 0x7cd   :  { %6619 = vmatprep.subr.bf16.mxu0 %v8362_v48  ;;  %6651 = vmatprep.subr.bf16.mxu1 %v9742_v50  ;;  %v3484_v50 = vld [vmem:[#allocation11 + $0x40] sm:$0xff]  ;;  %v6730_v53 = vpack.c.bf16 %v3491_v23, %v3487_v15  ;;  %v6740_v1 = vpack.c.bf16 %v3506_v63, %v3502_v49  ;;  %v3518_v23 = vld [vmem:[#allocation11 + $0x150] sm:$0xff]  ;;  %v3543_v49 = vld [vmem:[#allocation11 + $0x218] sm:$0xff] }
 0x7ce   :  { %7588 = vtanh.f32 %v9030_v11  ;;  %v6668_v42 = vpack.c.bf16 %v3488_v56, %v3484_v50  ;;  %v3522_v50 = vld [vmem:[#allocation11 + $0x170] sm:$0xff] }
 0x7cf   :  { %v6748_v56 = vpack.c.bf16 %v3522_v50, %v3518_v23  ;;  %v3538_v41 = vld [vmem:[#allocation11 + $0x1f0] sm:$0xff]  ;;  %v3559_v23 = vld [vmem:[#allocation11 + $0x298] sm:$0xff] }
 0x7d0   :  { %6621 = vmatpush1.bf16.msra.mxu0 %v8368_v7  ;;  %6653 = vmatpush1.bf16.msra.mxu1 %v8372_v0  ;;  %v6756_v36 = vpack.c.bf16 %v3538_v41, %v3534_v32  ;;  %v3575_v32 = vld [vmem:[#allocation11 + $0x318] sm:$0xff] }
 0x7d1   :  { %6623 = vmatprep.subr.bf16.mxu0 %v8374_v19  ;;  %6655 = vmatprep.subr.bf16.mxu1 %v8377_v35  ;;  %v3477_v19 = vld [vmem:[#allocation11 + $0x8] sm:$0xff] }
 0x7d2   :  { %v3481_v35 = vld [vmem:[#allocation11 + $0x28] sm:$0xff] }
 0x7d3   :  { %v6662_v33 = vpack.c.bf16 %v3481_v35, %v3477_v19  ;;  %v3508_v19 = vld [vmem:[#allocation11 + $0x100] sm:$0xff] }
 0x7d4   :  { %6625 = vmatpush1.bf16.msra.mxu0 %v8380_v39  ;;  %6657 = vmatpush1.bf16.msra.mxu1 %v8384_v31  ;;  %v3479_v39 = vld [vmem:[#allocation11 + $0x18] sm:$0xff]  ;;  %v3512_v35 = vld [vmem:[#allocation11 + $0x120] sm:$0xff] }
 0x7d5   :  { %6627 = vmatprep.subr.bf16.mxu0 %v8386_v46  ;;  %6659 = vmatprep.subr.bf16.mxu1 %v8389_v10  ;;  %v3483_v31 = vld [vmem:[#allocation11 + $0x38] sm:$0xff]  ;;  %v3480_v46 = vld [vmem:[#allocation11 + $0x20] sm:$0xff] }
 0x7d6   :  { %v6726_v34 = vpack.c.bf16 %v3483_v31, %v3479_v39  ;;  %v6664_v10 = vpack.c.bf16 %v3480_v46, %v3476_v18  ;;  %v3510_v31 = vld [vmem:[#allocation11 + $0x110] sm:$0xff] }
 0x7d7   :  { %v3514_v18 = vld [vmem:[#allocation11 + $0x130] sm:$0xff] }
 0x7d8   :  { %v7589_v48 = vpop.eup %7588  ;;  %6629 = vmatpush1.bf16.msra.mxu0 %v8392_v22  ;;  %6661 = vmatpush1.bf16.msra.mxu1 %v8396_v21  ;;  %v6728_v22 = vpack.c.bf16 %v3482_v60, %v3478_v12  ;;  %v3485_v21 = vld [vmem:[#allocation11 + $0x48] sm:$0xff]  ;;  %v6744_v46 = vpack.c.bf16 %v3514_v18, %v3510_v31  ;;  %v3519_v12 = vld [vmem:[#allocation11 + $0x158] sm:$0xff] }
 0x7d9   :  { %v3118_v7 = vmul.f32 %v7589_v48, %v7587_v25  ;;  %6663 = vmatprep.subr.bf16.mxu0 %v6662_v33  ;;  %6727 = vmatprep.subr.bf16.mxu1 %v6726_v34  ;;  %v6666_v52 = vpack.c.bf16 %v3489_v57, %v3485_v21  ;;  %v3513_v25 = vld [vmem:[#allocation11 + $0x128] sm:$0xff]  ;;  %v3511_v48 = vld [vmem:[#allocation11 + $0x118] sm:$0xff]  ;;  %v6680_v33 = vpack.c.bf16 %v3512_v35, %v3508_v19  ;;  %v3516_v21 = vld [vmem:[#allocation11 + $0x140] sm:$0xff] }
 0x7da   :  { %v3517_v34 = vld [vmem:[#allocation11 + $0x148] sm:$0xff]  ;;  %v3520_v57 = vld [vmem:[#allocation11 + $0x160] sm:$0xff]  ;;  %v3546_v19 = vld [vmem:[#allocation11 + $0x230] sm:$0xff] }
 0x7db   :  { %v3124_v0 = vrot.slane %v3118_v7, 6  ;;  %3342 = vmatmul.mubr.f32.vlgmr.msra.gmra.mrb[38].mxu0 %v3118_v7  ;;  %3413 = vmatmul.mubr.f32.vlgmr.msra.gmra.mrb[38].mxu1 %v3118_v7  ;;  %v6678_v7 = vpack.c.bf16 %v3513_v25, %v3509_v5  ;;  %v3540_v5 = vld [vmem:[#allocation11 + $0x200] sm:$0xff]  ;;  %v3551_v31 = vld [vmem:[#allocation11 + $0x258] sm:$0xff] }
 0x7dc   :  { %6665 = vmatpush1.bf16.msra.mxu0 %v6664_v10  ;;  %6729 = vmatpush1.bf16.msra.mxu1 %v6728_v22  ;;  %v3521_v10 = vld [vmem:[#allocation11 + $0x168] sm:$0xff]  ;;  %v3523_v22 = vld [vmem:[#allocation11 + $0x178] sm:$0xff]  ;;  %v3544_v25 = vld [vmem:[#allocation11 + $0x220] sm:$0xff] }
 0x7dd   :  { %3126 = vst [vmem:[#allocation2 + $0x8] sm:$0xc] %v3124_v0  ;;  %6667 = vmatprep.subr.bf16.mxu0 %v6666_v52  ;;  %6731 = vmatprep.subr.bf16.mxu1 %v6730_v53  ;;  %v3515_v0 = vld [vmem:[#allocation11 + $0x138] sm:$0xff]  ;;  %v6682_v60 = vpack.c.bf16 %v3521_v10, %v3517_v34  ;;  %v6746_v15 = vpack.c.bf16 %v3523_v22, %v3519_v12  ;;  %v3525_v53 = vld [vmem:[#allocation11 + $0x188] sm:$0xff]  ;;  %v3548_v34 = vld [vmem:[#allocation11 + $0x240] sm:$0xff] }
 0x7de   :  { %v6742_v39 = vpack.c.bf16 %v3515_v0, %v3511_v48  ;;  %v6684_v52 = vpack.c.bf16 %v3520_v57, %v3516_v21  ;;  %v3542_v0 = vld [vmem:[#allocation11 + $0x210] sm:$0xff]  ;;  %v3552_v10 = vld [vmem:[#allocation11 + $0x260] sm:$0xff] }
 0x7df   :  { %v6760_v35 = vpack.c.bf16 %v3546_v19, %v3542_v0  ;;  %v3550_v22 = vld [vmem:[#allocation11 + $0x250] sm:$0xff]  ;;  %v3583_v0 = vld [vmem:[#allocation11 + $0x358] sm:$0xff] }
 0x7e0   :  { %6669 = vmatpush1.bf16.msra.mxu0 %v6668_v42  ;;  %6733 = vmatpush1.bf16.msra.mxu1 %v6732_v4  ;;  %v3529_v42 = vld [vmem:[#allocation11 + $0x1a8] sm:$0xff]  ;;  %v3531_v4 = vld [vmem:[#allocation11 + $0x1b8] sm:$0xff]  ;;  %v3554_v21 = vld [vmem:[#allocation11 + $0x270] sm:$0xff] }
 0x7e1   :  { %6671 = vmatprep.subr.bf16.mxu0 %v6670_v28  ;;  %6735 = vmatprep.subr.bf16.mxu1 %v6734_v16  ;;  %v6686_v13 = vpack.c.bf16 %v3529_v42, %v3525_v53  ;;  %v6750_v61 = vpack.c.bf16 %v3531_v4, %v3527_v47  ;;  %v6688_v28 = vpack.c.bf16 %v3528_v2, %v3524_v58  ;;  %v3533_v16 = vld [vmem:[#allocation11 + $0x1c8] sm:$0xff]  ;;  %v3556_v53 = vld [vmem:[#allocation11 + $0x280] sm:$0xff]  ;;  %v3558_v4 = vld [vmem:[#allocation11 + $0x290] sm:$0xff] }
 0x7e2   :  { %v6764_v57 = vpack.c.bf16 %v3554_v21, %v3550_v22  ;;  %v3560_v42 = vld [vmem:[#allocation11 + $0x2a0] sm:$0xff]  ;;  %v3562_v58 = vld [vmem:[#allocation11 + $0x2b0] sm:$0xff]  ;;  %v3591_v22 = vld [vmem:[#allocation11 + $0x398] sm:$0xff] }
 0x7e3   :  { %v6768_v2 = vpack.c.bf16 %v3562_v58, %v3558_v4  ;;  %v3599_v4 = vld [vmem:[#allocation11 + $0x3d8] sm:$0xff] }
 0x7e4   :  { %6673 = vmatpush1.bf16.msra.mxu0 %v6672_v44  ;;  %6737 = vmatpush1.bf16.msra.mxu1 %v6736_v20  ;;  %v3537_v44 = vld [vmem:[#allocation11 + $0x1e8] sm:$0xff]  ;;  %v3539_v20 = vld [vmem:[#allocation11 + $0x1f8] sm:$0xff] }
 0x7e5   :  { %6675 = vmatprep.subr.bf16.mxu0 %v6674_v45  ;;  %6739 = vmatprep.subr.bf16.mxu1 %v6738_v37  ;;  %v6690_v6 = vpack.c.bf16 %v3537_v44, %v3533_v16  ;;  %v6754_v62 = vpack.c.bf16 %v3539_v20, %v3535_v30  ;;  %v6692_v45 = vpack.c.bf16 %v3536_v27, %v3532_v40  ;;  %v3541_v37 = vld [vmem:[#allocation11 + $0x208] sm:$0xff]  ;;  %v3564_v16 = vld [vmem:[#allocation11 + $0x2c0] sm:$0xff]  ;;  %v3566_v20 = vld [vmem:[#allocation11 + $0x2d0] sm:$0xff] }
 0x7e6   :  { %v3568_v44 = vld [vmem:[#allocation11 + $0x2e0] sm:$0xff]  ;;  %v3570_v40 = vld [vmem:[#allocation11 + $0x2f0] sm:$0xff]  ;;  %v3603_v58 = vld [vmem:[#allocation11 + $0x3f8] sm:$0xff] }
 0x7e7   :  { %v6772_v27 = vpack.c.bf16 %v3570_v40, %v3566_v20  ;;  %v3783_v20 = vld [vmem:[#allocation12 + $0x18] sm:$0xff] }
 0x7e8   :  { %6677 = vmatpush1.bf16.msra.mxu0 %v6676_v38  ;;  %6741 = vmatpush1.bf16.msra.mxu1 %v6740_v1  ;;  %v3545_v38 = vld [vmem:[#allocation11 + $0x228] sm:$0xff]  ;;  %v3547_v1 = vld [vmem:[#allocation11 + $0x238] sm:$0xff] }
 0x7e9   :  { %6679 = vmatprep.subr.bf16.mxu0 %v6678_v7  ;;  %6743 = vmatprep.subr.bf16.mxu1 %v6742_v39  ;;  %v6694_v63 = vpack.c.bf16 %v3545_v38, %v3541_v37  ;;  %v6758_v48 = vpack.c.bf16 %v3547_v1, %v3543_v49  ;;  %v6696_v7 = vpack.c.bf16 %v3544_v25, %v3540_v5  ;;  %v3549_v39 = vld [vmem:[#allocation11 + $0x248] sm:$0xff]  ;;  %v3572_v37 = vld [vmem:[#allocation11 + $0x300] sm:$0xff]  ;;  %v3574_v1 = vld [vmem:[#allocation11 + $0x310] sm:$0xff] }
 0x7ea   :  { %v3576_v38 = vld [vmem:[#allocation11 + $0x320] sm:$0xff]  ;;  %v3578_v5 = vld [vmem:[#allocation11 + $0x330] sm:$0xff] }
 0x7eb   :  { %v6776_v25 = vpack.c.bf16 %v3578_v5, %v3574_v1 }
 0x7ec   :  { %6681 = vmatpush1.bf16.msra.mxu0 %v6680_v33  ;;  %6745 = vmatpush1.bf16.msra.mxu1 %v6744_v46  ;;  %v3553_v33 = vld [vmem:[#allocation11 + $0x268] sm:$0xff]  ;;  %v3555_v46 = vld [vmem:[#allocation11 + $0x278] sm:$0xff] }
 0x7ed   :  { %6683 = vmatprep.subr.bf16.mxu0 %v6682_v60  ;;  %6747 = vmatprep.subr.bf16.mxu1 %v6746_v15  ;;  %v6698_v18 = vpack.c.bf16 %v3553_v33, %v3549_v39  ;;  %v6762_v12 = vpack.c.bf16 %v3555_v46, %v3551_v31  ;;  %v6700_v60 = vpack.c.bf16 %v3552_v10, %v3548_v34  ;;  %v3557_v15 = vld [vmem:[#allocation11 + $0x288] sm:$0xff]  ;;  %v3580_v39 = vld [vmem:[#allocation11 + $0x340] sm:$0xff]  ;;  %v3582_v46 = vld [vmem:[#allocation11 + $0x350] sm:$0xff] }
 0x7ee   :  { %v3584_v33 = vld [vmem:[#allocation11 + $0x360] sm:$0xff]  ;;  %v3586_v34 = vld [vmem:[#allocation11 + $0x370] sm:$0xff] }
 0x7ef   :  { %v6780_v10 = vpack.c.bf16 %v3586_v34, %v3582_v46 }
 0x7f0   :  { %6685 = vmatpush1.bf16.msra.mxu0 %v6684_v52  ;;  %6749 = vmatpush1.bf16.msra.mxu1 %v6748_v56  ;;  %v3561_v52 = vld [vmem:[#allocation11 + $0x2a8] sm:$0xff]  ;;  %v3563_v56 = vld [vmem:[#allocation11 + $0x2b8] sm:$0xff] }
 0x7f1   :  { %6687 = vmatprep.subr.bf16.mxu0 %v6686_v13  ;;  %6751 = vmatprep.subr.bf16.mxu1 %v6750_v61  ;;  %v6702_v50 = vpack.c.bf16 %v3561_v52, %v3557_v15  ;;  %v6766_v47 = vpack.c.bf16 %v3563_v56, %v3559_v23  ;;  %v6704_v13 = vpack.c.bf16 %v3560_v42, %v3556_v53  ;;  %v3565_v61 = vld [vmem:[#allocation11 + $0x2c8] sm:$0xff]  ;;  %v3588_v15 = vld [vmem:[#allocation11 + $0x380] sm:$0xff]  ;;  %v3590_v56 = vld [vmem:[#allocation11 + $0x390] sm:$0xff] }
 0x7f2   :  { %v3592_v52 = vld [vmem:[#allocation11 + $0x3a0] sm:$0xff]  ;;  %v3594_v53 = vld [vmem:[#allocation11 + $0x3b0] sm:$0xff]  ;;  %v3597_v42 = vld [vmem:[#allocation11 + $0x3c8] sm:$0xff] }
 0x7f4   :  { %6689 = vmatpush1.bf16.msra.mxu0 %v6688_v28  ;;  %6753 = vmatpush1.bf16.msra.mxu1 %v6752_v55  ;;  %v3569_v28 = vld [vmem:[#allocation11 + $0x2e8] sm:$0xff]  ;;  %v3571_v55 = vld [vmem:[#allocation11 + $0x2f8] sm:$0xff] }
 0x7f5   :  { %6691 = vmatprep.subr.bf16.mxu0 %v6690_v6  ;;  %6755 = vmatprep.subr.bf16.mxu1 %v6754_v62  ;;  %v6706_v59 = vpack.c.bf16 %v3569_v28, %v3565_v61  ;;  %v6770_v30 = vpack.c.bf16 %v3571_v55, %v3567_v8  ;;  %v6708_v6 = vpack.c.bf16 %v3568_v44, %v3564_v16  ;;  %v3573_v62 = vld [vmem:[#allocation11 + $0x308] sm:$0xff]  ;;  %v3596_v28 = vld [vmem:[#allocation11 + $0x3c0] sm:$0xff]  ;;  %v3602_v16 = vld [vmem:[#allocation11 + $0x3f0] sm:$0xff] }
 0x7f6   :  { %v6786_v61 = vpack.c.bf16 %v3603_v58, %v3599_v4  ;;  %v3600_v8 = vld [vmem:[#allocation11 + $0x3e0] sm:$0xff] }
 0x7f7   :  { %v6724_v55 = vpack.c.bf16 %v3600_v8, %v3596_v28 }
 0x7f8   :  { %6693 = vmatpush1.bf16.msra.mxu0 %v6692_v45  ;;  %6757 = vmatpush1.bf16.msra.mxu1 %v6756_v36  ;;  %v3577_v45 = vld [vmem:[#allocation11 + $0x328] sm:$0xff]  ;;  %v3579_v36 = vld [vmem:[#allocation11 + $0x338] sm:$0xff] }
 0x7f9   :  { %6695 = vmatprep.subr.bf16.mxu0 %v6694_v63  ;;  %6759 = vmatprep.subr.bf16.mxu1 %v6758_v48  ;;  %v6710_v41 = vpack.c.bf16 %v3577_v45, %v3573_v62  ;;  %v6774_v49 = vpack.c.bf16 %v3579_v36, %v3575_v32  ;;  %v6712_v63 = vpack.c.bf16 %v3576_v38, %v3572_v37  ;;  %v3581_v48 = vld [vmem:[#allocation11 + $0x348] sm:$0xff]  ;;  %v3127_v45 = vrot.slane %v9916_v29, 6 }
 0x7fa   :  { %v3128_v36 = vrot.slane %v9885_v26, 6 }
 0x7fc   :  { %6697 = vmatpush1.bf16.msra.mxu0 %v6696_v7  ;;  %6761 = vmatpush1.bf16.msra.mxu1 %v6760_v35  ;;  %v3585_v7 = vld [vmem:[#allocation11 + $0x368] sm:$0xff]  ;;  %v3587_v35 = vld [vmem:[#allocation11 + $0x378] sm:$0xff] }
 0x7fd   :  { %6699 = vmatprep.subr.bf16.mxu0 %v6698_v18  ;;  %6763 = vmatprep.subr.bf16.mxu1 %v6762_v12  ;;  %v6714_v19 = vpack.c.bf16 %v3585_v7, %v3581_v48  ;;  %v6778_v31 = vpack.c.bf16 %v3587_v35, %v3583_v0  ;;  %v6716_v18 = vpack.c.bf16 %v3584_v33, %v3580_v39  ;;  %v3589_v12 = vld [vmem:[#allocation11 + $0x388] sm:$0xff]  ;;  %v3129_v7 = vrot.slane %v9917_v14, 6 }
 0x800   :  { %6701 = vmatpush1.bf16.msra.mxu0 %v6700_v60  ;;  %6765 = vmatpush1.bf16.msra.mxu1 %v6764_v57  ;;  %v3593_v60 = vld [vmem:[#allocation11 + $0x3a8] sm:$0xff]  ;;  %v3595_v57 = vld [vmem:[#allocation11 + $0x3b8] sm:$0xff] }
 0x801   :  { %6703 = vmatprep.subr.bf16.mxu0 %v6702_v50  ;;  %6767 = vmatprep.subr.bf16.mxu1 %v6766_v47  ;;  %v6718_v21 = vpack.c.bf16 %v3593_v60, %v3589_v12  ;;  %v6782_v23 = vpack.c.bf16 %v3595_v57, %v3591_v22  ;;  %v6720_v50 = vpack.c.bf16 %v3592_v52, %v3588_v15 }
 0x802   :  { %v6784_v47 = vpack.c.bf16 %v3594_v53, %v3590_v56 }
 0x804   :  { %6705 = vmatpush1.bf16.msra.mxu0 %v6704_v13  ;;  %6769 = vmatpush1.bf16.msra.mxu1 %v6768_v2  ;;  %v3601_v13 = vld [vmem:[#allocation11 + $0x3e8] sm:$0xff] }
 0x805   :  { %6707 = vmatprep.subr.bf16.mxu0 %v6706_v59  ;;  %6771 = vmatprep.subr.bf16.mxu1 %v6770_v30  ;;  %v6722_v2 = vpack.c.bf16 %v3601_v13, %v3597_v42  ;;  %v3598_v59 = vld [vmem:[#allocation11 + $0x3d0] sm:$0xff]  ;;  %v3781_v30 = vld [vmem:[#allocation12 + $0x8] sm:$0xff] }
 0x806   :  { %v6788_v44 = vpack.c.bf16 %v3602_v16, %v3598_v59 }
 0x808   :  { %6709 = vmatpush1.bf16.msra.mxu0 %v6708_v6  ;;  %6773 = vmatpush1.bf16.msra.mxu1 %v6772_v27  ;;  %v3785_v6 = vld [vmem:[#allocation12 + $0x28] sm:$0xff]  ;;  %v3787_v27 = vld [vmem:[#allocation12 + $0x38] sm:$0xff] }
 0x809   :  { %6711 = vmatprep.subr.bf16.mxu0 %v6710_v41  ;;  %6775 = vmatprep.subr.bf16.mxu1 %v6774_v49  ;;  %v9047_v40 = vpack.c.bf16 %v3785_v6, %v3781_v30  ;;  %v9049_v62 = vpack.c.bf16 %v3787_v27, %v3783_v20  ;;  %v3780_v6 = vld [vmem:[#allocation12] sm:$0xff]  ;;  %v3782_v27 = vld [vmem:[#allocation12 + $0x10] sm:$0xff] }
 0x80a   :  { %v3784_v20 = vld [vmem:[#allocation12 + $0x20] sm:$0xff] }
 0x80c   :  { %6713 = vmatpush1.bf16.msra.mxu0 %v6712_v63  ;;  %6777 = vmatpush1.bf16.msra.mxu1 %v6776_v25  ;;  %v3130_v25 = vrot.slane %v9886_v54, 6 }
 0x80d   :  { %6715 = vmatprep.subr.bf16.mxu0 %v6714_v19  ;;  %6779 = vmatprep.subr.bf16.mxu1 %v6778_v31 }
 0x810   :  { %6717 = vmatpush1.bf16.msra.mxu0 %v6716_v18  ;;  %6781 = vmatpush1.bf16.msra.mxu1 %v6780_v10 }
 0x811   :  { %6719 = vmatprep.subr.bf16.mxu0 %v6718_v21  ;;  %6783 = vmatprep.subr.bf16.mxu1 %v6782_v23 }
 0x814   :  { %6721 = vmatpush1.bf16.msra.mxu0 %v6720_v50  ;;  %6785 = vmatpush1.bf16.msra.mxu1 %v6784_v47 }
 0x815   :  { %6723 = vmatprep.subr.bf16.mxu0 %v6722_v2  ;;  %6787 = vmatprep.subr.bf16.mxu1 %v6786_v61 }
 0x818   :  { %6725 = vmatpush1.bf16.msra.mxu0 %v6724_v55  ;;  %6789 = vmatpush1.bf16.msra.mxu1 %v6788_v44 }
 0x819   :  { %6791 = vmatprep.subr.bf16.mxu0 %v9047_v40  ;;  %6823 = vmatprep.subr.bf16.mxu1 %v9049_v62 }
 0x88e   :  { %v3201_v32 = vpop.f32.mrb[36].mxu0  ;;  %v3272_v41 = vpop.f32.mrb[36].mxu1 }
 0x88f   :  { %v3202_v37 = vadd.f32 %v3201_v32, %v3127_v45  ;;  %v3203_v38 = vpop.f32.mrb[37].mxu0  ;;  %v3274_v49 = vpop.f32.mrb[37].mxu1  ;;  %v3273_v19 = vadd.f32 %v3272_v41, %v3129_v7  ;;  %v3786_v45 = vld [vmem:[#allocation12 + $0x30] sm:$0xff]  ;;  %v3789_v32 = vld [vmem:[#allocation12 + $0x48] sm:$0xff] }
 0x890   :  { %v3204_v63 = vadd.f32 %v3203_v38, %v3128_v36  ;;  %v3275_v48 = vadd.f32 %v3274_v49, %v3130_v25  ;;  %v3793_v41 = vld [vmem:[#allocation12 + $0x68] sm:$0xff]  ;;  %v3791_v36 = vld [vmem:[#allocation12 + $0x58] sm:$0xff]  ;;  %v9063_v49 = vpack.c.bf16 %v3784_v20, %v3780_v6  ;;  %v3820_v20 = vld [vmem:[#allocation12 + $0x140] sm:$0xff] }
 0x891   :  { %v5486_v1 = vmul.f32 -1.442695, %v3202_v37  ;;  %v3795_v37 = vld [vmem:[#allocation12 + $0x78] sm:$0xff]  ;;  %v3472_v38 = vld [vmem:[#allocation2] sm:$0xff] }
 0x892   :  { %v5487_v5 = vmul.f32 -1.442695, %v3204_v63  ;;  %v5488_v0 = vmul.f32 -1.442695, %v3275_v48  ;;  %v9065_v63 = vpack.c.bf16 %v3786_v45, %v3782_v27  ;;  %v3794_v48 = vld [vmem:[#allocation12 + $0x70] sm:$0xff]  ;;  %v3797_v7 = vld [vmem:[#allocation12 + $0x88] sm:$0xff] }
 0x893   :  { %7590 = vpow2.f32 %v5486_v1  ;;  %v3792_v1 = vld [vmem:[#allocation12 + $0x60] sm:$0xff] }
 0x894   :  { %7592 = vpow2.f32 %v5487_v5  ;;  %v3790_v5 = vld [vmem:[#allocation12 + $0x50] sm:$0xff]  ;;  %v3824_v27 = vld [vmem:[#allocation12 + $0x160] sm:$0xff] }
 0x895   :  { %7594 = vpow2.f32 %v5488_v0  ;;  %v9067_v0 = vpack.c.bf16 %v3793_v41, %v3789_v32  ;;  %v3822_v41 = vld [vmem:[#allocation12 + $0x150] sm:$0xff] }
 0x896   :  { %7596 = vtanh.f32 %v3273_v19  ;;  %v9069_v19 = vpack.c.bf16 %v3795_v37, %v3791_v36  ;;  %v3826_v36 = vld [vmem:[#allocation12 + $0x170] sm:$0xff]  ;;  %v3829_v37 = vld [vmem:[#allocation12 + $0x188] sm:$0xff] }
 0x89d   :  { %v7591_v29 = vpop.eup %7590 }
 0x89e   :  { %v7593_v35 = vpop.eup %7592  ;;  %v3422_v39 = vadd.f32 1.0, %v7591_v29  ;;  %v3801_v29 = vld [vmem:[#allocation12 + $0xa8] sm:$0xff] }
 0x89f   :  { %v3428_v26 = vadd.f32 1.0, %v7593_v35  ;;  %v7595_v33 = vpop.eup %7594  ;;  %v3799_v35 = vld [vmem:[#allocation12 + $0x98] sm:$0xff] }
 0x8a0   :  { %7598 = vrcp.f32 %v3422_v39  ;;  %v7597_v31 = vpop.eup %7596  ;;  %v3435_v10 = vadd.f32 1.0, %v7595_v33  ;;  %v3803_v39 = vld [vmem:[#allocation12 + $0xb8] sm:$0xff] }
 0x8a1   :  { %7600 = vrcp.f32 %v3428_v26  ;;  %v3475_v26 = vld [vmem:[#allocation2 + $0x18] sm:$0xff] }
 0x8a2   :  { %7602 = vrcp.f32 %v3435_v10  ;;  %v9077_v10 = vpack.c.bf16 %v3801_v29, %v3797_v7  ;;  %v3832_v7 = vld [vmem:[#allocation12 + $0x1a0] sm:$0xff] }
 0x8aa   :  { %v7599_v18 = vpop.eup %7598 }
 0x8ab   :  { %v7601_v46 = vpop.eup %7600  ;;  %v3439_v34 = vmul.f32 %v7599_v18, %v7597_v31  ;;  %v9075_v31 = vpack.c.bf16 %v3794_v48, %v3790_v5  ;;  %v3796_v18 = vld [vmem:[#allocation12 + $0x80] sm:$0xff]  ;;  %v9123_v5 = vpack.c.bf16 %v3824_v27, %v3820_v20 }
 0x8ac   :  { %v3438_v54 = vmul.f32 %v7601_v46, %v9005_v43  ;;  %v7603_v56 = vpop.eup %7602  ;;  %v3800_v46 = vld [vmem:[#allocation12 + $0xa0] sm:$0xff] }
 0x8ad   :  { %v3828_v48 = vld [vmem:[#allocation12 + $0x180] sm:$0xff] }
 0x8ae   :  { %v3440_v12 = vadd.f32 %v3439_v34, %v3438_v54  ;;  %v3343_v14 = vpop.f32.mrb[38].mxu0  ;;  %v3414_v60 = vpop.f32.mrb[38].mxu1  ;;  %v3798_v34 = vld [vmem:[#allocation12 + $0x90] sm:$0xff]  ;;  %v9079_v54 = vpack.c.bf16 %v3803_v39, %v3799_v35 }
 0x8af   :  { %v3344_v22 = vadd.f32 %v3343_v14, %v9888_v3  ;;  %v3345_v21 = vpop.f32.mrb[39].mxu0  ;;  %v3416_v57 = vpop.f32.mrb[39].mxu1  ;;  %v3415_v47 = vadd.f32 %v3414_v60, %v9860_v17  ;;  %v3805_v14 = vld [vmem:[#allocation12 + $0xc8] sm:$0xff]  ;;  %v3830_v39 = vld [vmem:[#allocation12 + $0x190] sm:$0xff] }
 0x8b0   :  { %7604 = vtanh.f32 %v3440_v12  ;;  %v3346_v15 = vadd.f32 %v3345_v21, %v9918_v51  ;;  %v3417_v50 = vadd.f32 %v3416_v57, %v9859_v24  ;;  %v3802_v12 = vld [vmem:[#allocation12 + $0xb0] sm:$0xff]  ;;  %v3809_v60 = vld [vmem:[#allocation12 + $0xe8] sm:$0xff]  ;;  %v3807_v21 = vld [vmem:[#allocation12 + $0xd8] sm:$0xff] }
 0x8b1   :  { %v5489_v52 = vmul.f32 -1.442695, %v3344_v22  ;;  %v3811_v57 = vld [vmem:[#allocation12 + $0xf8] sm:$0xff] }
 0x8b2   :  { %v5490_v23 = vmul.f32 -1.442695, %v3346_v15  ;;  %v5491_v43 = vmul.f32 -1.442695, %v3417_v50  ;;  %v9085_v15 = vpack.c.bf16 %v3800_v46, %v3796_v18  ;;  %v3808_v50 = vld [vmem:[#allocation12 + $0xe0] sm:$0xff]  ;;  %v3837_v18 = vld [vmem:[#allocation12 + $0x1c8] sm:$0xff] }
 0x8b3   :  { %7606 = vpow2.f32 %v5489_v52  ;;  %v9087_v52 = vpack.c.bf16 %v3802_v12, %v3798_v34  ;;  %v3841_v46 = vld [vmem:[#allocation12 + $0x1e8] sm:$0xff]  ;;  %v3839_v34 = vld [vmem:[#allocation12 + $0x1d8] sm:$0xff] }
 0x8b4   :  { %7608 = vpow2.f32 %v5490_v23  ;;  %v3804_v23 = vld [vmem:[#allocation12 + $0xc0] sm:$0xff]  ;;  %v3843_v12 = vld [vmem:[#allocation12 + $0x1f8] sm:$0xff] }
 0x8b5   :  { %7610 = vpow2.f32 %v5491_v43  ;;  %v3806_v43 = vld [vmem:[#allocation12 + $0xd0] sm:$0xff] }
 0x8b6   :  { %7612 = vtanh.f32 %v3415_v47  ;;  %v3813_v47 = vld [vmem:[#allocation12 + $0x108] sm:$0xff] }
 0x8ba   :  { %v7605_v53 = vpop.eup %7604 }
 0x8bb   :  { %v3442_v42 = vmul.f32 %v7605_v53, %v7603_v56  ;;  %v9091_v56 = vpack.c.bf16 %v3809_v60, %v3805_v14  ;;  %v9093_v53 = vpack.c.bf16 %v3811_v57, %v3807_v21  ;;  %v9135_v14 = vpack.c.bf16 %v3832_v7, %v3828_v48 }
 0x8bc   :  { %v9141_v21 = vpack.c.bf16 %v3841_v46, %v3837_v18  ;;  %v9143_v57 = vpack.c.bf16 %v3843_v12, %v3839_v34 }
 0x8bd   :  { %v7607_v13 = vpop.eup %7606  ;;  %v3468_v4 = vrot.slane %v3442_v42, 2  ;;  %v3810_v42 = vld [vmem:[#allocation12 + $0xf0] sm:$0xff] }
 0x8be   :  { %v7609_v3 = vpop.eup %7608  ;;  %v3446_v58 = vadd.f32 1.0, %v7607_v13  ;;  %v3817_v13 = vld [vmem:[#allocation12 + $0x128] sm:$0xff] }
 0x8bf   :  { %3470 = vst [vmem:[#allocation2 + $0x10] sm:$0xc0] %v3468_v4  ;;  %v3452_v51 = vadd.f32 1.0, %v7609_v3  ;;  %v7611_v2 = vpop.eup %7610  ;;  %v3815_v4 = vld [vmem:[#allocation12 + $0x118] sm:$0xff] }
 0x8c0   :  { %7614 = vrcp.f32 %v3446_v58  ;;  %v7613_v61 = vpop.eup %7612  ;;  %v3459_v59 = vadd.f32 1.0, %v7611_v2  ;;  %v3819_v3 = vld [vmem:[#allocation12 + $0x138] sm:$0xff]  ;;  %v9099_v58 = vpack.c.bf16 %v3808_v50, %v3804_v23  ;;  %v3812_v2 = vld [vmem:[#allocation12 + $0x100] sm:$0xff]  ;;  %v3838_v50 = vld [vmem:[#allocation12 + $0x1d0] sm:$0xff] }
 0x8c1   :  { %7616 = vrcp.f32 %v3452_v51  ;;  %v9101_v51 = vpack.c.bf16 %v3810_v42, %v3806_v43  ;;  %v3840_v23 = vld [vmem:[#allocation12 + $0x1e0] sm:$0xff]  ;;  %v3842_v43 = vld [vmem:[#allocation12 + $0x1f0] sm:$0xff] }
 0x8c2   :  { %7618 = vrcp.f32 %v3459_v59  ;;  %v3818_v59 = vld [vmem:[#allocation12 + $0x130] sm:$0xff] }
 0x8c6   :  { %v3474_v22 = vld [vmem:[#allocation2 + $0x10] sm:$0xff] }
 0x8ca   :  { %v7615_v28 = vpop.eup %7614 }
 0x8cb   :  { %v7617_v24 = vpop.eup %7616  ;;  %v3463_v8 = vmul.f32 %v7615_v28, %v7613_v61  ;;  %v3816_v61 = vld [vmem:[#allocation12 + $0x120] sm:$0xff]  ;;  %v9105_v28 = vpack.c.bf16 %v3817_v13, %v3813_v47  ;;  %v9149_v47 = vpack.c.bf16 %v3842_v43, %v3838_v50  ;;  %v3604_v13 = vld [vmem:[%s9575_s9] sm:$0xf] }
 0x8cc   :  { %v3462_v55 = vmul.f32 %v7617_v24, %v9030_v11  ;;  %v7619_v17 = vpop.eup %7618  ;;  %v3788_v11 = vld [vmem:[#allocation12 + $0x40] sm:$0xff]  ;;  %v9107_v24 = vpack.c.bf16 %v3819_v3, %v3815_v4 }
 0x8cd   :  { %v9073_v33 = vpack.c.bf16 %v3792_v1, %v3788_v11  ;;  %v3831_v11 = vld [vmem:[#allocation12 + $0x198] sm:$0xff] }
 0x8ce   :  { %v3464_v16 = vadd.f32 %v3463_v8, %v3462_v55  ;;  %v3814_v8 = vld [vmem:[#allocation12 + $0x110] sm:$0xff]  ;;  %v3821_v55 = vld [vmem:[#allocation12 + $0x148] sm:$0xff]  ;;  %v3835_v1 = vld [vmem:[#allocation12 + $0x1b8] sm:$0xff] }
 0x8cf   :  { %v9113_v6 = vpack.c.bf16 %v3818_v59, %v3814_v8  ;;  %v9131_v35 = vpack.c.bf16 %v3835_v1, %v3831_v11  ;;  %v9919_v8 = vld [vmem:[#allocation59_spill] sm:$0xff] }
 0x8d0   :  { %7620 = vtanh.f32 %v3464_v16  ;;  %v3825_v16 = vld [vmem:[#allocation12 + $0x168] sm:$0xff]  ;;  %v9920_v59 = vsub.s32 0, %v9919_v8  ;;  %v9923_v27 = vsub.s32 3, %v9919_v8 }
 0x8d1   :  { %v9117_v45 = vpack.c.bf16 %v3825_v16, %v3821_v55  ;;  %v9921_v16 = vsub.s32 2, %v9919_v8 }
 0x8d2   :  { %v3609_v55 = vrot.slane %v3604_v13, %v9920_v59 }
 0x8da   :  { %v7621_v44 = vpop.eup %7620 }
 0x8db   :  { %v3466_v30 = vmul.f32 %v7621_v44, %v7619_v17  ;;  %v3823_v17 = vld [vmem:[#allocation12 + $0x158] sm:$0xff] }
 0x8dc   :  { %v3827_v44 = vld [vmem:[#allocation12 + $0x178] sm:$0xff] }
 0x8dd   :  { %3471 = vst [vmem:[#allocation2 + $0x8] sm:$0x3] %v3466_v30  ;;  %v9111_v30 = vpack.c.bf16 %v3816_v61, %v3812_v2  ;;  %v9119_v32 = vpack.c.bf16 %v3827_v44, %v3823_v17  ;;  %v3617_v17 = vrot.slane %v3604_v13, %v9921_v16  ;;  %v9922_v44 = vsub.s32 1, %v9919_v8 }
 0x8df   :  { %v3613_v20 = vrot.slane %v3604_v13, %v9922_v44 }
 0x8e4   :  { %v3473_v25 = vld [vmem:[#allocation2 + $0x8] sm:$0xff] }
 0x8e5   :  { %3690 = vmatprep.mubr.f32.mxu0 %v3473_v25  ;;  %3767 = vmatprep.mubr.f32.mxu1 %v3473_v25  ;;  %v9125_v25 = vpack.c.bf16 %v3826_v36, %v3822_v41  ;;  %v3621_v41 = vrot.slane %v3604_v13, %v9923_v27 }
 0x8e6   :  { %3691 = vmatmul.mubr.f32.vlgmr.msra.gmra.mrb[40].mxu0 %v3472_v38  ;;  %3768 = vmatmul.mubr.f32.vlgmr.msra.gmra.mrb[40].mxu1 %v3472_v38  ;;  %v3833_v38 = vld [vmem:[#allocation12 + $0x1a8] sm:$0xff] }
 0x8e7   :  { %6793 = vmatpush1.bf16.msra.mxu0 %v9063_v49  ;;  %6825 = vmatpush1.bf16.msra.mxu1 %v9065_v63  ;;  %v9129_v29 = vpack.c.bf16 %v3833_v38, %v3829_v37 }
 0x8e8   :  { %3696 = vmatprep.mubr.f32.mxu0 %v3475_v26  ;;  %3773 = vmatprep.mubr.f32.mxu1 %v3475_v26  ;;  %v3834_v26 = vld [vmem:[#allocation12 + $0x1b0] sm:$0xff] }
 0x8e9   :  { %6795 = vmatprep.subr.bf16.mxu0 %v9067_v0  ;;  %6827 = vmatprep.subr.bf16.mxu1 %v9069_v19  ;;  %v9137_v60 = vpack.c.bf16 %v3834_v26, %v3830_v39 }
 0x8ea   :  { %3697 = vmatmul.mubr.f32.gmra.mrb[42].mxu0 %v3474_v22  ;;  %3774 = vmatmul.mubr.f32.gmra.mrb[42].mxu1 %v3474_v22  ;;  %v3836_v22 = vld [vmem:[#allocation12 + $0x1c0] sm:$0xff] }
 0x8eb   :  { %6797 = vmatpush1.bf16.msra.mxu0 %v9073_v33  ;;  %6829 = vmatpush1.bf16.msra.mxu1 %v9075_v31  ;;  %v9147_v42 = vpack.c.bf16 %v3840_v23, %v3836_v22 }
 0x8ec   :  { %6799 = vmatprep.subr.bf16.mxu0 %v9077_v10  ;;  %6831 = vmatprep.subr.bf16.mxu1 %v9079_v54 }
 0x8ed   :  { %3908 = vmatprep.mubr.f32.mxu0 %v9717_v9  ;;  %3979 = vmatprep.mubr.f32.mxu1 %v9717_v9 }
 0x8ef   :  { %6801 = vmatpush1.bf16.msra.mxu0 %v9085_v15  ;;  %6833 = vmatpush1.bf16.msra.mxu1 %v9087_v52 }
 0x8f0   :  { %6803 = vmatprep.subr.bf16.mxu0 %v9091_v56  ;;  %6835 = vmatprep.subr.bf16.mxu1 %v9093_v53 }
 0x8f3   :  { %6805 = vmatpush1.bf16.msra.mxu0 %v9099_v58  ;;  %6837 = vmatpush1.bf16.msra.mxu1 %v9101_v51 }
 0x8f4   :  { %6807 = vmatprep.subr.bf16.mxu0 %v9105_v28  ;;  %6839 = vmatprep.subr.bf16.mxu1 %v9107_v24 }
 0x8f7   :  { %6809 = vmatpush1.bf16.msra.mxu0 %v9111_v30  ;;  %6841 = vmatpush1.bf16.msra.mxu1 %v9113_v6 }
 0x8f8   :  { %6811 = vmatprep.subr.bf16.mxu0 %v9117_v45  ;;  %6843 = vmatprep.subr.bf16.mxu1 %v9119_v32 }
 0x8fb   :  { %6813 = vmatpush1.bf16.msra.mxu0 %v9123_v5  ;;  %6845 = vmatpush1.bf16.msra.mxu1 %v9125_v25 }
 0x8fc   :  { %6815 = vmatprep.subr.bf16.mxu0 %v9129_v29  ;;  %6847 = vmatprep.subr.bf16.mxu1 %v9131_v35 }
 0x8ff   :  { %6817 = vmatpush1.bf16.msra.mxu0 %v9135_v14  ;;  %6849 = vmatpush1.bf16.msra.mxu1 %v9137_v60 }
 0x900   :  { %6819 = vmatprep.subr.bf16.mxu0 %v9141_v21  ;;  %6851 = vmatprep.subr.bf16.mxu1 %v9143_v57 }
 0x903   :  { %6821 = vmatpush1.bf16.msra.mxu0 %v9147_v42  ;;  %6853 = vmatpush1.bf16.msra.mxu1 %v9149_v47 }
 0x904   :  { %6855 = vmatprep.subr.bf16.mxu0 %v9047_v40  ;;  %6887 = vmatprep.subr.bf16.mxu1 %v9049_v62 }
 0x906   :  { %3909 = vmatmul.mubr.f32.vlgmr.msra.gmra.mrb[44].mxu0 %v9717_v9  ;;  %3980 = vmatmul.mubr.f32.vlgmr.msra.gmra.mrb[44].mxu1 %v9717_v9 }
 0x907   :  { %6857 = vmatpush1.bf16.msra.mxu0 %v9063_v49  ;;  %6889 = vmatpush1.bf16.msra.mxu1 %v9065_v63 }
 0x908   :  { %6859 = vmatprep.subr.bf16.mxu0 %v9067_v0  ;;  %6891 = vmatprep.subr.bf16.mxu1 %v9069_v19 }
 0x909   :  { %4086 = vmatprep.mubr.f32.mxu0 %v9717_v9  ;;  %4157 = vmatprep.mubr.f32.mxu1 %v9717_v9 }
 0x90b   :  { %6861 = vmatpush1.bf16.msra.mxu0 %v9073_v33  ;;  %6893 = vmatpush1.bf16.msra.mxu1 %v9075_v31 }
 0x90c   :  { %6863 = vmatprep.subr.bf16.mxu0 %v9077_v10  ;;  %6895 = vmatprep.subr.bf16.mxu1 %v9079_v54 }
 0x90f   :  { %6865 = vmatpush1.bf16.msra.mxu0 %v9085_v15  ;;  %6897 = vmatpush1.bf16.msra.mxu1 %v9087_v52 }
 0x910   :  { %6867 = vmatprep.subr.bf16.mxu0 %v9091_v56  ;;  %6899 = vmatprep.subr.bf16.mxu1 %v9093_v53 }
 0x913   :  { %6869 = vmatpush1.bf16.msra.mxu0 %v9099_v58  ;;  %6901 = vmatpush1.bf16.msra.mxu1 %v9101_v51 }
 0x914   :  { %6871 = vmatprep.subr.bf16.mxu0 %v9105_v28  ;;  %6903 = vmatprep.subr.bf16.mxu1 %v9107_v24 }
 0x917   :  { %6873 = vmatpush1.bf16.msra.mxu0 %v9111_v30  ;;  %6905 = vmatpush1.bf16.msra.mxu1 %v9113_v6 }
 0x918   :  { %6875 = vmatprep.subr.bf16.mxu0 %v9117_v45  ;;  %6907 = vmatprep.subr.bf16.mxu1 %v9119_v32 }
 0x91b   :  { %6877 = vmatpush1.bf16.msra.mxu0 %v9123_v5  ;;  %6909 = vmatpush1.bf16.msra.mxu1 %v9125_v25 }
 0x91c   :  { %6879 = vmatprep.subr.bf16.mxu0 %v9129_v29  ;;  %6911 = vmatprep.subr.bf16.mxu1 %v9131_v35 }
 0x91f   :  { %6881 = vmatpush1.bf16.msra.mxu0 %v9135_v14  ;;  %6913 = vmatpush1.bf16.msra.mxu1 %v9137_v60 }
 0x920   :  { %6883 = vmatprep.subr.bf16.mxu0 %v9141_v21  ;;  %6915 = vmatprep.subr.bf16.mxu1 %v9143_v57 }
 0x923   :  { %6885 = vmatpush1.bf16.msra.mxu0 %v9147_v42  ;;  %6917 = vmatpush1.bf16.msra.mxu1 %v9149_v47 }
 0x924   :  { %6919 = vmatprep.subr.bf16.mxu0 %v9047_v40  ;;  %6951 = vmatprep.subr.bf16.mxu1 %v9049_v62 }
 0x9b9   :  { %v3692_v4 = vpop.f32.mrb[40].mxu0  ;;  %v3769_v3 = vpop.f32.mrb[40].mxu1 }
 0x9ba   :  { %v3694_v2 = vpop.f32.mrb[41].mxu0  ;;  %v3771_v61 = vpop.f32.mrb[41].mxu1  ;;  %v9212_v26 = vadd.f32 %v3692_v4, %v3609_v55  ;;  %v9214_v18 = vadd.f32 %v3769_v3, %v3617_v17 }
 0x9bb   :  { %v9216_v46 = vadd.f32 %v3694_v2, %v3613_v20  ;;  %v9218_v34 = vadd.f32 %v3771_v61, %v3621_v41 }
 0x9bd   :  { %v3698_v36 = vpop.f32.mrb[42].mxu0  ;;  %v3775_v37 = vpop.f32.mrb[42].mxu1 }
 0x9be   :  { %v9204_v38 = vadd.f32 %v3698_v36, %v3609_v55  ;;  %v9206_v11 = vadd.f32 %v3775_v37, %v3617_v17  ;;  %v3700_v1 = vpop.f32.mrb[43].mxu0  ;;  %v3777_v48 = vpop.f32.mrb[43].mxu1 }
 0x9bf   :  { %v9208_v7 = vadd.f32 %v3700_v1, %v3613_v20  ;;  %v9210_v39 = vadd.f32 %v3777_v48, %v3621_v41 }
 0x9d9   :  { %v3910_v12 = vpop.f32.mrb[44].mxu0  ;;  %v3981_v22 = vpop.f32.mrb[44].mxu1 }
 0x9da   :  { %v3911_v23 = vadd.f32 %v3910_v12, %v9212_v26  ;;  %v3982_v50 = vadd.f32 %v3981_v22, %v9214_v18  ;;  %v3912_v43 = vpop.f32.mrb[45].mxu0  ;;  %v3983_v13 = vpop.f32.mrb[45].mxu1 }
 0x9db   :  { %v3913_v8 = vadd.f32 %v3912_v43, %v9216_v46  ;;  %v3984_v59 = vadd.f32 %v3983_v13, %v9218_v34  ;;  %v4016_v43 = vrot.slane %v9214_v18, 2 }
 0x9dc   :  { %v5492_v4 = vmul.f32 -1.442695, %v3911_v23 }
 0x9dd   :  { %v5493_v55 = vmul.f32 -1.442695, %v3913_v8  ;;  %v5494_v3 = vmul.f32 -1.442695, %v3984_v59  ;;  %v4015_v59 = vrot.slane %v9216_v46, 2 }
 0x9de   :  { %7622 = vpow2.f32 %v5492_v4  ;;  %v4017_v4 = vrot.slane %v9218_v34, 2 }
 0x9df   :  { %7624 = vpow2.f32 %v5493_v55 }
 0x9e0   :  { %7626 = vpow2.f32 %v5494_v3 }
 0x9e1   :  { %7628 = vtanh.f32 %v3982_v50  ;;  %v4014_v50 = vrot.slane %v9212_v26, 2 }
 0x9e8   :  { %v7623_v2 = vpop.eup %7622 }
 0x9e9   :  { %v7625_v61 = vpop.eup %7624  ;;  %v3989_v16 = vadd.f32 1.0, %v7623_v2 }
 0x9ea   :  { %v3995_v17 = vadd.f32 1.0, %v7625_v61  ;;  %v7627_v44 = vpop.eup %7626 }
 0x9eb   :  { %7630 = vrcp.f32 %v3989_v16  ;;  %v7629_v20 = vpop.eup %7628  ;;  %v4002_v37 = vadd.f32 1.0, %v7627_v44 }
 0x9ec   :  { %7632 = vrcp.f32 %v3995_v17 }
 0x9ed   :  { %7634 = vrcp.f32 %v4002_v37 }
 0x9f5   :  { %v7631_v27 = vpop.eup %7630 }
 0x9f6   :  { %v7633_v41 = vpop.eup %7632  ;;  %v4006_v36 = vmul.f32 %v7631_v27, %v7629_v20 }
 0x9f7   :  { %v4005_v1 = vmul.f32 0.0, %v7633_v41  ;;  %v7635_v12 = vpop.eup %7634 }
 0x9f9   :  { %v9224_v48 = vadd.f32 %v4006_v36, %v4005_v1 }
 0x9fb   :  { %7636 = vtanh.f32 %v9224_v48 }
 0xa05   :  { %v7637_v22 = vpop.eup %7636 }
 0xa06   :  { %v4009_v23 = vmul.f32 %v7637_v22, %v7635_v12 }
 0xa08   :  { %4087 = vmatmul.mubr.f32.vlgmr.msra.gmra.mrb[46].mxu0 %v4009_v23  ;;  %4158 = vmatmul.mubr.f32.vlgmr.msra.gmra.mrb[46].mxu1 %v4009_v23 }
 0xa09   :  { %6921 = vmatpush1.bf16.msra.mxu0 %v9063_v49  ;;  %6953 = vmatpush1.bf16.msra.mxu1 %v9065_v63 }
 0xa0a   :  { %6923 = vmatprep.subr.bf16.mxu0 %v9067_v0  ;;  %6955 = vmatprep.subr.bf16.mxu1 %v9069_v19 }
 0xa0b   :  { %4260 = vmatprep.mubr.f32.mxu0 %v9717_v9  ;;  %4331 = vmatprep.mubr.f32.mxu1 %v9717_v9 }
 0xa0d   :  { %6925 = vmatpush1.bf16.msra.mxu0 %v9073_v33  ;;  %6957 = vmatpush1.bf16.msra.mxu1 %v9075_v31 }
 0xa0e   :  { %6927 = vmatprep.subr.bf16.mxu0 %v9077_v10  ;;  %6959 = vmatprep.subr.bf16.mxu1 %v9079_v54 }
 0xa11   :  { %6929 = vmatpush1.bf16.msra.mxu0 %v9085_v15  ;;  %6961 = vmatpush1.bf16.msra.mxu1 %v9087_v52 }
 0xa12   :  { %6931 = vmatprep.subr.bf16.mxu0 %v9091_v56  ;;  %6963 = vmatprep.subr.bf16.mxu1 %v9093_v53 }
 0xa15   :  { %6933 = vmatpush1.bf16.msra.mxu0 %v9099_v58  ;;  %6965 = vmatpush1.bf16.msra.mxu1 %v9101_v51 }
 0xa16   :  { %6935 = vmatprep.subr.bf16.mxu0 %v9105_v28  ;;  %6967 = vmatprep.subr.bf16.mxu1 %v9107_v24 }
 0xa19   :  { %6937 = vmatpush1.bf16.msra.mxu0 %v9111_v30  ;;  %6969 = vmatpush1.bf16.msra.mxu1 %v9113_v6 }
 0xa1a   :  { %6939 = vmatprep.subr.bf16.mxu0 %v9117_v45  ;;  %6971 = vmatprep.subr.bf16.mxu1 %v9119_v32 }
 0xa1d   :  { %6941 = vmatpush1.bf16.msra.mxu0 %v9123_v5  ;;  %6973 = vmatpush1.bf16.msra.mxu1 %v9125_v25 }
 0xa1e   :  { %6943 = vmatprep.subr.bf16.mxu0 %v9129_v29  ;;  %6975 = vmatprep.subr.bf16.mxu1 %v9131_v35 }
 0xa21   :  { %6945 = vmatpush1.bf16.msra.mxu0 %v9135_v14  ;;  %6977 = vmatpush1.bf16.msra.mxu1 %v9137_v60 }
 0xa22   :  { %6947 = vmatprep.subr.bf16.mxu0 %v9141_v21  ;;  %6979 = vmatprep.subr.bf16.mxu1 %v9143_v57 }
 0xa25   :  { %6949 = vmatpush1.bf16.msra.mxu0 %v9147_v42  ;;  %6981 = vmatpush1.bf16.msra.mxu1 %v9149_v47 }
 0xa26   :  { %6983 = vmatprep.subr.bf16.mxu0 %v9047_v40  ;;  %7015 = vmatprep.subr.bf16.mxu1 %v9049_v62 }
 0xadb   :  { %v4088_v13 = vpop.f32.mrb[46].mxu0  ;;  %v4159_v8 = vpop.f32.mrb[46].mxu1 }
 0xadc   :  { %v4089_v55 = vadd.f32 %v4088_v13, %v4014_v50  ;;  %v4160_v3 = vadd.f32 %v4159_v8, %v4016_v43  ;;  %v4090_v2 = vpop.f32.mrb[47].mxu0  ;;  %v4161_v61 = vpop.f32.mrb[47].mxu1 }
 0xadd   :  { %v4091_v16 = vadd.f32 %v4090_v2, %v4015_v59  ;;  %v4162_v17 = vadd.f32 %v4161_v61, %v4017_v4 }
 0xade   :  { %v5495_v44 = vmul.f32 -1.442695, %v4089_v55 }
 0xadf   :  { %v5496_v20 = vmul.f32 -1.442695, %v4091_v16  ;;  %v5497_v27 = vmul.f32 -1.442695, %v4162_v17  ;;  %v4189_v17 = vrot.slane %v9216_v46, 4 }
 0xae0   :  { %7638 = vpow2.f32 %v5495_v44  ;;  %v4191_v44 = vrot.slane %v9218_v34, 4 }
 0xae1   :  { %7640 = vpow2.f32 %v5496_v20 }
 0xae2   :  { %7642 = vpow2.f32 %v5497_v27 }
 0xae3   :  { %7644 = vtanh.f32 %v4160_v3  ;;  %v4190_v3 = vrot.slane %v9214_v18, 4 }
 0xaea   :  { %v7639_v41 = vpop.eup %7638 }
 0xaeb   :  { %v7641_v36 = vpop.eup %7640  ;;  %v4167_v37 = vadd.f32 1.0, %v7639_v41 }
 0xaec   :  { %v4173_v1 = vadd.f32 1.0, %v7641_v36  ;;  %v7643_v12 = vpop.eup %7642 }
 0xaed   :  { %7646 = vrcp.f32 %v4167_v37  ;;  %v7645_v22 = vpop.eup %7644  ;;  %v4180_v13 = vadd.f32 1.0, %v7643_v12 }
 0xaee   :  { %7648 = vrcp.f32 %v4173_v1 }
 0xaef   :  { %7650 = vrcp.f32 %v4180_v13 }
 0xaf7   :  { %v7647_v23 = vpop.eup %7646 }
 0xaf8   :  { %v7649_v50 = vpop.eup %7648  ;;  %v4184_v43 = vmul.f32 %v7647_v23, %v7645_v22 }
 0xaf9   :  { %v4183_v8 = vmul.f32 %v7649_v50, %v9224_v48  ;;  %v7651_v4 = vpop.eup %7650  ;;  %v4188_v48 = vrot.slane %v9212_v26, 4 }
 0xafb   :  { %v9266_v59 = vadd.f32 %v4184_v43, %v4183_v8 }
 0xafd   :  { %7652 = vtanh.f32 %v9266_v59 }
 0xb07   :  { %v7653_v55 = vpop.eup %7652 }
 0xb08   :  { %v4187_v2 = vmul.f32 %v7653_v55, %v7651_v4 }
 0xb0a   :  { %4261 = vmatmul.mubr.f32.vlgmr.msra.gmra.mrb[48].mxu0 %v4187_v2  ;;  %4332 = vmatmul.mubr.f32.vlgmr.msra.gmra.mrb[48].mxu1 %v4187_v2 }
 0xb0b   :  { %6985 = vmatpush1.bf16.msra.mxu0 %v9063_v49  ;;  %7017 = vmatpush1.bf16.msra.mxu1 %v9065_v63 }
 0xb0c   :  { %6987 = vmatprep.subr.bf16.mxu0 %v9067_v0  ;;  %7019 = vmatprep.subr.bf16.mxu1 %v9069_v19 }
 0xb0d   :  { %4434 = vmatprep.mubr.f32.mxu0 %v9717_v9  ;;  %4505 = vmatprep.mubr.f32.mxu1 %v9717_v9 }
 0xb0f   :  { %6989 = vmatpush1.bf16.msra.mxu0 %v9073_v33  ;;  %7021 = vmatpush1.bf16.msra.mxu1 %v9075_v31 }
 0xb10   :  { %6991 = vmatprep.subr.bf16.mxu0 %v9077_v10  ;;  %7023 = vmatprep.subr.bf16.mxu1 %v9079_v54 }
 0xb13   :  { %6993 = vmatpush1.bf16.msra.mxu0 %v9085_v15  ;;  %7025 = vmatpush1.bf16.msra.mxu1 %v9087_v52 }
 0xb14   :  { %6995 = vmatprep.subr.bf16.mxu0 %v9091_v56  ;;  %7027 = vmatprep.subr.bf16.mxu1 %v9093_v53 }
 0xb17   :  { %6997 = vmatpush1.bf16.msra.mxu0 %v9099_v58  ;;  %7029 = vmatpush1.bf16.msra.mxu1 %v9101_v51 }
 0xb18   :  { %6999 = vmatprep.subr.bf16.mxu0 %v9105_v28  ;;  %7031 = vmatprep.subr.bf16.mxu1 %v9107_v24 }
 0xb1b   :  { %7001 = vmatpush1.bf16.msra.mxu0 %v9111_v30  ;;  %7033 = vmatpush1.bf16.msra.mxu1 %v9113_v6 }
 0xb1c   :  { %7003 = vmatprep.subr.bf16.mxu0 %v9117_v45  ;;  %7035 = vmatprep.subr.bf16.mxu1 %v9119_v32 }
 0xb1f   :  { %7005 = vmatpush1.bf16.msra.mxu0 %v9123_v5  ;;  %7037 = vmatpush1.bf16.msra.mxu1 %v9125_v25 }
 0xb20   :  { %7007 = vmatprep.subr.bf16.mxu0 %v9129_v29  ;;  %7039 = vmatprep.subr.bf16.mxu1 %v9131_v35 }
 0xb23   :  { %7009 = vmatpush1.bf16.msra.mxu0 %v9135_v14  ;;  %7041 = vmatpush1.bf16.msra.mxu1 %v9137_v60 }
 0xb24   :  { %7011 = vmatprep.subr.bf16.mxu0 %v9141_v21  ;;  %7043 = vmatprep.subr.bf16.mxu1 %v9143_v57 }
 0xb27   :  { %7013 = vmatpush1.bf16.msra.mxu0 %v9147_v42  ;;  %7045 = vmatpush1.bf16.msra.mxu1 %v9149_v47 }
 0xb28   :  { %7047 = vmatprep.subr.bf16.mxu0 %v9047_v40  ;;  %7079 = vmatprep.subr.bf16.mxu1 %v9049_v62 }
 0xbdd   :  { %v4262_v61 = vpop.f32.mrb[48].mxu0  ;;  %v4333_v16 = vpop.f32.mrb[48].mxu1 }
 0xbde   :  { %v4263_v20 = vadd.f32 %v4262_v61, %v4188_v48  ;;  %v4334_v27 = vadd.f32 %v4333_v16, %v4190_v3  ;;  %v4264_v41 = vpop.f32.mrb[49].mxu0  ;;  %v4335_v36 = vpop.f32.mrb[49].mxu1 }
 0xbdf   :  { %v4265_v37 = vadd.f32 %v4264_v41, %v4189_v17  ;;  %v4336_v1 = vadd.f32 %v4335_v36, %v4191_v44 }
 0xbe0   :  { %v5498_v12 = vmul.f32 -1.442695, %v4263_v20 }
 0xbe1   :  { %v5499_v22 = vmul.f32 -1.442695, %v4265_v37  ;;  %v5500_v23 = vmul.f32 -1.442695, %v4336_v1  ;;  %v4363_v1 = vrot.slane %v9216_v46, 6 }
 0xbe2   :  { %7654 = vpow2.f32 %v5498_v12  ;;  %v4365_v12 = vrot.slane %v9218_v34, 6 }
 0xbe3   :  { %7656 = vpow2.f32 %v5499_v22 }
 0xbe4   :  { %7658 = vpow2.f32 %v5500_v23 }
 0xbe5   :  { %7660 = vtanh.f32 %v4334_v27  ;;  %v4364_v27 = vrot.slane %v9214_v18, 6 }
 0xbec   :  { %v7655_v50 = vpop.eup %7654 }
 0xbed   :  { %v7657_v43 = vpop.eup %7656  ;;  %v4341_v13 = vadd.f32 1.0, %v7655_v50 }
 0xbee   :  { %v4347_v8 = vadd.f32 1.0, %v7657_v43  ;;  %v7659_v4 = vpop.eup %7658 }
 0xbef   :  { %7662 = vrcp.f32 %v4341_v13  ;;  %v7661_v55 = vpop.eup %7660  ;;  %v4354_v61 = vadd.f32 1.0, %v7659_v4 }
 0xbf0   :  { %7664 = vrcp.f32 %v4347_v8 }
 0xbf1   :  { %7666 = vrcp.f32 %v4354_v61 }
 0xbf9   :  { %v7663_v2 = vpop.eup %7662 }
 0xbfa   :  { %v7665_v48 = vpop.eup %7664  ;;  %v4358_v3 = vmul.f32 %v7663_v2, %v7661_v55 }
 0xbfb   :  { %v4357_v16 = vmul.f32 %v7665_v48, %v9266_v59  ;;  %v7667_v44 = vpop.eup %7666  ;;  %v4362_v59 = vrot.slane %v9212_v26, 6 }
 0xbfd   :  { %v9308_v17 = vadd.f32 %v4358_v3, %v4357_v16 }
 0xbff   :  { %7668 = vtanh.f32 %v9308_v17 }
 0xc09   :  { %v7669_v20 = vpop.eup %7668 }
 0xc0a   :  { %v4361_v41 = vmul.f32 %v7669_v20, %v7667_v44 }
 0xc0c   :  { %4435 = vmatmul.mubr.f32.vlgmr.msra.gmra.mrb[50].mxu0 %v4361_v41  ;;  %4506 = vmatmul.mubr.f32.vlgmr.msra.gmra.mrb[50].mxu1 %v4361_v41 }
 0xc0d   :  { %7049 = vmatpush1.bf16.msra.mxu0 %v9063_v49  ;;  %7081 = vmatpush1.bf16.msra.mxu1 %v9065_v63 }
 0xc0e   :  { %7051 = vmatprep.subr.bf16.mxu0 %v9067_v0  ;;  %7083 = vmatprep.subr.bf16.mxu1 %v9069_v19 }
 0xc0f   :  { %4600 = vmatprep.mubr.f32.mxu0 %v9717_v9  ;;  %4671 = vmatprep.mubr.f32.mxu1 %v9717_v9 }
 0xc11   :  { %7053 = vmatpush1.bf16.msra.mxu0 %v9073_v33  ;;  %7085 = vmatpush1.bf16.msra.mxu1 %v9075_v31 }
 0xc12   :  { %7055 = vmatprep.subr.bf16.mxu0 %v9077_v10  ;;  %7087 = vmatprep.subr.bf16.mxu1 %v9079_v54 }
 0xc15   :  { %7057 = vmatpush1.bf16.msra.mxu0 %v9085_v15  ;;  %7089 = vmatpush1.bf16.msra.mxu1 %v9087_v52 }
 0xc16   :  { %7059 = vmatprep.subr.bf16.mxu0 %v9091_v56  ;;  %7091 = vmatprep.subr.bf16.mxu1 %v9093_v53 }
 0xc19   :  { %7061 = vmatpush1.bf16.msra.mxu0 %v9099_v58  ;;  %7093 = vmatpush1.bf16.msra.mxu1 %v9101_v51 }
 0xc1a   :  { %7063 = vmatprep.subr.bf16.mxu0 %v9105_v28  ;;  %7095 = vmatprep.subr.bf16.mxu1 %v9107_v24 }
 0xc1d   :  { %7065 = vmatpush1.bf16.msra.mxu0 %v9111_v30  ;;  %7097 = vmatpush1.bf16.msra.mxu1 %v9113_v6 }
 0xc1e   :  { %7067 = vmatprep.subr.bf16.mxu0 %v9117_v45  ;;  %7099 = vmatprep.subr.bf16.mxu1 %v9119_v32 }
 0xc21   :  { %7069 = vmatpush1.bf16.msra.mxu0 %v9123_v5  ;;  %7101 = vmatpush1.bf16.msra.mxu1 %v9125_v25 }
 0xc22   :  { %7071 = vmatprep.subr.bf16.mxu0 %v9129_v29  ;;  %7103 = vmatprep.subr.bf16.mxu1 %v9131_v35 }
 0xc25   :  { %7073 = vmatpush1.bf16.msra.mxu0 %v9135_v14  ;;  %7105 = vmatpush1.bf16.msra.mxu1 %v9137_v60 }
 0xc26   :  { %7075 = vmatprep.subr.bf16.mxu0 %v9141_v21  ;;  %7107 = vmatprep.subr.bf16.mxu1 %v9143_v57 }
 0xc29   :  { %7077 = vmatpush1.bf16.msra.mxu0 %v9147_v42  ;;  %7109 = vmatpush1.bf16.msra.mxu1 %v9149_v47 }
 0xc2a   :  { %7111 = vmatprep.subr.bf16.mxu0 %v9047_v40  ;;  %7143 = vmatprep.subr.bf16.mxu1 %v9049_v62 }
 0xcdf   :  { %v4436_v36 = vpop.f32.mrb[50].mxu0  ;;  %v4507_v37 = vpop.f32.mrb[50].mxu1 }
 0xce0   :  { %v4437_v22 = vadd.f32 %v4436_v36, %v4362_v59  ;;  %v4508_v23 = vadd.f32 %v4507_v37, %v4364_v27  ;;  %v4438_v50 = vpop.f32.mrb[51].mxu0  ;;  %v4509_v43 = vpop.f32.mrb[51].mxu1 }
 0xce1   :  { %v4439_v13 = vadd.f32 %v4438_v50, %v4363_v1  ;;  %v4510_v8 = vadd.f32 %v4509_v43, %v4365_v12 }
 0xce2   :  { %v5501_v4 = vmul.f32 -1.442695, %v4437_v22 }
 0xce3   :  { %v5502_v55 = vmul.f32 -1.442695, %v4439_v13  ;;  %v5503_v2 = vmul.f32 -1.442695, %v4510_v8 }
 0xce4   :  { %7670 = vpow2.f32 %v5501_v4 }
 0xce5   :  { %7672 = vpow2.f32 %v5502_v55 }
 0xce6   :  { %7674 = vpow2.f32 %v5503_v2 }
 0xce7   :  { %7676 = vtanh.f32 %v4508_v23 }
 0xcee   :  { %v7671_v26 = vpop.eup %7670 }
 0xcef   :  { %v7673_v48 = vpop.eup %7672  ;;  %v4515_v18 = vadd.f32 1.0, %v7671_v26 }
 0xcf0   :  { %v4521_v3 = vadd.f32 1.0, %v7673_v48  ;;  %v7675_v46 = vpop.eup %7674 }
 0xcf1   :  { %7678 = vrcp.f32 %v4515_v18  ;;  %v7677_v34 = vpop.eup %7676  ;;  %v4528_v20 = vadd.f32 1.0, %v7675_v46 }
 0xcf2   :  { %7680 = vrcp.f32 %v4521_v3 }
 0xcf3   :  { %7682 = vrcp.f32 %v4528_v20 }
 0xcfb   :  { %v7679_v61 = vpop.eup %7678 }
 0xcfc   :  { %v7681_v16 = vpop.eup %7680  ;;  %v4532_v44 = vmul.f32 %v7679_v61, %v7677_v34 }
 0xcfd   :  { %v4531_v41 = vmul.f32 %v7681_v16, %v9308_v17  ;;  %v7683_v27 = vpop.eup %7682 }
 0xcff   :  { %v9350_v59 = vadd.f32 %v4532_v44, %v4531_v41 }
 0xd01   :  { %7684 = vtanh.f32 %v9350_v59 }
 0xd0b   :  { %v7685_v36 = vpop.eup %7684 }
 0xd0c   :  { %v4535_v37 = vmul.f32 %v7685_v36, %v7683_v27 }
 0xd0e   :  { %4601 = vmatmul.mubr.f32.vlgmr.msra.gmra.mrb[52].mxu0 %v4535_v37  ;;  %4672 = vmatmul.mubr.f32.vlgmr.msra.gmra.mrb[52].mxu1 %v4535_v37 }
 0xd0f   :  { %7113 = vmatpush1.bf16.msra.mxu0 %v9063_v49  ;;  %7145 = vmatpush1.bf16.msra.mxu1 %v9065_v63 }
 0xd10   :  { %7115 = vmatprep.subr.bf16.mxu0 %v9067_v0  ;;  %7147 = vmatprep.subr.bf16.mxu1 %v9069_v19 }
 0xd11   :  { %4778 = vmatprep.mubr.f32.mxu0 %v9717_v9  ;;  %4849 = vmatprep.mubr.f32.mxu1 %v9717_v9 }
 0xd13   :  { %7117 = vmatpush1.bf16.msra.mxu0 %v9073_v33  ;;  %7149 = vmatpush1.bf16.msra.mxu1 %v9075_v31 }
 0xd14   :  { %7119 = vmatprep.subr.bf16.mxu0 %v9077_v10  ;;  %7151 = vmatprep.subr.bf16.mxu1 %v9079_v54 }
 0xd17   :  { %7121 = vmatpush1.bf16.msra.mxu0 %v9085_v15  ;;  %7153 = vmatpush1.bf16.msra.mxu1 %v9087_v52 }
 0xd18   :  { %7123 = vmatprep.subr.bf16.mxu0 %v9091_v56  ;;  %7155 = vmatprep.subr.bf16.mxu1 %v9093_v53 }
 0xd1b   :  { %7125 = vmatpush1.bf16.msra.mxu0 %v9099_v58  ;;  %7157 = vmatpush1.bf16.msra.mxu1 %v9101_v51 }
 0xd1c   :  { %7127 = vmatprep.subr.bf16.mxu0 %v9105_v28  ;;  %7159 = vmatprep.subr.bf16.mxu1 %v9107_v24 }
 0xd1f   :  { %7129 = vmatpush1.bf16.msra.mxu0 %v9111_v30  ;;  %7161 = vmatpush1.bf16.msra.mxu1 %v9113_v6 }
 0xd20   :  { %7131 = vmatprep.subr.bf16.mxu0 %v9117_v45  ;;  %7163 = vmatprep.subr.bf16.mxu1 %v9119_v32 }
 0xd23   :  { %7133 = vmatpush1.bf16.msra.mxu0 %v9123_v5  ;;  %7165 = vmatpush1.bf16.msra.mxu1 %v9125_v25 }
 0xd24   :  { %7135 = vmatprep.subr.bf16.mxu0 %v9129_v29  ;;  %7167 = vmatprep.subr.bf16.mxu1 %v9131_v35 }
 0xd27   :  { %7137 = vmatpush1.bf16.msra.mxu0 %v9135_v14  ;;  %7169 = vmatpush1.bf16.msra.mxu1 %v9137_v60 }
 0xd28   :  { %7139 = vmatprep.subr.bf16.mxu0 %v9141_v21  ;;  %7171 = vmatprep.subr.bf16.mxu1 %v9143_v57 }
 0xd2b   :  { %7141 = vmatpush1.bf16.msra.mxu0 %v9147_v42  ;;  %7173 = vmatpush1.bf16.msra.mxu1 %v9149_v47 }
 0xd2c   :  { %7175 = vmatprep.subr.bf16.mxu0 %v9047_v40  ;;  %7207 = vmatprep.subr.bf16.mxu1 %v9049_v62 }
 0xde1   :  { %v4602_v17 = vpop.f32.mrb[52].mxu0  ;;  %v4673_v1 = vpop.f32.mrb[52].mxu1 }
 0xde2   :  { %v4603_v12 = vadd.f32 %v4602_v17, %v9204_v38  ;;  %v4604_v22 = vpop.f32.mrb[53].mxu0  ;;  %v4675_v23 = vpop.f32.mrb[53].mxu1  ;;  %v4674_v55 = vadd.f32 %v4673_v1, %v9206_v11 }
 0xde3   :  { %v4605_v50 = vadd.f32 %v4604_v22, %v9208_v7  ;;  %v4676_v8 = vadd.f32 %v4675_v23, %v9210_v39 }
 0xde4   :  { %v5504_v43 = vmul.f32 -1.442695, %v4603_v12  ;;  %v4707_v12 = vrot.slane %v9208_v7, 2 }
 0xde5   :  { %v5505_v13 = vmul.f32 -1.442695, %v4605_v50  ;;  %v5506_v4 = vmul.f32 -1.442695, %v4676_v8 }
 0xde6   :  { %7686 = vpow2.f32 %v5504_v43 }
 0xde7   :  { %7688 = vpow2.f32 %v5505_v13 }
 0xde8   :  { %7690 = vpow2.f32 %v5506_v4  ;;  %v4709_v4 = vrot.slane %v9210_v39, 2 }
 0xde9   :  { %7692 = vtanh.f32 %v4674_v55 }
 0xdf0   :  { %v7687_v2 = vpop.eup %7686 }
 0xdf1   :  { %v7689_v26 = vpop.eup %7688  ;;  %v4681_v48 = vadd.f32 1.0, %v7687_v2 }
 0xdf2   :  { %v4687_v18 = vadd.f32 1.0, %v7689_v26  ;;  %v7691_v3 = vpop.eup %7690 }
 0xdf3   :  { %7694 = vrcp.f32 %v4681_v48  ;;  %v7693_v46 = vpop.eup %7692  ;;  %v4694_v44 = vadd.f32 1.0, %v7691_v3 }
 0xdf4   :  { %7696 = vrcp.f32 %v4687_v18 }
 0xdf5   :  { %7698 = vrcp.f32 %v4694_v44 }
 0xdfd   :  { %v7695_v34 = vpop.eup %7694 }
 0xdfe   :  { %v7697_v61 = vpop.eup %7696  ;;  %v4698_v16 = vmul.f32 %v7695_v34, %v7693_v46 }
 0xdff   :  { %v4697_v20 = vmul.f32 %v7697_v61, %v9350_v59  ;;  %v7699_v27 = vpop.eup %7698  ;;  %v4706_v59 = vrot.slane %v9204_v38, 2 }
 0xe01   :  { %v9392_v41 = vadd.f32 %v4698_v16, %v4697_v20 }
 0xe03   :  { %7700 = vtanh.f32 %v9392_v41 }
 0xe0d   :  { %v7701_v36 = vpop.eup %7700 }
 0xe0e   :  { %v4701_v37 = vmul.f32 %v7701_v36, %v7699_v27 }
 0xe10   :  { %4779 = vmatmul.mubr.f32.vlgmr.msra.gmra.mrb[54].mxu0 %v4701_v37  ;;  %4850 = vmatmul.mubr.f32.vlgmr.msra.gmra.mrb[54].mxu1 %v4701_v37 }
 0xe11   :  { %7177 = vmatpush1.bf16.msra.mxu0 %v9063_v49  ;;  %7209 = vmatpush1.bf16.msra.mxu1 %v9065_v63 }
 0xe12   :  { %7179 = vmatprep.subr.bf16.mxu0 %v9067_v0  ;;  %7211 = vmatprep.subr.bf16.mxu1 %v9069_v19 }
 0xe13   :  { %4952 = vmatprep.mubr.f32.mxu0 %v9717_v9  ;;  %5023 = vmatprep.mubr.f32.mxu1 %v9717_v9 }
 0xe15   :  { %7181 = vmatpush1.bf16.msra.mxu0 %v9073_v33  ;;  %7213 = vmatpush1.bf16.msra.mxu1 %v9075_v31 }
 0xe16   :  { %7183 = vmatprep.subr.bf16.mxu0 %v9077_v10  ;;  %7215 = vmatprep.subr.bf16.mxu1 %v9079_v54 }
 0xe19   :  { %7185 = vmatpush1.bf16.msra.mxu0 %v9085_v15  ;;  %7217 = vmatpush1.bf16.msra.mxu1 %v9087_v52 }
 0xe1a   :  { %7187 = vmatprep.subr.bf16.mxu0 %v9091_v56  ;;  %7219 = vmatprep.subr.bf16.mxu1 %v9093_v53 }
 0xe1d   :  { %7189 = vmatpush1.bf16.msra.mxu0 %v9099_v58  ;;  %7221 = vmatpush1.bf16.msra.mxu1 %v9101_v51 }
 0xe1e   :  { %7191 = vmatprep.subr.bf16.mxu0 %v9105_v28  ;;  %7223 = vmatprep.subr.bf16.mxu1 %v9107_v24 }
 0xe21   :  { %7193 = vmatpush1.bf16.msra.mxu0 %v9111_v30  ;;  %7225 = vmatpush1.bf16.msra.mxu1 %v9113_v6 }
 0xe22   :  { %7195 = vmatprep.subr.bf16.mxu0 %v9117_v45  ;;  %7227 = vmatprep.subr.bf16.mxu1 %v9119_v32 }
 0xe25   :  { %7197 = vmatpush1.bf16.msra.mxu0 %v9123_v5  ;;  %7229 = vmatpush1.bf16.msra.mxu1 %v9125_v25 }
 0xe26   :  { %7199 = vmatprep.subr.bf16.mxu0 %v9129_v29  ;;  %7231 = vmatprep.subr.bf16.mxu1 %v9131_v35 }
 0xe29   :  { %7201 = vmatpush1.bf16.msra.mxu0 %v9135_v14  ;;  %7233 = vmatpush1.bf16.msra.mxu1 %v9137_v60 }
 0xe2a   :  { %7203 = vmatprep.subr.bf16.mxu0 %v9141_v21  ;;  %7235 = vmatprep.subr.bf16.mxu1 %v9143_v57 }
 0xe2d   :  { %7205 = vmatpush1.bf16.msra.mxu0 %v9147_v42  ;;  %7237 = vmatpush1.bf16.msra.mxu1 %v9149_v47 }
 0xe2e   :  { %7239 = vmatprep.subr.bf16.mxu0 %v9047_v40  ;;  %7271 = vmatprep.subr.bf16.mxu1 %v9049_v62  ;;  %v4708_v40 = vrot.slane %v9206_v11, 2 }
 0xee3   :  { %v4780_v17 = vpop.f32.mrb[54].mxu0  ;;  %v4851_v1 = vpop.f32.mrb[54].mxu1 }
 0xee4   :  { %v4781_v22 = vadd.f32 %v4780_v17, %v4706_v59  ;;  %v4782_v23 = vpop.f32.mrb[55].mxu0  ;;  %v4853_v50 = vpop.f32.mrb[55].mxu1  ;;  %v4852_v2 = vadd.f32 %v4851_v1, %v4708_v40  ;;  %v5229_v1 = vld [vmem:[#allocation14 + $0x8] sm:$0xff]  ;;  %v5235_v40 = vld [vmem:[#allocation14 + $0x38] sm:$0xff] }
 0xee5   :  { %v4783_v43 = vadd.f32 %v4782_v23, %v4707_v12  ;;  %v4854_v55 = vadd.f32 %v4853_v50, %v4709_v4  ;;  %v5230_v23 = vld [vmem:[#allocation14 + $0x10] sm:$0xff]  ;;  %v5231_v50 = vld [vmem:[#allocation14 + $0x18] sm:$0xff] }
 0xee6   :  { %v5507_v13 = vmul.f32 -1.442695, %v4781_v22  ;;  %v7949_v22 = vmov 0.0|0.0  }
 0xee7   :  { %v5508_v8 = vmul.f32 -1.442695, %v4783_v43  ;;  %v5509_v62 = vmul.f32 -1.442695, %v4854_v55  ;;  %v7306_v43 = vpack.c.bf16 %v5231_v50, %v5230_v23  ;;  %v5234_v55 = vld [vmem:[#allocation14 + $0x30] sm:$0xff] }
 0xee8   :  { %7702 = vpow2.f32 %v5507_v13  ;;  %v5232_v13 = vld [vmem:[#allocation14 + $0x20] sm:$0xff] }
 0xee9   :  { %7704 = vpow2.f32 %v5508_v8  ;;  %v5233_v8 = vld [vmem:[#allocation14 + $0x28] sm:$0xff] }
 0xeea   :  { %7706 = vpow2.f32 %v5509_v62  ;;  %v7309_v4 = vpack.c.bf16 %v5233_v8, %v5232_v13  ;;  %v7312_v62 = vpack.c.bf16 %v5235_v40, %v5234_v55 }
 0xeeb   :  { %7708 = vtanh.f32 %v4852_v2  ;;  %v5236_v2 = vld [vmem:[#allocation14 + $0x40] sm:$0xff] }
 0xef2   :  { %v7703_v26 = vpop.eup %7702 }
 0xef3   :  { %v7705_v48 = vpop.eup %7704  ;;  %v4859_v18 = vadd.f32 1.0, %v7703_v26  ;;  %v5237_v26 = vld [vmem:[#allocation14 + $0x48] sm:$0xff] }
 0xef4   :  { %v4865_v3 = vadd.f32 1.0, %v7705_v48  ;;  %v7707_v46 = vpop.eup %7706  ;;  %v7315_v48 = vpack.c.bf16 %v5237_v26, %v5236_v2  ;;  %v5336_v2 = vld [vmem:[%s9578_s12 + $0x70] sm:$0xff]  ;;  %v5337_v26 = vld [vmem:[%s9578_s12 + $0x78] sm:$0xff] }
 0xef5   :  { %7710 = vrcp.f32 %v4859_v18  ;;  %v7709_v34 = vpop.eup %7708  ;;  %v4872_v20 = vadd.f32 1.0, %v7707_v46  ;;  %v5238_v18 = vld [vmem:[#allocation14 + $0x50] sm:$0xff]  ;;  %v5240_v46 = vld [vmem:[#allocation14 + $0x60] sm:$0xff] }
 0xef6   :  { %7712 = vrcp.f32 %v4865_v3  ;;  %v5239_v3 = vld [vmem:[#allocation14 + $0x58] sm:$0xff] }
 0xef7   :  { %7714 = vrcp.f32 %v4872_v20  ;;  %v5243_v20 = vld [vmem:[#allocation14 + $0x78] sm:$0xff] }
 0xeff   :  { %v7711_v61 = vpop.eup %7710 }
 0xf00   :  { %v7713_v16 = vpop.eup %7712  ;;  %v4876_v44 = vmul.f32 %v7711_v61, %v7709_v34  ;;  %v7318_v34 = vpack.c.bf16 %v5239_v3, %v5238_v18  ;;  %v5241_v61 = vld [vmem:[#allocation14 + $0x68] sm:$0xff] }
 0xf01   :  { %v4875_v27 = vmul.f32 %v7713_v16, %v9392_v41  ;;  %v7715_v37 = vpop.eup %7714  ;;  %v5228_v41 = vld [vmem:[#allocation14] sm:$0xff]  ;;  %v7321_v16 = vpack.c.bf16 %v5241_v61, %v5240_v46  ;;  %v5517_v61 = vld [vmem:[%s9579_s13] ss:$0 sm:$0xff] }
 0xf02   :  { %v7303_v12 = vpack.c.bf16 %v5229_v1, %v5228_v41 }
 0xf03   :  { %v9434_v36 = vadd.f32 %v4876_v44, %v4875_v27  ;;  %v5242_v44 = vld [vmem:[#allocation14 + $0x70] sm:$0xff] }
 0xf04   :  { %v7324_v27 = vpack.c.bf16 %v5243_v20, %v5242_v44 }
 0xf05   :  { %7716 = vtanh.f32 %v9434_v36 }
 0xf0f   :  { %v7717_v59 = vpop.eup %7716 }
 0xf10   :  { %v4879_v17 = vmul.f32 %v7717_v59, %v7715_v37  ;;  %v5323_v37 = vld [vmem:[%s9578_s12 + $0x8] sm:$0xff] }
 0xf12   :  { %4953 = vmatmul.mubr.f32.vlgmr.msra.gmra.mrb[56].mxu0 %v4879_v17  ;;  %5024 = vmatmul.mubr.f32.vlgmr.msra.gmra.mrb[56].mxu1 %v4879_v17  ;;  %v5325_v17 = vld [vmem:[%s9578_s12 + $0x18] sm:$0xff] }
 0xf13   :  { %7241 = vmatpush1.bf16.msra.mxu0 %v9063_v49  ;;  %7273 = vmatpush1.bf16.msra.mxu1 %v9065_v63  ;;  %v4880_v49 = vrot.slane %v9204_v38, 4 }
 0xf14   :  { %7243 = vmatprep.subr.bf16.mxu0 %v9067_v0  ;;  %7275 = vmatprep.subr.bf16.mxu1 %v9069_v19  ;;  %v4881_v19 = vrot.slane %v9208_v7, 4 }
 0xf15   :  { %5126 = vmatprep.mubr.f32.mxu0 %v9717_v9  ;;  %5197 = vmatprep.mubr.f32.mxu1 %v9717_v9 }
 0xf17   :  { %7245 = vmatpush1.bf16.msra.mxu0 %v9073_v33  ;;  %7277 = vmatpush1.bf16.msra.mxu1 %v9075_v31 }
 0xf18   :  { %7247 = vmatprep.subr.bf16.mxu0 %v9077_v10  ;;  %7279 = vmatprep.subr.bf16.mxu1 %v9079_v54 }
 0xf1b   :  { %7249 = vmatpush1.bf16.msra.mxu0 %v9085_v15  ;;  %7281 = vmatpush1.bf16.msra.mxu1 %v9087_v52 }
 0xf1c   :  { %7251 = vmatprep.subr.bf16.mxu0 %v9091_v56  ;;  %7283 = vmatprep.subr.bf16.mxu1 %v9093_v53  ;;  %v4883_v56 = vrot.slane %v9210_v39, 4 }
 0xf1f   :  { %7253 = vmatpush1.bf16.msra.mxu0 %v9099_v58  ;;  %7285 = vmatpush1.bf16.msra.mxu1 %v9101_v51  ;;  %v4882_v58 = vrot.slane %v9206_v11, 4 }
 0xf20   :  { %7255 = vmatprep.subr.bf16.mxu0 %v9105_v28  ;;  %7287 = vmatprep.subr.bf16.mxu1 %v9107_v24 }
 0xf23   :  { %7257 = vmatpush1.bf16.msra.mxu0 %v9111_v30  ;;  %7289 = vmatpush1.bf16.msra.mxu1 %v9113_v6 }
 0xf24   :  { %7259 = vmatprep.subr.bf16.mxu0 %v9117_v45  ;;  %7291 = vmatprep.subr.bf16.mxu1 %v9119_v32 }
 0xf27   :  { %7261 = vmatpush1.bf16.msra.mxu0 %v9123_v5  ;;  %7293 = vmatpush1.bf16.msra.mxu1 %v9125_v25 }
 0xf28   :  { %7263 = vmatprep.subr.bf16.mxu0 %v9129_v29  ;;  %7295 = vmatprep.subr.bf16.mxu1 %v9131_v35 }
 0xf2b   :  { %7265 = vmatpush1.bf16.msra.mxu0 %v9135_v14  ;;  %7297 = vmatpush1.bf16.msra.mxu1 %v9137_v60 }
 0xf2c   :  { %7267 = vmatprep.subr.bf16.mxu0 %v9141_v21  ;;  %7299 = vmatprep.subr.bf16.mxu1 %v9143_v57 }
 0xf2f   :  { %7269 = vmatpush1.bf16.msra.mxu0 %v9147_v42  ;;  %7301 = vmatpush1.bf16.msra.mxu1 %v9149_v47 }
 0xf30   :  { %7302 = vmatprep.subr.bf16.mxu0 %v7949_v22  ;;  %7326 = vmatprep.subr.bf16.mxu1 %v7949_v22 }
 0xfe5   :  { %v4954_v63 = vpop.f32.mrb[56].mxu0  ;;  %v5025_v0 = vpop.f32.mrb[56].mxu1 }
 0xfe6   :  { %v4955_v33 = vadd.f32 %v4954_v63, %v4880_v49  ;;  %v4956_v31 = vpop.f32.mrb[57].mxu0  ;;  %v5027_v10 = vpop.f32.mrb[57].mxu1  ;;  %v5026_v28 = vadd.f32 %v5025_v0, %v4882_v58  ;;  %v5326_v63 = vld [vmem:[%s9578_s12 + $0x20] sm:$0xff]  ;;  %v5327_v0 = vld [vmem:[%s9578_s12 + $0x28] sm:$0xff] }
 0xfe7   :  { %v4957_v54 = vadd.f32 %v4956_v31, %v4881_v19  ;;  %v5028_v53 = vadd.f32 %v5027_v10, %v4883_v56  ;;  %v7333_v19 = vpack.c.bf16 %v5327_v0, %v5326_v63  ;;  %v5329_v31 = vld [vmem:[%s9578_s12 + $0x38] sm:$0xff]  ;;  %v5332_v56 = vld [vmem:[%s9578_s12 + $0x50] sm:$0xff] }
 0xfe8   :  { %v5510_v15 = vmul.f32 -1.442695, %v4955_v33  ;;  %v5328_v33 = vld [vmem:[%s9578_s12 + $0x30] sm:$0xff] }
 0xfe9   :  { %v5511_v52 = vmul.f32 -1.442695, %v4957_v54  ;;  %v5512_v51 = vmul.f32 -1.442695, %v5028_v53  ;;  %v7336_v10 = vpack.c.bf16 %v5329_v31, %v5328_v33  ;;  %v5330_v54 = vld [vmem:[%s9578_s12 + $0x40] sm:$0xff]  ;;  %v5333_v53 = vld [vmem:[%s9578_s12 + $0x58] sm:$0xff] }
 0xfea   :  { %7718 = vpow2.f32 %v5510_v15  ;;  %v5331_v15 = vld [vmem:[%s9578_s12 + $0x48] sm:$0xff]  ;;  %v7342_v58 = vpack.c.bf16 %v5333_v53, %v5332_v56 }
 0xfeb   :  { %7720 = vpow2.f32 %v5511_v52  ;;  %v7339_v52 = vpack.c.bf16 %v5331_v15, %v5330_v54 }
 0xfec   :  { %7722 = vpow2.f32 %v5512_v51  ;;  %v5334_v51 = vld [vmem:[%s9578_s12 + $0x60] sm:$0xff] }
 0xfed   :  { %7724 = vtanh.f32 %v5026_v28  ;;  %v5335_v28 = vld [vmem:[%s9578_s12 + $0x68] sm:$0xff] }
 0xff4   :  { %v7719_v24 = vpop.eup %7718 }
 0xff5   :  { %v7721_v30 = vpop.eup %7720  ;;  %v5033_v6 = vadd.f32 1.0, %v7719_v24  ;;  %v7345_v24 = vpack.c.bf16 %v5335_v28, %v5334_v51 }
 0xff6   :  { %v5039_v45 = vadd.f32 1.0, %v7721_v30  ;;  %v7723_v32 = vpop.eup %7722  ;;  %v5054_v30 = vrot.slane %v9204_v38, 6 }
 0xff7   :  { %7726 = vrcp.f32 %v5033_v6  ;;  %v7725_v5 = vpop.eup %7724  ;;  %v5046_v14 = vadd.f32 1.0, %v7723_v32  ;;  %v5055_v32 = vrot.slane %v9208_v7, 6 }
 0xff8   :  { %7728 = vrcp.f32 %v5039_v45 }
 0xff9   :  { %7730 = vrcp.f32 %v5046_v14 }
0x1001   :  { %v7727_v25 = vpop.eup %7726 }
0x1002   :  { %v7729_v29 = vpop.eup %7728  ;;  %v5050_v35 = vmul.f32 %v7727_v25, %v7725_v5 }
0x1003   :  { %v5049_v60 = vmul.f32 %v7729_v29, %v9434_v36  ;;  %v7731_v57 = vpop.eup %7730  ;;  %v5322_v36 = vld [vmem:[%s9578_s12] sm:$0xff] }
0x1004   :  { %v7327_v59 = vpack.c.bf16 %v5323_v37, %v5322_v36 }
0x1005   :  { %v9474_v21 = vadd.f32 %v5050_v35, %v5049_v60 }
0x1007   :  { %7732 = vtanh.f32 %v9474_v21 }
0x1011   :  { %v7733_v42 = vpop.eup %7732 }
0x1012   :  { %v5053_v47 = vmul.f32 %v7733_v42, %v7731_v57  ;;  %v5057_v57 = vrot.slane %v9210_v39, 6 }
0x1014   :  { %5127 = vmatmul.mubr.f32.vlgmr.msra.gmra.mrb[58].mxu0 %v5053_v47  ;;  %5198 = vmatmul.mubr.f32.vlgmr.msra.gmra.mrb[58].mxu1 %v5053_v47  ;;  %v5056_v47 = vrot.slane %v9206_v11, 6 }
0x1015   :  { %7304 = vmatpush3.bf16.msra.mxu0 %v7303_v12  ;;  %5584 = vmatprep.mubr.msk.f32.mxu0 %vm7950_vm1, %v9717_v9 }
0x1016   :  { %7305 = vmatprep.subr.bf16.mxu0 %v7949_v22  ;;  %5619 = vmatprep.mubr.msk.f32.mxu1 %vm7950_vm1, %v9717_v9  ;;  %v5324_v9 = vld [vmem:[%s9578_s12 + $0x10] sm:$0xff]  ;;  %s7904_s12 = scalar_lea.vmem %s5424_s30, 32 }
0x1017   :  { %7328 = vmatpush3.bf16.msra.mxu1 %v7327_v59  ;;  %v7330_v49 = vpack.c.bf16 %v5325_v17, %v5324_v9  ;;  %p7905_p0 = scmp.ne.s32.totalorder %s5424_s30, %s7904_s12  ;;  %p7910_p2 = scmp.lt.s32.totalorder %s7904_s12, %s7904_s12 }
0x1018   :  { %7329 = vmatprep.subr.bf16.mxu1 %v7949_v22 }
0x1019   :  { %7307 = vmatpush3.bf16.msra.mxu0 %v7306_v43  ;;  %p7911_p3 = por %p7910_p2, %p7909_p1 }
0x101a   :  { %7308 = vmatprep.subr.bf16.mxu0 %v7949_v22 }
0x101b   :  { %7331 = vmatpush3.bf16.msra.mxu1 %v7330_v49  ;;  %p7912_p4 = pnand %p7911_p3, %p7905_p0 }
0x101c   :  { %7332 = vmatprep.subr.bf16.mxu1 %v7949_v22 }
0x101d   :  { %7310 = vmatpush3.bf16.msra.mxu0 %v7309_v4 }
0x101e   :  { %7311 = vmatprep.subr.bf16.mxu0 %v7949_v22 }
0x101f   :  { %7334 = vmatpush3.bf16.msra.mxu1 %v7333_v19 }
0x1020   :  { %7335 = vmatprep.subr.bf16.mxu1 %v7949_v22 }
0x1021   :  { %7313 = vmatpush3.bf16.msra.mxu0 %v7312_v62 }
0x1022   :  { %7314 = vmatprep.subr.bf16.mxu0 %v7949_v22 }
0x1023   :  { %7337 = vmatpush3.bf16.msra.mxu1 %v7336_v10 }
0x1024   :  { %7338 = vmatprep.subr.bf16.mxu1 %v7949_v22 }
0x1025   :  { %7316 = vmatpush3.bf16.msra.mxu0 %v7315_v48  ;;  %v7348_v48 = vpack.c.bf16 %v5337_v26, %v5336_v2 }
0x1026   :  { %7317 = vmatprep.subr.bf16.mxu0 %v7949_v22 }
0x1027   :  { %7340 = vmatpush3.bf16.msra.mxu1 %v7339_v52 }
0x1028   :  { %7341 = vmatprep.subr.bf16.mxu1 %v7949_v22 }
0x1029   :  { %7319 = vmatpush3.bf16.msra.mxu0 %v7318_v34 }
0x102a   :  { %7320 = vmatprep.subr.bf16.mxu0 %v7949_v22 }
0x102b   :  { %7343 = vmatpush3.bf16.msra.mxu1 %v7342_v58 }
0x102c   :  { %7344 = vmatprep.subr.bf16.mxu1 %v7949_v22 }
0x102d   :  { %7322 = vmatpush3.bf16.msra.mxu0 %v7321_v16 }
0x102e   :  { %7323 = vmatprep.subr.bf16.mxu0 %v7949_v22 }
0x102f   :  { %7346 = vmatpush3.bf16.msra.mxu1 %v7345_v24 }
0x1030   :  { %7347 = vmatprep.subr.bf16.mxu1 %v7949_v22 }
0x1031   :  { %7325 = vmatpush3.bf16.msra.mxu0 %v7324_v27 }
0x1033   :  { %7349 = vmatpush3.bf16.msra.mxu1 %v7348_v48 }
0x10e7   :  { %v5128_v6 = vpop.f32.mrb[58].mxu0  ;;  %v5199_v45 = vpop.f32.mrb[58].mxu1 }
0x10e8   :  { %v5129_v5 = vadd.f32 %v5128_v6, %v5054_v30  ;;  %v5130_v25 = vpop.f32.mrb[59].mxu0  ;;  %v5201_v29 = vpop.f32.mrb[59].mxu1  ;;  %v5200_v1 = vadd.f32 %v5199_v45, %v5056_v47 }
0x10e9   :  { %v5131_v35 = vadd.f32 %v5130_v25, %v5055_v32  ;;  %v5202_v42 = vadd.f32 %v5201_v29, %v5057_v57 }
0x10ea   :  { %v5513_v14 = vmul.f32 -1.442695, %v5129_v5 }
0x10eb   :  { %v5514_v60 = vmul.f32 -1.442695, %v5131_v35  ;;  %v5515_v41 = vmul.f32 -1.442695, %v5202_v42 }
0x10ec   :  { %7734 = vpow2.f32 %v5513_v14 }
0x10ed   :  { %7736 = vpow2.f32 %v5514_v60 }
0x10ee   :  { %7738 = vpow2.f32 %v5515_v41 }
0x10ef   :  { %7740 = vtanh.f32 %v5200_v1 }
0x10f6   :  { %v7735_v38 = vpop.eup %7734 }
0x10f7   :  { %v7737_v12 = vpop.eup %7736  ;;  %v5207_v22 = vadd.f32 1.0, %v7735_v38 }
0x10f8   :  { %v5213_v7 = vadd.f32 1.0, %v7737_v12  ;;  %v7739_v23 = vpop.eup %7738 }
0x10f9   :  { %7742 = vrcp.f32 %v5207_v22  ;;  %v7741_v50 = vpop.eup %7740  ;;  %v5220_v4 = vadd.f32 1.0, %v7739_v23 }
0x10fa   :  { %7744 = vrcp.f32 %v5213_v7 }
0x10fb   :  { %7746 = vrcp.f32 %v5220_v4 }
0x1103   :  { %v7743_v43 = vpop.eup %7742 }
0x1104   :  { %v7745_v13 = vpop.eup %7744  ;;  %v5224_v8 = vmul.f32 %v7743_v43, %v7741_v50 }
0x1105   :  { %v5223_v39 = vmul.f32 %v7745_v13, %v9474_v21  ;;  %v7747_v11 = vpop.eup %7746  ;;  %v5516_v21 = vld [vmem:[%s9577_s11] ss:$0 sm:$0xff] }
0x1107   :  { %v5225_v55 = vadd.f32 %v5224_v8, %v5223_v39 }
0x1109   :  { %7748 = vtanh.f32 %v5225_v55 }
0x1113   :  { %v7749_v40 = vpop.eup %7748 }
0x1114   :  { %v5227_v62 = vmul.f32 %v7749_v40, %v7747_v11 }
0x1116   :  { %5585 = vmatmul.mubr.f32.vlgmr.msra.gmra.mrb[60].mxu0 %v5227_v62 }
0x11e9   :  { %v5317_v18 = vpop.f32.mrb[60].mxu0 }
0x11ea   :  { %v5318_v3 = vadd.f32 %v5516_v21, %v5317_v18  ;;  %v5586_v46 = vpop.f32.mrb[61].mxu0 }
0x11ec   :  { %v5321_v34 = vmax.f32 %v5318_v3, 0.0 }
0x11ee   :  { %5620 = vmatmul.mubr.f32.vlgmr.msra.gmra.mrb[60].mxu1 %v5321_v34 }
0x12c1   :  { %v5411_v16 = vpop.f32.mrb[60].mxu1 }
0x12c2   :  { %v5412_v44 = vadd.f32 %v5517_v61, %v5411_v16  ;;  %v5621_v20 = vpop.f32.mrb[61].mxu1 }
0x12c4   :  { %5416 = vst.msk [vmem:[#allocation15] sm:$0x3] %vm5415_vm2, %v5412_v44 }
0x12c5   :  { %7915 = shalt.err (!%p7912_p4)
}
0x12c6   :  { %s7916_s2 = scalar_lea.hbm %s9580_s14, 32 }
0x12c7   :  { %p7917_p5 = scmp.ne.s32.totalorder %s9580_s14, %s7916_s2  ;;  %p7920_p6 = scmp.lt.u32.totalorder %s7916_s2, %s9580_s14 }
0x12c9   :  { %p7922_p7 = pnand %p7920_p6, %p7917_p5 }
0x12cb   :  { %7925 = shalt.err (!%p7922_p7)
}
0x12cc   :  { %5426 = dma.vmem_to_hbm [thread:$0]  %s5424_s30, 32, %s9580_s14, [#allocation5]  }
0x12cd   :  { %7934 = dma.done.wait [#allocation5], 32  }
0x12ce   :  { %7935 = vsyncadd [#allocation5], 4294967264 }
0x12cf   :  { %5430 = vsyncpa [#allocation4], 1 }
0x12d0   :  { %5431 = vsyncpa [#allocation7], 1 }
0x12d1   :  { %5432 = vsyncpa [#allocation10], 1 }
0x12d2   :  { %5433 = vsyncpa [#allocation13], 1 }
0x12d3   :  { %5434 = vsyncpa [#allocation5], 1 }

</bundles_post_ra>
